<compile_context>
chip_gen: v7x
topology: tpu7x:2x2x1
jax: 0.10.0
libtpu: 0.0.40
codegen_flags: <defaults>
</compile_context>

<pallas_src>
import jax
import jax.numpy as jnp
from jax.experimental import pallas as pl
from jax.experimental.pallas import tpu as pltpu

_LANE = 128  # lane width: pad class dim / input dim to a multiple of this


def _mlp_kernel(x_ref, w1_ref, w2_ref, w3_ref, w4_ref, b_ref, o_ref):
    # Four fused matmuls: bf16 operands, f32 accumulation on the MXU.
    # Bias-add + ReLU epilogues in f32 (VPU). Dropout (eval) = identity.
    h1 = w1_ref.shape[1]          # 512
    h2 = w2_ref.shape[1]          # 512
    h3 = w3_ref.shape[1]          # 256
    # Static, 128-aligned slices of the merged bias operand.
    b1 = b_ref[:, :h1]
    b2 = b_ref[:, h1:h1 + h2]
    b3 = b_ref[:, h1 + h2:h1 + h2 + h3]
    b4 = b_ref[:, h1 + h2 + h3:]

    h = jnp.dot(x_ref[...], w1_ref[...], preferred_element_type=jnp.float32)
    h = jnp.maximum(h + b1, 0.0)
    h = jnp.dot(h.astype(jnp.bfloat16), w2_ref[...],
                preferred_element_type=jnp.float32)
    h = jnp.maximum(h + b2, 0.0)
    h = jnp.dot(h.astype(jnp.bfloat16), w3_ref[...],
                preferred_element_type=jnp.float32)
    h = jnp.maximum(h + b3, 0.0)
    o = jnp.dot(h.astype(jnp.bfloat16), w4_ref[...],
                preferred_element_type=jnp.float32)
    o_ref[...] = (o + b4).astype(o_ref.dtype)


def mix_classification_big(x, params, *, batch_tile=None):
    """Fused MLP head.

    x: (B, 2*input_size) float32 (or bf16).
    params: dict with w1..w4 of shape (in, out) and b1..b4 of shape (1, out).
    Returns (B, n_classes) float32.
    """
    w1, b1 = params["w1"], params["b1"]
    w2, b2 = params["w2"], params["b2"]
    w3, b3 = params["w3"], params["b3"]
    w4, b4 = params["w4"], params["b4"]

    B, D_in = x.shape
    n_classes = w4.shape[1]

    # --- lane-dense output: pad class dim up to a multiple of 128 ----------
    n_pad = pl.cdiv(n_classes, _LANE) * _LANE
    if n_pad != n_classes:
        w4 = jnp.pad(w4, ((0, 0), (0, n_pad - n_classes)))
        b4 = jnp.pad(b4, ((0, 0), (0, n_pad - n_classes)))

    # --- lane-dense x / clean K on layer 1: zero-pad D_in to 128 -----------
    d_pad = pl.cdiv(D_in, _LANE) * _LANE
    if d_pad != D_in:
        x = jnp.pad(x, ((0, 0), (0, d_pad - D_in)))
        w1 = jnp.pad(w1, ((0, d_pad - D_in), (0, 0)))   # zero rows -> exact

    # --- batch tile: fill 256-row MXU when possible, keep grid >= 2 --------
    if batch_tile is None:
        batch_tile = 256 if B >= 512 else 128
    B_pad = pl.cdiv(B, batch_tile) * batch_tile
    if B_pad != B:
        x = jnp.pad(x, ((0, B_pad - B), (0, 0)))

    # bf16 matmul operands (wrapper-side cast so weights are DMA'd as bf16);
    # biases stay f32 for the f32 epilogue, merged into a single operand.
    x_bf = x.astype(jnp.bfloat16)
    w1, w2, w3, w4 = (w.astype(jnp.bfloat16) for w in (w1, w2, w3, w4))
    b_all = jnp.concatenate(
        [b.astype(jnp.float32).reshape(1, -1) for b in (b1, b2, b3, b4)],
        axis=1)   # (1, 512 + 512 + 256 + n_pad), all 128-aligned offsets

    flops = 2 * B_pad * (d_pad * 512 + 512 * 512 + 512 * 256 + 256 * n_pad)
    bytes_accessed = (
        x_bf.size * 2
        + sum(w.size * 2 for w in (w1, w2, w3, w4))
        + b_all.size * 4
        + B_pad * n_pad * 4
    )

    def build(single_buffer_consts):
        if single_buffer_consts:
            # Constant index_map -> operand is resident; single-buffer it to
            # halve its VMEM footprint and skip redundant buffer plumbing.
            const_spec = lambda a: pl.BlockSpec(
                a.shape, lambda i: (0, 0), pipeline_mode=pl.Buffered(1))
        else:
            const_spec = lambda a: pl.BlockSpec(a.shape, lambda i: (0, 0))
        return pl.pallas_call(
            _mlp_kernel,
            out_shape=jax.ShapeDtypeStruct((B_pad, n_pad), jnp.float32),
            grid_spec=pltpu.PrefetchScalarGridSpec(
                num_scalar_prefetch=0,
                grid=(B_pad // batch_tile,),
                in_specs=[
                    pl.BlockSpec((batch_tile, d_pad), lambda i: (i, 0)),  # x
                    const_spec(w1), const_spec(w2),
                    const_spec(w3), const_spec(w4),
                    const_spec(b_all),
                ],
                out_specs=pl.BlockSpec((batch_tile, n_pad), lambda i: (i, 0)),
            ),
            compiler_params=pltpu.CompilerParams(
                dimension_semantics=("parallel",),
            ),
            cost_estimate=pl.CostEstimate(
                flops=flops, transcendentals=0, bytes_accessed=bytes_accessed),
        )

    args = (x_bf, w1, w2, w3, w4, b_all)
    try:
        out = build(True)(*args)
    except Exception:
        # Fallback: some jax versions reject pipeline_mode=Buffered(1) on a
        # top-level pallas_call; default double-buffering is correct, just
        # uses ~0.9 MiB more VMEM.
        out = build(False)(*args)

    # slice padded rows / padded classes back off
    return out[:B, :n_classes]


def init_params(key, input_size, n_classes, dtype=jnp.float32):
    """Deterministic init mimicking nn.Linear default: U(-1/sqrt(fan_in), ...)."""
    dims = [2 * input_size, 512, 512, 256, n_classes]
    params = {}
    for idx in range(4):
        fan_in, fan_out = dims[idx], dims[idx + 1]
        key, kw, kb = jax.random.split(key, 3)
        bound = 1.0 / jnp.sqrt(fan_in)
        params[f"w{idx+1}"] = jax.random.uniform(
            kw, (fan_in, fan_out), dtype, minval=-bound, maxval=bound)
        params[f"b{idx+1}"] = jax.random.uniform(
            kb, (1, fan_out), dtype, minval=-bound, maxval=bound)
    return params


def reference_forward_f32(x, params):
    h = x
    for i in range(1, 4):
        h = jnp.maximum(h @ params[f"w{i}"] + params[f"b{i}"], 0.0)
    return h @ params["w4"] + params["b4"]


def reference_forward_bf16(x, params):
    # Mirrors the kernel's numerics: bf16 matmul operands, f32 accumulation.
    h = x.astype(jnp.bfloat16)
    for i in range(1, 4):
        h = jnp.dot(h, params[f"w{i}"].astype(jnp.bfloat16),
                    preferred_element_type=jnp.float32)
        h = jnp.maximum(h + params[f"b{i}"], 0.0).astype(jnp.bfloat16)
    return jnp.dot(h, params["w4"].astype(jnp.bfloat16),
                   preferred_element_type=jnp.float32) + params["b4"]


if __name__ == "__main__":
    input_size = 16      # -> Linear in_features = 2*input_size = 32
    n_classes = 16
    batch = 200          # ragged on purpose: pads to 256 -> grid of 2 tiles

    key = jax.random.PRNGKey(0)
    key, kx = jax.random.split(key)
    x = jax.random.normal(kx, (batch, 2 * input_size), jnp.float32)
    params = init_params(key, input_size, n_classes)

    out = mix_classification_big(x, params)
    out = jax.block_until_ready(out)
    assert out.shape == (batch, n_classes)

    # Numerics: tight vs. a bf16-mimicking reference, loose vs. pure f32.
    ref_bf16 = reference_forward_bf16(x, params)
    ref_f32 = reference_forward_f32(x, params)
    assert jnp.allclose(out, ref_bf16, atol=1e-2, rtol=1e-2), \
        "mismatch vs bf16-accumulate reference"
    assert jnp.allclose(out, ref_f32, atol=5e-2, rtol=5e-2), \
        "mismatch vs f32 reference"

    print("KERNEL_OK")
</pallas_src>

<mosaic_0001>
module attributes {stable_mosaic.version = 11 : i64} {
  func.func @_mlp_kernel(%arg0: i32, %arg1: memref<128x128xbf16, #tpu.memory_space<vmem>>, %arg2: memref<128x512xbf16, #tpu.memory_space<vmem>>, %arg3: memref<512x512xbf16, #tpu.memory_space<vmem>>, %arg4: memref<512x256xbf16, #tpu.memory_space<vmem>>, %arg5: memref<256x128xbf16, #tpu.memory_space<vmem>>, %arg6: memref<1x1408xf32, #tpu.memory_space<vmem>>, %arg7: memref<128x128xf32, #tpu.memory_space<vmem>>) attributes {dimension_semantics = [#tpu.dimension_semantics<parallel>], iteration_bounds = array<i64: 2>, scalar_prefetch = 0 : i64, scratch_operands = 0 : i64, tpu.core_type = #tpu.core_type<tc>, window_params = [{transform_indices = @transform_0, window_bounds = array<i64: 128, 128>}, {pipeline_mode = #tpu.pipeline_mode<synchronous>, transform_indices = @transform_1, window_bounds = array<i64: 128, 512>}, {pipeline_mode = #tpu.pipeline_mode<synchronous>, transform_indices = @transform_2, window_bounds = array<i64: 512, 512>}, {pipeline_mode = #tpu.pipeline_mode<synchronous>, transform_indices = @transform_3, window_bounds = array<i64: 512, 256>}, {pipeline_mode = #tpu.pipeline_mode<synchronous>, transform_indices = @transform_4, window_bounds = array<i64: 256, 128>}, {pipeline_mode = #tpu.pipeline_mode<synchronous>, transform_indices = @transform_5, window_bounds = array<i64: 1, 1408>}, {transform_indices = @transform_6, window_bounds = array<i64: 128, 128>}]} {
    %c0 = arith.constant 0 : index
    %c0_0 = arith.constant 0 : index
    %0 = vector.load %arg6[%c0, %c0_0] : memref<1x1408xf32, #tpu.memory_space<vmem>>, vector<1x512xf32>
    %c0_1 = arith.constant 0 : index
    %c512 = arith.constant 512 : index
    %1 = vector.load %arg6[%c0_1, %c512] : memref<1x1408xf32, #tpu.memory_space<vmem>>, vector<1x512xf32>
    %c0_2 = arith.constant 0 : index
    %c1024 = arith.constant 1024 : index
    %2 = vector.load %arg6[%c0_2, %c1024] : memref<1x1408xf32, #tpu.memory_space<vmem>>, vector<1x256xf32>
    %c0_3 = arith.constant 0 : index
    %c1280 = arith.constant 1280 : index
    %3 = vector.load %arg6[%c0_3, %c1280] : memref<1x1408xf32, #tpu.memory_space<vmem>>, vector<1x128xf32>
    %c0_4 = arith.constant 0 : index
    %c0_5 = arith.constant 0 : index
    %4 = vector.load %arg1[%c0_4, %c0_5] : memref<128x128xbf16, #tpu.memory_space<vmem>>, vector<128x128xbf16>
    %c0_6 = arith.constant 0 : index
    %c0_7 = arith.constant 0 : index
    %5 = vector.load %arg2[%c0_6, %c0_7] : memref<128x512xbf16, #tpu.memory_space<vmem>>, vector<128x512xbf16>
    %cst = arith.constant dense<0.000000e+00> : vector<128x512xf32>
    %6 = tpu.matmul %4, %5, %cst {dimension_numbers = #tpu.dot_dimension_numbers<[1], [0], [0], [1], [0, 0, 1, 1], [], []>} : vector<128x128xbf16>, vector<128x512xbf16>, vector<128x512xf32> -> vector<128x512xf32>
    %7 = vector.broadcast %0 : vector<1x512xf32> to vector<128x512xf32>
    %8 = arith.addf %6, %7 : vector<128x512xf32>
    %cst_8 = arith.constant 0.000000e+00 : f32
    %9 = vector.broadcast %cst_8 : f32 to vector<128x512xf32>
    %10 = arith.maximumf %8, %9 : vector<128x512xf32>
    %11 = arith.truncf %10 : vector<128x512xf32> to vector<128x512xbf16>
    %c0_9 = arith.constant 0 : index
    %c0_10 = arith.constant 0 : index
    %12 = vector.load %arg3[%c0_9, %c0_10] : memref<512x512xbf16, #tpu.memory_space<vmem>>, vector<512x512xbf16>
    %cst_11 = arith.constant dense<0.000000e+00> : vector<128x512xf32>
    %13 = tpu.matmul %11, %12, %cst_11 {dimension_numbers = #tpu.dot_dimension_numbers<[1], [0], [0], [1], [0, 0, 1, 1], [], []>} : vector<128x512xbf16>, vector<512x512xbf16>, vector<128x512xf32> -> vector<128x512xf32>
    %14 = vector.broadcast %1 : vector<1x512xf32> to vector<128x512xf32>
    %15 = arith.addf %13, %14 : vector<128x512xf32>
    %cst_12 = arith.constant 0.000000e+00 : f32
    %16 = vector.broadcast %cst_12 : f32 to vector<128x512xf32>
    %17 = arith.maximumf %15, %16 : vector<128x512xf32>
    %18 = arith.truncf %17 : vector<128x512xf32> to vector<128x512xbf16>
    %c0_13 = arith.constant 0 : index
    %c0_14 = arith.constant 0 : index
    %19 = vector.load %arg4[%c0_13, %c0_14] : memref<512x256xbf16, #tpu.memory_space<vmem>>, vector<512x256xbf16>
    %cst_15 = arith.constant dense<0.000000e+00> : vector<128x256xf32>
    %20 = tpu.matmul %18, %19, %cst_15 {dimension_numbers = #tpu.dot_dimension_numbers<[1], [0], [0], [1], [0, 0, 1, 1], [], []>} : vector<128x512xbf16>, vector<512x256xbf16>, vector<128x256xf32> -> vector<128x256xf32>
    %21 = vector.broadcast %2 : vector<1x256xf32> to vector<128x256xf32>
    %22 = arith.addf %20, %21 : vector<128x256xf32>
    %cst_16 = arith.constant 0.000000e+00 : f32
    %23 = vector.broadcast %cst_16 : f32 to vector<128x256xf32>
    %24 = arith.maximumf %22, %23 : vector<128x256xf32>
    %25 = arith.truncf %24 : vector<128x256xf32> to vector<128x256xbf16>
    %c0_17 = arith.constant 0 : index
    %c0_18 = arith.constant 0 : index
    %26 = vector.load %arg5[%c0_17, %c0_18] : memref<256x128xbf16, #tpu.memory_space<vmem>>, vector<256x128xbf16>
    %cst_19 = arith.constant dense<0.000000e+00> : vector<128x128xf32>
    %27 = tpu.matmul %25, %26, %cst_19 {dimension_numbers = #tpu.dot_dimension_numbers<[1], [0], [0], [1], [0, 0, 1, 1], [], []>} : vector<128x256xbf16>, vector<256x128xbf16>, vector<128x128xf32> -> vector<128x128xf32>
    %28 = vector.broadcast %3 : vector<1x128xf32> to vector<128x128xf32>
    %29 = arith.addf %27, %28 : vector<128x128xf32>
    %c0_20 = arith.constant 0 : index
    %c0_21 = arith.constant 0 : index
    %30 = vector.load %arg7[%c0_20, %c0_21] : memref<128x128xf32, #tpu.memory_space<vmem>>, vector<128x128xf32>
    tpu.vector_store %arg7[%c0_20, %c0_21], %29 {strides = array<i32>} : memref<128x128xf32, #tpu.memory_space<vmem>>, vector<128x128xf32>,
    return
  }
  func.func @transform_0(%arg0: i32) -> (i32, i32) {
    %c0_i32 = arith.constant 0 : i32
    %c0_i32_0 = arith.constant 0 : i32
    return %arg0, %c0_i32 : i32, i32
  }
  func.func @transform_1(%arg0: i32) -> (i32, i32) {
    %c0_i32 = arith.constant 0 : i32
    %c0_i32_0 = arith.constant 0 : i32
    %c0_i32_1 = arith.constant 0 : i32
    return %c0_i32, %c0_i32_0 : i32, i32
  }
  func.func @transform_2(%arg0: i32) -> (i32, i32) {
    %c0_i32 = arith.constant 0 : i32
    %c0_i32_0 = arith.constant 0 : i32
    %c0_i32_1 = arith.constant 0 : i32
    return %c0_i32, %c0_i32_0 : i32, i32
  }
  func.func @transform_3(%arg0: i32) -> (i32, i32) {
    %c0_i32 = arith.constant 0 : i32
    %c0_i32_0 = arith.constant 0 : i32
    %c0_i32_1 = arith.constant 0 : i32
    return %c0_i32, %c0_i32_0 : i32, i32
  }
  func.func @transform_4(%arg0: i32) -> (i32, i32) {
    %c0_i32 = arith.constant 0 : i32
    %c0_i32_0 = arith.constant 0 : i32
    %c0_i32_1 = arith.constant 0 : i32
    return %c0_i32, %c0_i32_0 : i32, i32
  }
  func.func @transform_5(%arg0: i32) -> (i32, i32) {
    %c0_i32 = arith.constant 0 : i32
    %c0_i32_0 = arith.constant 0 : i32
    %c0_i32_1 = arith.constant 0 : i32
    return %c0_i32, %c0_i32_0 : i32, i32
  }
  func.func @transform_6(%arg0: i32) -> (i32, i32) {
    %c0_i32 = arith.constant 0 : i32
    %c0_i32_0 = arith.constant 0 : i32
    return %arg0, %c0_i32 : i32, i32
  }
}

module attributes {stable_mosaic.version = 11 : i64} {
  func.func @_mlp_kernel(%arg0: i32, %arg1: memref<128x128xbf16, #tpu.memory_space<vmem>>, %arg2: memref<128x512xbf16, #tpu.memory_space<vmem>>, %arg3: memref<512x512xbf16, #tpu.memory_space<vmem>>, %arg4: memref<512x256xbf16, #tpu.memory_space<vmem>>, %arg5: memref<256x128xbf16, #tpu.memory_space<vmem>>, %arg6: memref<1x1408xf32, #tpu.memory_space<vmem>>, %arg7: memref<128x128xf32, #tpu.memory_space<vmem>>) attributes {dimension_semantics = [#tpu.dimension_semantics<parallel>], iteration_bounds = array<i64: 2>, scalar_prefetch = 0 : i64, scratch_operands = 0 : i64, tpu.core_type = #tpu.core_type<tc>, window_params = [{transform_indices = @transform_0, window_bounds = array<i64: 128, 128>}, {pipeline_mode = #tpu.pipeline_mode<synchronous>, transform_indices = @transform_1, window_bounds = array<i64: 128, 512>}, {pipeline_mode = #tpu.pipeline_mode<synchronous>, transform_indices = @transform_2, window_bounds = array<i64: 512, 512>}, {pipeline_mode = #tpu.pipeline_mode<synchronous>, transform_indices = @transform_3, window_bounds = array<i64: 512, 256>}, {pipeline_mode = #tpu.pipeline_mode<synchronous>, transform_indices = @transform_4, window_bounds = array<i64: 256, 128>}, {pipeline_mode = #tpu.pipeline_mode<synchronous>, transform_indices = @transform_5, window_bounds = array<i64: 1, 1408>}, {transform_indices = @transform_6, window_bounds = array<i64: 128, 128>}]} {
    %c0 = arith.constant 0 : index
    %c0_0 = arith.constant 0 : index
    %0 = vector.load %arg6[%c0, %c0_0] : memref<1x1408xf32, #tpu.memory_space<vmem>>, vector<1x512xf32>
    %c0_1 = arith.constant 0 : index
    %c512 = arith.constant 512 : index
    %1 = vector.load %arg6[%c0_1, %c512] : memref<1x1408xf32, #tpu.memory_space<vmem>>, vector<1x512xf32>
    %c0_2 = arith.constant 0 : index
    %c1024 = arith.constant 1024 : index
    %2 = vector.load %arg6[%c0_2, %c1024] : memref<1x1408xf32, #tpu.memory_space<vmem>>, vector<1x256xf32>
    %c0_3 = arith.constant 0 : index
    %c1280 = arith.constant 1280 : index
    %3 = vector.load %arg6[%c0_3, %c1280] : memref<1x1408xf32, #tpu.memory_space<vmem>>, vector<1x128xf32>
    %c0_4 = arith.constant 0 : index
    %c0_5 = arith.constant 0 : index
    %4 = vector.load %arg1[%c0_4, %c0_5] : memref<128x128xbf16, #tpu.memory_space<vmem>>, vector<128x128xbf16>
    %c0_6 = arith.constant 0 : index
    %c0_7 = arith.constant 0 : index
    %5 = vector.load %arg2[%c0_6, %c0_7] : memref<128x512xbf16, #tpu.memory_space<vmem>>, vector<128x512xbf16>
    %cst = arith.constant dense<0.000000e+00> : vector<128x512xf32>
    %6 = tpu.matmul %4, %5, %cst {dimension_numbers = #tpu.dot_dimension_numbers<[1], [0], [0], [1], [0, 0, 1, 1], [], []>} : vector<128x128xbf16>, vector<128x512xbf16>, vector<128x512xf32> -> vector<128x512xf32>
    %7 = vector.broadcast %0 : vector<1x512xf32> to vector<128x512xf32>
    %8 = arith.addf %6, %7 : vector<128x512xf32>
    %cst_8 = arith.constant 0.000000e+00 : f32
    %9 = vector.broadcast %cst_8 : f32 to vector<128x512xf32>
    %10 = arith.maximumf %8, %9 : vector<128x512xf32>
    %11 = arith.truncf %10 : vector<128x512xf32> to vector<128x512xbf16>
    %c0_9 = arith.constant 0 : index
    %c0_10 = arith.constant 0 : index
    %12 = vector.load %arg3[%c0_9, %c0_10] : memref<512x512xbf16, #tpu.memory_space<vmem>>, vector<512x512xbf16>
    %cst_11 = arith.constant dense<0.000000e+00> : vector<128x512xf32>
    %13 = tpu.matmul %11, %12, %cst_11 {dimension_numbers = #tpu.dot_dimension_numbers<[1], [0], [0], [1], [0, 0, 1, 1], [], []>} : vector<128x512xbf16>, vector<512x512xbf16>, vector<128x512xf32> -> vector<128x512xf32>
    %14 = vector.broadcast %1 : vector<1x512xf32> to vector<128x512xf32>
    %15 = arith.addf %13, %14 : vector<128x512xf32>
    %cst_12 = arith.constant 0.000000e+00 : f32
    %16 = vector.broadcast %cst_12 : f32 to vector<128x512xf32>
    %17 = arith.maximumf %15, %16 : vector<128x512xf32>
    %18 = arith.truncf %17 : vector<128x512xf32> to vector<128x512xbf16>
    %c0_13 = arith.constant 0 : index
    %c0_14 = arith.constant 0 : index
    %19 = vector.load %arg4[%c0_13, %c0_14] : memref<512x256xbf16, #tpu.memory_space<vmem>>, vector<512x256xbf16>
    %cst_15 = arith.constant dense<0.000000e+00> : vector<128x256xf32>
    %20 = tpu.matmul %18, %19, %cst_15 {dimension_numbers = #tpu.dot_dimension_numbers<[1], [0], [0], [1], [0, 0, 1, 1], [], []>} : vector<128x512xbf16>, vector<512x256xbf16>, vector<128x256xf32> -> vector<128x256xf32>
    %21 = vector.broadcast %2 : vector<1x256xf32> to vector<128x256xf32>
    %22 = arith.addf %20, %21 : vector<128x256xf32>
    %cst_16 = arith.constant 0.000000e+00 : f32
    %23 = vector.broadcast %cst_16 : f32 to vector<128x256xf32>
    %24 = arith.maximumf %22, %23 : vector<128x256xf32>
    %25 = arith.truncf %24 : vector<128x256xf32> to vector<128x256xbf16>
    %c0_17 = arith.constant 0 : index
    %c0_18 = arith.constant 0 : index
    %26 = vector.load %arg5[%c0_17, %c0_18] : memref<256x128xbf16, #tpu.memory_space<vmem>>, vector<256x128xbf16>
    %cst_19 = arith.constant dense<0.000000e+00> : vector<128x128xf32>
    %27 = tpu.matmul %25, %26, %cst_19 {dimension_numbers = #tpu.dot_dimension_numbers<[1], [0], [0], [1], [0, 0, 1, 1], [], []>} : vector<128x256xbf16>, vector<256x128xbf16>, vector<128x128xf32> -> vector<128x128xf32>
    %28 = vector.broadcast %3 : vector<1x128xf32> to vector<128x128xf32>
    %29 = arith.addf %27, %28 : vector<128x128xf32>
    %c0_20 = arith.constant 0 : index
    %c0_21 = arith.constant 0 : index
    %30 = vector.load %arg7[%c0_20, %c0_21] : memref<128x128xf32, #tpu.memory_space<vmem>>, vector<128x128xf32>
    tpu.vector_store %arg7[%c0_20, %c0_21], %29 {strides = array<i32>} : memref<128x128xf32, #tpu.memory_space<vmem>>, vector<128x128xf32>,
    return
  }
  func.func @transform_0(%arg0: i32) -> (i32, i32) {
    %c0_i32 = arith.constant 0 : i32
    %c0_i32_0 = arith.constant 0 : i32
    return %arg0, %c0_i32 : i32, i32
  }
  func.func @transform_1(%arg0: i32) -> (i32, i32) {
    %c0_i32 = arith.constant 0 : i32
    %c0_i32_0 = arith.constant 0 : i32
    %c0_i32_1 = arith.constant 0 : i32
    return %c0_i32, %c0_i32_0 : i32, i32
  }
  func.func @transform_2(%arg0: i32) -> (i32, i32) {
    %c0_i32 = arith.constant 0 : i32
    %c0_i32_0 = arith.constant 0 : i32
    %c0_i32_1 = arith.constant 0 : i32
    return %c0_i32, %c0_i32_0 : i32, i32
  }
  func.func @transform_3(%arg0: i32) -> (i32, i32) {
    %c0_i32 = arith.constant 0 : i32
    %c0_i32_0 = arith.constant 0 : i32
    %c0_i32_1 = arith.constant 0 : i32
    return %c0_i32, %c0_i32_0 : i32, i32
  }
  func.func @transform_4(%arg0: i32) -> (i32, i32) {
    %c0_i32 = arith.constant 0 : i32
    %c0_i32_0 = arith.constant 0 : i32
    %c0_i32_1 = arith.constant 0 : i32
    return %c0_i32, %c0_i32_0 : i32, i32
  }
  func.func @transform_5(%arg0: i32) -> (i32, i32) {
    %c0_i32 = arith.constant 0 : i32
    %c0_i32_0 = arith.constant 0 : i32
    %c0_i32_1 = arith.constant 0 : i32
    return %c0_i32, %c0_i32_0 : i32, i32
  }
  func.func @transform_6(%arg0: i32) -> (i32, i32) {
    %c0_i32 = arith.constant 0 : i32
    %c0_i32_0 = arith.constant 0 : i32
    return %arg0, %c0_i32 : i32, i32
  }
}

</mosaic_0001>

<bundles_post_ra>
// kernel: tpu_custom_call.1
= control target key start
LH: loop header
LB: loop body
LE: loop exit
PB: predicated region body
PF: predicated region fallthrough
CT: control target
= control target key end

     0   :  { %11 = vsyncpa [#allocation3], 0  ;;  %s5410_s0 = inlined_call_operand.hbm [shape: bf16[256,128], index: 0, kind: input, shape index: {}]   ;;  %s5411_s1 = inlined_call_operand.hbm [shape: bf16[128,512], index: 1, kind: input, shape index: {}]   ;;  %s5412_s2 = inlined_call_operand.hbm [shape: bf16[512,512], index: 2, kind: input, shape index: {}]   ;;  %s5413_s3 = inlined_call_operand.hbm [shape: bf16[512,256], index: 3, kind: input, shape index: {}]   ;;  %s5414_s4 = inlined_call_operand.hbm [shape: bf16[256,128], index: 4, kind: input, shape index: {}]   ;;  %s5415_s5 = inlined_call_operand.vmem [shape: f32[1,1408], index: 5, kind: input, shape index: {}]   ;;  %s5416_s6 = inlined_call_operand.hbm [shape: f32[256,128], index: 6, kind: output, shape index: {}]  }
   0x1   :  { %13 = vsyncpa [#allocation3 + $0x1], 0 }
   0x2   :  { %14 = vsyncpa [#allocation6], 0 }
   0x3   :  { %15 = vsyncpa [#allocation9], 0 }
   0x4   :  { %16 = vsyncpa [#allocation4], 0 }
   0x5   :  { %18 = vsyncpa [#allocation4 + $0x1], 0  ;;  %s4597_s21 = smov 0   ;;  %s4599_s22 = smov 0  }
   0x6   :  { %s4601_s23 = smov 0   ;;  %s4603_s24 = smov 0  }
   0x7 LB: > { %s4618_s25 = sadd.s32 4294967295, %s4545_s24   ;;  %s3312_s26 = sadd.s32 4294967294, %s4545_s24   ;;  %s4545_s24 = sphi %s4603_s24, %s5443_s24   ;;  %s4541_s23 = sphi %s4601_s23, %s5442_s23   ;;  %s4537_s22 = sphi %s4599_s22, %s5441_s22   ;;  %s4533_s21 = sphi %s4597_s21, %s5440_s21  }
   0x8   : > { %p44_p0 = scmp.ne.s32.totalorder %s4537_s22, %s4533_s21  ;;  %p5417_p1 = scmp.eq.s32.totalorder %s4618_s25, 0 }
   0x9   : > { %p179_p3 = scmp.eq.s32.totalorder %s3312_s26, 1  ;;  %p3313_p5 = scmp.ge.s32.totalorder %s4545_s24, 1 }
   0xa   : > { %p4627_p4 = por %p5417_p1, %p44_p0  ;;  %p186_p7 = scmp.lt.s32.totalorder %s4545_s24, 3 }
   0xb   : > { %p4632_p6 = por %p179_p3, %p44_p0  ;;  %s4547_s30 = smov [#allocation5]  }
   0xc   : > { %s5422_s27 = scalar_select %p4627_p4, 1, 0 }
   0xd   : > { %s5423_s28 = scalar_select %p4632_p6, 1, 0 }
   0xe   : > { %p4637_p8 = pnand %p3313_p5, %p186_p7  ;;  %s198_s7 = sshll.u32 %s4547_s30, 4  ;;  %s4641_s7 = int_to_ptr.vmem [resolvable:$true] %s198_s7 }
   0xf   : > { %s4548_s9 = smov [#allocation8]   ;;  %s4329_s13 = scalar_lea.hbm %s5411_s1, 4096 }
  0x10   : > { %s5424_s29 = scalar_select %p4637_p8, 1, 0 }
  0x11   : > { %p3893_p9 = pneg %p4637_p8  ;;  %s224_s10 = sshll.u32 %s4548_s9, 4  ;;  %s4652_s10 = int_to_ptr.vmem [resolvable:$true] %s224_s10 }
  0x12   : > { %p4330_p12 = scmp.ne.s32.totalorder %s5411_s1, %s4329_s13  ;;  %p4336_p5 = scmp.lt.u32.totalorder %s4329_s13, %s5411_s1 }
  0x13   : > { %p4648_p11 = pnand %p3893_p9, %p5417_p1 }
  0x15   : > { %p4662_p13 = pneg %p4648_p11 }
  0x17   : > { %p4332_p0 = pnand %p4662_p13, %p4330_p12 }
  0x19   : > { %p4333_p3 = pneg %p4332_p0 }
  0x1b   : > { %p4338_p7 = pnand %p4336_p5, %p4333_p3 }
  0x1d   : > { %4341 = shalt.err (!%p4338_p7)
}
  0x1e   : > { %s4342_s19 = scalar_lea.vmem %s4641_s7, 4096  ;;  %p4350_p2 = scmp.lt.s32.totalorder %s4641_s7, %s4641_s7 }
  0x1f   : > { %p4343_p9 = scmp.ne.s32.totalorder %s4641_s7, %s4342_s19  ;;  %p4351_p6 = scmp.lt.s32.totalorder %s4342_s19, %s4342_s19 }
  0x21   : > { %p4345_p10 = pnand %p4343_p9, %p4662_p13  ;;  %p4352_p12 = por %p4351_p6, %p4350_p2 }
  0x23   : > { %p4346_p1 = pneg %p4345_p10 }
  0x25   : > { %p4353_p0 = pnand %p4352_p12, %p4346_p1 }
  0x27   : > { %4356 = shalt.err (!%p4353_p0)
}
  0x28   : > { %s5418_s20 = smov 256   ;;  %s5419_s26 = smov 16  }
  0x29   : > { %3896 = dma.hbm_to_vmem [thread:$0]  (!%p4648_p11), %s5411_s1, 4096, %s4641_s7, [#allocation6], %s5418_s20, %s5418_s20, %s5419_s26  }
  0x2a   : > { %s4357_s13 = scalar_lea.hbm %s5413_s3, 8192 }
  0x2b   : > { %p4358_p1 = scmp.ne.s32.totalorder %s5413_s3, %s4357_s13  ;;  %p4364_p10 = scmp.lt.u32.totalorder %s4357_s13, %s5413_s3 }
  0x2d   : > { %p4360_p2 = pnand %p4358_p1, %p4662_p13 }
  0x2f   : > { %p4361_p6 = pneg %p4360_p2 }
  0x31   : > { %p4366_p3 = pnand %p4364_p10, %p4361_p6 }
  0x33   : > { %4369 = shalt.err (!%p4366_p3)
}
  0x34   : > { %s4370_s7 = scalar_lea.vmem %s4652_s10, 8192  ;;  %p4378_p12 = scmp.lt.s32.totalorder %s4652_s10, %s4652_s10 }
  0x35   : > { %p4371_p5 = scmp.ne.s32.totalorder %s4652_s10, %s4370_s7  ;;  %p4379_p0 = scmp.lt.s32.totalorder %s4370_s7, %s4370_s7 }
  0x37   : > { %p4373_p7 = pnand %p4371_p5, %p4662_p13  ;;  %p4380_p1 = por %p4379_p0, %p4378_p12 }
  0x39   : > { %p4374_p9 = pneg %p4373_p7 }
  0x3b   : > { %p4381_p2 = pnand %p4380_p1, %p4374_p9 }
  0x3d   : > { %4384 = shalt.err (!%p4381_p2)
}
  0x3e   : > { %s4551_s19 = smov 128   ;;  %s4552_s30 = smov 8  }
  0x3f   : > { %3902 = dma.hbm_to_vmem [thread:$0]  (!%p4648_p11), %s5413_s3, 8192, %s4652_s10, [#allocation9], %s4551_s19, %s4551_s19, %s4552_s30  }
  0x40   : > { %s4553_s12 = smov [#allocation7]   ;;  %s4554_s14 = smov [#allocation10]  }
  0x41   : > { %s211_s13 = sshll.u32 %s4553_s12, 4  ;;  %s237_s15 = sshll.u32 %s4554_s14, 4  ;;  %s212_s13 = int_to_ptr.vmem [resolvable:$true] %s211_s13  ;;  %s4709_s15 = int_to_ptr.vmem [resolvable:$true] %s237_s15 }
  0x42   : > { %s4385_s7 = scalar_lea.hbm %s5412_s2, 16384 }
  0x43   : > { %p4386_p6 = scmp.ne.s32.totalorder %s5412_s2, %s4385_s7  ;;  %p4392_p5 = scmp.lt.u32.totalorder %s4385_s7, %s5412_s2 }
  0x45   : > { %p4388_p10 = pnand %p4386_p6, %p4662_p13 }
  0x47   : > { %p4389_p3 = pneg %p4388_p10 }
  0x49   : > { %p4394_p7 = pnand %p4392_p5, %p4389_p3 }
  0x4b   : > { %4397 = shalt.err (!%p4394_p7)
}
  0x4c   : > { %s4398_s19 = scalar_lea.vmem %s212_s13, 16384  ;;  %p4406_p1 = scmp.lt.s32.totalorder %s212_s13, %s212_s13 }
  0x4d   : > { %p4399_p9 = scmp.ne.s32.totalorder %s212_s13, %s4398_s19  ;;  %p4407_p2 = scmp.lt.s32.totalorder %s4398_s19, %s4398_s19 }
  0x4f   : > { %p4401_p12 = pnand %p4399_p9, %p4662_p13  ;;  %p4408_p4 = por %p4407_p2, %p4406_p1 }
  0x51   : > { %p4402_p0 = pneg %p4401_p12 }
  0x53   : > { %p4409_p8 = pnand %p4408_p4, %p4402_p0 }
  0x55   : > { %4412 = shalt.err (!%p4409_p8)
}
  0x56   : > { %s5427_s20 = smov 16   ;;  %s5428_s26 = smov 256  }
  0x57   : > { %3899 = dma.hbm_to_vmem [thread:$0]  (!%p4648_p11), %s5412_s2, 16384, %s212_s13, [#allocation6], %s5428_s26, %s5428_s26, %s5427_s20  }
  0x58   : > { %s4413_s17 = scalar_lea.hbm %s5414_s4, 2048 }
  0x59   : > { %p4414_p6 = scmp.ne.s32.totalorder %s5414_s4, %s4413_s17  ;;  %p4420_p10 = scmp.lt.u32.totalorder %s4413_s17, %s5414_s4 }
  0x5b   : > { %p4416_p4 = pnand %p4414_p6, %p4662_p13 }
  0x5d   : > { %p4417_p8 = pneg %p4416_p4 }
  0x5f   : > { %p4422_p3 = pnand %p4420_p10, %p4417_p8 }
  0x61   : > { %4425 = shalt.err (!%p4422_p3)
}
  0x62   : > { %s4426_s13 = scalar_lea.vmem %s4709_s15, 2048  ;;  %p4434_p12 = scmp.lt.s32.totalorder %s4709_s15, %s4709_s15 }
  0x63   : > { %p4427_p5 = scmp.ne.s32.totalorder %s4709_s15, %s4426_s13  ;;  %p4435_p0 = scmp.lt.s32.totalorder %s4426_s13, %s4426_s13 }
  0x65   : > { %p4429_p7 = pnand %p4427_p5, %p4662_p13  ;;  %p4436_p1 = por %p4435_p0, %p4434_p12 }
  0x67   : > { %p4430_p9 = pneg %p4429_p7 }
  0x69   : > { %p4437_p2 = pnand %p4436_p1, %p4430_p9 }
  0x6b   : > { %4440 = shalt.err (!%p4437_p2)
}
  0x6c   : > { %s4555_s19 = smov 64   ;;  %s4556_s16 = smov 4  }
  0x6d   : > { %3905 = dma.hbm_to_vmem [thread:$0]  (!%p4648_p11), %s5414_s4, 2048, %s4709_s15, [#allocation9], %s4555_s19, %s4555_s19, %s4556_s16  }
  0x6e   : > { %s4759_s30 = sadd.s32 1, %s4545_s24   ;;  %s31_s12 = sadd.s32 1, %s4541_s23 }
  0x6f   : > { %s28_s11 = ssub.s32 %s4545_s24, %s4759_s30  ;;  %p38_p6 = scmp.ne.s32.totalorder %s4541_s23, %s4537_s22 }
  0x70   : > { %p29_p13 = scmp.eq.s32.totalorder %s28_s11, 0  ;;  %p39_p4 = scmp.eq.s32.totalorder %s4545_s24, 0 }
  0x71   : > { %p5429_p10 = scmp.eq.s32.totalorder %s4618_s25, 1  ;;  %p3918_p5 = scmp.lt.s32.totalorder %s4545_s24, 2 }
  0x72   : > { %s4768_s14 = scalar_select %p29_p13, %s4541_s23, %s31_s12  }
  0x73   : > { %p40_p8 = por %p39_p4, %p38_p6  ;;  %p4772_p3 = por %p5429_p10, %p38_p6 }
  0x74   : > { %s254_s17 = sand.u32 1, %s4541_s23   ;;  %s3583_s15 = sshll.u32 %s4545_s24, 10 }
  0x75   : > { %s3319_s18 = sshll.u32 %s254_s17, 6  ;;  %s4782_s10 = scalar_lea.hbm %s5410_s0, %s3583_s15 }
  0x76   : > { %s258_s13 = scalar_lea.vmem [#allocation2], %s3319_s18  ;;  %p4786_p11 = pnand %p3918_p5, %p40_p8 }
  0x77   : > { %s265_s20 = sshll.u32 %s258_s13, 4  ;;  %s4790_s11 = scalar_lea.sflag [#allocation3], %s254_s17  ;;  %s4784_s20 = int_to_ptr.vmem [resolvable:$true] %s265_s20 }
  0x78   : > { %s4441_s12 = scalar_lea.hbm %s4782_s10, 1024  ;;  %p4443_p9 = pneg %p4786_p11 }
  0x79   : > { %p4442_p7 = scmp.ne.s32.totalorder %s4782_s10, %s4441_s12  ;;  %s4446_s7 = scalar_lea.hbm %s5410_s0, 2048 }
  0x7a   : > { %p4447_p1 = scmp.lt.u32.totalorder %s4782_s10, %s5410_s0  ;;  %p4448_p2 = scmp.lt.u32.totalorder %s4446_s7, %s4441_s12 }
  0x7b   : > { %p4444_p12 = pnand %p4443_p9, %p4442_p7  ;;  %p4450_p6 = scmp.lt.u32.totalorder %s4441_s12, %s4782_s10 }
  0x7c   : > { %p4449_p13 = por %p4448_p2, %p4447_p1 }
  0x7d   : > { %p4445_p0 = pneg %p4444_p12 }
  0x7e   : > { %p4451_p4 = por %p4450_p6, %p4449_p13 }
  0x80   : > { %p4452_p8 = pnand %p4451_p4, %p4445_p0 }
  0x82   : > { %4455 = shalt.err (!%p4452_p8)
}
  0x83   : > { %s4456_s17 = scalar_lea.vmem %s4784_s20, 1024  ;;  %s4557_s18 = smov [#allocation2]  }
  0x84   : > { %p4457_p10 = scmp.ne.s32.totalorder %s4784_s20, %s4456_s17  ;;  %s4461_s15 = sshll.u32 %s4557_s18, 4  ;;  %s4462_s15 = int_to_ptr.vmem [resolvable:$false] %s4461_s15 }
  0x85   : > { %s4463_s9 = scalar_lea.vmem %s4462_s15, 2048  ;;  %p4464_p12 = scmp.lt.s32.totalorder %s4784_s20, %s4462_s15 }
  0x86   : > { %p4459_p5 = pnand %p4457_p10, %p4443_p9  ;;  %p4465_p1 = scmp.lt.s32.totalorder %s4463_s9, %s4456_s17 }
  0x88   : > { %p4460_p7 = pneg %p4459_p5  ;;  %p4466_p2 = por %p4465_p1, %p4464_p12 }
  0x8a   : > { %p4467_p13 = pnand %p4466_p2, %p4460_p7 }
  0x8c   : > { %4470 = shalt.err (!%p4467_p13)
}
  0x8d   : > { %3909 = dma.hbm_to_vmem [thread:$0]  (!%p4786_p11), %s4782_s10, 1024, %s4784_s20, %s4790_s11, %s4555_s19, %s4555_s19, %s4556_s16  }
  0x8e   : > { %p5432_p9 = scmp.ne.s32.totalorder %s5424_s29, 0 }
  0x8f   : > { %s4824_s12 = sand.u32 (!%p5432_p9), 1, %s4537_s22   ;;  %p5433_p0 = scmp.ne.s32.totalorder (!%p5432_p9), %s5422_s27, 0 }
  0x90   : > { %277 = sbr.rel (%p5432_p9) target bundleno = 1277 (0x4fd), region = 44  ;;  %s3323_s7 = sshll.u32 (!%p5432_p9), %s4824_s12, 6 }
  0x91   : > { %s280_s13 = scalar_lea.sflag (!%p5432_p9), [#allocation3], %s4824_s12  ;;  %s4828_s17 = scalar_lea.vmem (!%p5432_p9), [#allocation2], %s3323_s7 }
  0x97   : > { %4516 = dma.done.wait (%p5433_p0), %s280_s13, 1024  }
  0x98   : > { %4518 = vsyncadd (%p5433_p0), %s280_s13, 4294966272  ;;  %p5434_p11 = scmp.eq.s32.totalorder %s4618_s25, 0 }
  0x9a   : > { %4520 = dma.done.wait (%p5434_p11), [#allocation6], 20480   ;;  %p5435_p6 = pmov %p5434_p11 }
  0x9c   : > { %4522 = vsyncadd (%p5435_p6), [#allocation6], 4294946816  ;;  %p5436_p4 = pmov %p5435_p6 }
  0x9e   : > { %4524 = dma.done.wait (%p5436_p4), [#allocation9], 10240   ;;  %p5437_p8 = pmov %p5436_p4 }
  0x9f   : > { %v4558_v0 = vmov 0   ;;  %v3969_v1 = vld [vmem:[#allocation5 + $0x4] ss:$16 sps:$4 sm:$0xff]   ;;  %v3971_v2 = vld [vmem:[#allocation5] ss:$16 sps:$4 sm:$0xff]   ;;  %v3994_v36 = vld [vmem:[%s4828_s17 + $0x8] sm:$0xff]  }
  0xa0   : > { %4526 = vsyncadd (%p5437_p8), [#allocation9], 4294957056  ;;  %644 = vmatprep.mubr.bf16.mxu0 %v4558_v0  ;;  %757 = vmatprep.mubr.bf16.mxu1 %v4558_v0  ;;  %v3972_v3 = vld [vmem:[#allocation5 + $0x24] ss:$16 sps:$4 sm:$0xff]   ;;  %v3974_v4 = vld [vmem:[#allocation5 + $0x20] ss:$16 sps:$4 sm:$0xff]  }
  0xa1   : > { %612 = vmatprep.subr.bf16.mxu0 %v3969_v1  ;;  %v3975_v5 = vld [vmem:[#allocation5 + $0x44] ss:$16 sps:$4 sm:$0xff]   ;;  %v3977_v6 = vld [vmem:[#allocation5 + $0x40] ss:$16 sps:$4 sm:$0xff]   ;;  %v3997_v11 = vld [vmem:[#allocation5 + $0xc] ss:$16 sps:$4 sm:$0xff]  }
  0xa2   : > { %613 = vmatpush1.bf16.msra.mxu0 %v3971_v2  ;;  %v3978_v7 = vld [vmem:[#allocation5 + $0x64] ss:$16 sps:$4 sm:$0xff]   ;;  %v3980_v8 = vld [vmem:[#allocation5 + $0x60] ss:$16 sps:$4 sm:$0xff]   ;;  %v3999_v12 = vld [vmem:[#allocation5 + $0x8] ss:$16 sps:$4 sm:$0xff]   ;;  %725 = vmatprep.subr.bf16.mxu1 %v3997_v11 }
  0xa3   : > { %614 = vmatprep.subr.bf16.mxu0 %v3972_v3  ;;  %v3981_v9 = vld [vmem:[#allocation5 + $0x84] ss:$16 sps:$4 sm:$0xff]   ;;  %v3983_v10 = vld [vmem:[#allocation5 + $0x80] ss:$16 sps:$4 sm:$0xff]   ;;  %v4001_v14 = vld [vmem:[#allocation5 + $0x2c] ss:$16 sps:$4 sm:$0xff]   ;;  %726 = vmatpush1.bf16.msra.mxu1 %v3999_v12 }
  0xa4   : > { %v3984_v13 = vld [vmem:[#allocation5 + $0xa4] ss:$16 sps:$4 sm:$0xff]   ;;  %v4003_v15 = vld [vmem:[#allocation5 + $0x28] ss:$16 sps:$4 sm:$0xff]   ;;  %v3986_v16 = vld [vmem:[#allocation5 + $0xa0] ss:$16 sps:$4 sm:$0xff]   ;;  %727 = vmatprep.subr.bf16.mxu1 %v4001_v14 }
  0xa5   : > { %v4004_v17 = vld [vmem:[#allocation5 + $0x4c] ss:$16 sps:$4 sm:$0xff]   ;;  %v3987_v18 = vld [vmem:[#allocation5 + $0xc4] ss:$16 sps:$4 sm:$0xff]   ;;  %v3989_v19 = vld [vmem:[#allocation5 + $0xc0] ss:$16 sps:$4 sm:$0xff]  }
  0xa6   : > { %615 = vmatpush1.bf16.msra.mxu0 %v3974_v4  ;;  %v4006_v20 = vld [vmem:[#allocation5 + $0x48] ss:$16 sps:$4 sm:$0xff]   ;;  %v4008_v21 = vld [vmem:[#allocation5 + $0x6c] ss:$16 sps:$4 sm:$0xff]   ;;  %v3990_v22 = vld [vmem:[#allocation5 + $0xe4] ss:$16 sps:$4 sm:$0xff]  }
  0xa7   : > { %616 = vmatprep.subr.bf16.mxu0 %v3975_v5  ;;  %728 = vmatpush1.bf16.msra.mxu1 %v4003_v15  ;;  %v3992_v23 = vld [vmem:[#allocation5 + $0xe0] ss:$16 sps:$4 sm:$0xff]   ;;  %v4010_v24 = vld [vmem:[#allocation5 + $0x68] ss:$16 sps:$4 sm:$0xff]   ;;  %v4011_v25 = vld [vmem:[#allocation5 + $0x8c] ss:$16 sps:$4 sm:$0xff]  }
  0xa8   : > { %729 = vmatprep.subr.bf16.mxu1 %v4004_v17  ;;  %v3993_v26 = vld [vmem:[%s4828_s17] sm:$0xff]   ;;  %v4013_v27 = vld [vmem:[#allocation5 + $0x88] ss:$16 sps:$4 sm:$0xff]   ;;  %v4015_v29 = vld [vmem:[#allocation5 + $0xac] ss:$16 sps:$4 sm:$0xff]   ;;  %s3328_s26 = sshll.u32 %s4824_s12, 7 }
  0xa9   : > { %v4027_v28 = vld [vmem:[#allocation7 + $0x4] ss:$16 sps:$4 sm:$0xff]   ;;  %v4025_v30 = vld [vmem:[#allocation7] ss:$16 sps:$4 sm:$0xff]   ;;  %v4017_v32 = vld [vmem:[#allocation5 + $0xa8] ss:$16 sps:$4 sm:$0xff]  }
  0xaa   : > { %617 = vmatpush1.bf16.msra.mxu0 %v3977_v6  ;;  %v4033_v31 = vld [vmem:[#allocation7 + $0x24] ss:$16 sps:$4 sm:$0xff]   ;;  %v4018_v33 = vld [vmem:[#allocation5 + $0xcc] ss:$16 sps:$4 sm:$0xff]   ;;  %v4031_v34 = vld [vmem:[#allocation7 + $0x20] ss:$16 sps:$4 sm:$0xff]  }
  0xab   : > { %618 = vmatprep.subr.bf16.mxu0 %v3978_v7  ;;  %730 = vmatpush1.bf16.msra.mxu1 %v4006_v20  ;;  %v4039_v35 = vld [vmem:[#allocation7 + $0x44] ss:$16 sps:$4 sm:$0xff]   ;;  %v4020_v37 = vld [vmem:[#allocation5 + $0xc8] ss:$16 sps:$4 sm:$0xff]   ;;  %v4022_v38 = vld [vmem:[#allocation5 + $0xec] ss:$16 sps:$4 sm:$0xff]  }
  0xac   : > { %731 = vmatprep.subr.bf16.mxu1 %v4008_v21  ;;  %v4037_v39 = vld [vmem:[#allocation7 + $0x40] ss:$16 sps:$4 sm:$0xff]   ;;  %v4045_v40 = vld [vmem:[#allocation7 + $0x64] ss:$16 sps:$4 sm:$0xff]   ;;  %v4024_v41 = vld [vmem:[#allocation5 + $0xe8] ss:$16 sps:$4 sm:$0xff]  }
  0xad   : > { %v4030_v42 = vld [vmem:[#allocation7 + $0xc] ss:$16 sps:$4 sm:$0xff]   ;;  %v4043_v43 = vld [vmem:[#allocation7 + $0x60] ss:$16 sps:$4 sm:$0xff]   ;;  %v4051_v44 = vld [vmem:[#allocation7 + $0x84] ss:$16 sps:$4 sm:$0xff]  }
  0xae   : > { %619 = vmatpush1.bf16.msra.mxu0 %v3980_v8  ;;  %v3995_v45 = vld [vmem:[%s4828_s17 + $0x10] sm:$0xff]   ;;  %v4028_v46 = vld [vmem:[#allocation7 + $0x8] ss:$16 sps:$4 sm:$0xff]   ;;  %v4036_v47 = vld [vmem:[#allocation7 + $0x2c] ss:$16 sps:$4 sm:$0xff]   ;;  %s5326_s15 = scalar_lea.vmem [#allocation11], %s3328_s26 }
  0xaf   : > { %620 = vmatprep.subr.bf16.mxu0 %v3981_v9  ;;  %732 = vmatpush1.bf16.msra.mxu1 %v4010_v24  ;;  %v4049_v48 = vld [vmem:[#allocation7 + $0x80] ss:$16 sps:$4 sm:$0xff]   ;;  %v4057_v49 = vld [vmem:[#allocation7 + $0xa4] ss:$16 sps:$4 sm:$0xff]   ;;  %v4034_v50 = vld [vmem:[#allocation7 + $0x28] ss:$16 sps:$4 sm:$0xff]  }
  0xb0   : > { %733 = vmatprep.subr.bf16.mxu1 %v4011_v25  ;;  %v4042_v51 = vld [vmem:[#allocation7 + $0x4c] ss:$16 sps:$4 sm:$0xff]   ;;  %v4055_v52 = vld [vmem:[#allocation7 + $0xa0] ss:$16 sps:$4 sm:$0xff]   ;;  %v4063_v53 = vld [vmem:[#allocation7 + $0xc4] ss:$16 sps:$4 sm:$0xff]  }
  0xb1   : > { %v3996_v54 = vld [vmem:[%s4828_s17 + $0x18] sm:$0xff]   ;;  %v4061_v57 = vld [vmem:[#allocation7 + $0xc0] ss:$16 sps:$4 sm:$0xff]   ;;  %v4069_v58 = vld [vmem:[#allocation7 + $0xe4] ss:$16 sps:$4 sm:$0xff]   ;;  %s3584_s9 = sshll.u32 %s4618_s25, 11 }
  0xb2   : > { %621 = vmatpush1.bf16.msra.mxu0 %v3983_v10  ;;  %v4040_v55 = vld [vmem:[#allocation7 + $0x48] ss:$16 sps:$4 sm:$0xff]   ;;  %v4048_v56 = vld [vmem:[#allocation7 + $0x6c] ss:$16 sps:$4 sm:$0xff]   ;;  %v4067_v61 = vld [vmem:[#allocation7 + $0xe0] ss:$16 sps:$4 sm:$0xff]   ;;  %s5361_s27 = scalar_lea.hbm %s5416_s6, %s3584_s9 }
  0xb3   : > { %622 = vmatprep.subr.bf16.mxu0 %v3984_v13  ;;  %734 = vmatpush1.bf16.msra.mxu1 %v4013_v27  ;;  %v4046_v59 = vld [vmem:[#allocation7 + $0x68] ss:$16 sps:$4 sm:$0xff]   ;;  %v4054_v60 = vld [vmem:[#allocation7 + $0x8c] ss:$16 sps:$4 sm:$0xff]   ;;  %v4075_v62 = vld [vmem:[#allocation7 + $0x104] ss:$16 sps:$4 sm:$0xff]  }
  0xb4   : > { %735 = vmatprep.subr.bf16.mxu1 %v4015_v29  ;;  %v4000_v63 = vld [vmem:[%s4828_s17 + $0x20] sm:$0xff]   ;;  %v4052_v1 = vld [vmem:[#allocation7 + $0x88] ss:$16 sps:$4 sm:$0xff]   ;;  %v4060_v2 = vld [vmem:[#allocation7 + $0xac] ss:$16 sps:$4 sm:$0xff]   ;;  %s3201_s7 = sshll.u32 %s5326_s15, 4  ;;  %s5363_s7 = int_to_ptr.vmem [resolvable:$true] %s3201_s7 }
  0xb5   : > { %v4073_v3 = vld [vmem:[#allocation7 + $0x100] ss:$16 sps:$4 sm:$0xff]   ;;  %v4081_v4 = vld [vmem:[#allocation7 + $0x124] ss:$16 sps:$4 sm:$0xff]   ;;  %v4058_v5 = vld [vmem:[#allocation7 + $0xa8] ss:$16 sps:$4 sm:$0xff]  }
  0xb6   : > { %623 = vmatpush1.bf16.msra.mxu0 %v3986_v16  ;;  %v4066_v6 = vld [vmem:[#allocation7 + $0xcc] ss:$16 sps:$4 sm:$0xff]   ;;  %v4079_v7 = vld [vmem:[#allocation7 + $0x120] ss:$16 sps:$4 sm:$0xff]   ;;  %v4087_v8 = vld [vmem:[#allocation7 + $0x144] ss:$16 sps:$4 sm:$0xff]  }
  0xb7   : > { %624 = vmatprep.subr.bf16.mxu0 %v3987_v18  ;;  %736 = vmatpush1.bf16.msra.mxu1 %v4017_v32  ;;  %v4007_v9 = vld [vmem:[%s4828_s17 + $0x28] sm:$0xff]   ;;  %v4085_v12 = vld [vmem:[#allocation7 + $0x140] ss:$16 sps:$4 sm:$0xff]   ;;  %v4093_v13 = vld [vmem:[#allocation7 + $0x164] ss:$16 sps:$4 sm:$0xff]   ;;  %s3188_s25 = scalar_lea.sflag [#allocation4], %s4824_s12 }
  0xb8   : > { %737 = vmatprep.subr.bf16.mxu1 %v4018_v33  ;;  %v4064_v10 = vld [vmem:[#allocation7 + $0xc8] ss:$16 sps:$4 sm:$0xff]   ;;  %v4072_v11 = vld [vmem:[#allocation7 + $0xec] ss:$16 sps:$4 sm:$0xff]   ;;  %v4091_v16 = vld [vmem:[#allocation7 + $0x160] ss:$16 sps:$4 sm:$0xff]  }
  0xb9   : > { %v4070_v14 = vld [vmem:[#allocation7 + $0xe8] ss:$16 sps:$4 sm:$0xff]   ;;  %v4078_v15 = vld [vmem:[#allocation7 + $0x10c] ss:$16 sps:$4 sm:$0xff]   ;;  %v4099_v17 = vld [vmem:[#allocation7 + $0x184] ss:$16 sps:$4 sm:$0xff]  }
  0xba   : > { %625 = vmatpush1.bf16.msra.mxu0 %v3989_v19  ;;  %v4014_v18 = vld [vmem:[%s4828_s17 + $0x30] sm:$0xff]   ;;  %v4076_v19 = vld [vmem:[#allocation7 + $0x108] ss:$16 sps:$4 sm:$0xff]   ;;  %v4084_v20 = vld [vmem:[#allocation7 + $0x12c] ss:$16 sps:$4 sm:$0xff]   ;;  %s4471_s29 = scalar_lea.vmem %s5363_s7, 2048 }
  0xbb   : > { %626 = vmatprep.subr.bf16.mxu0 %v3990_v22  ;;  %738 = vmatpush1.bf16.msra.mxu1 %v4020_v37  ;;  %v4097_v21 = vld [vmem:[#allocation7 + $0x180] ss:$16 sps:$4 sm:$0xff]   ;;  %v4105_v22 = vld [vmem:[#allocation7 + $0x1a4] ss:$16 sps:$4 sm:$0xff]   ;;  %v4090_v24 = vld [vmem:[#allocation7 + $0x14c] ss:$16 sps:$4 sm:$0xff]   ;;  %p4472_p10 = scmp.ne.s32.totalorder %s5363_s7, %s4471_s29 }
  0xbc   : > { %739 = vmatprep.subr.bf16.mxu1 %v4022_v38  ;;  %v4103_v25 = vld [vmem:[#allocation7 + $0x1a0] ss:$16 sps:$4 sm:$0xff]   ;;  %v4088_v27 = vld [vmem:[#allocation7 + $0x148] ss:$16 sps:$4 sm:$0xff]   ;;  %v4108_v32 = vld [vmem:[#allocation7 + $0x1ac] ss:$16 sps:$4 sm:$0xff]  }
  0xbd   : > { %v4094_v29 = vld [vmem:[#allocation7 + $0x168] ss:$16 sps:$4 sm:$0xff]   ;;  %v4117_v38 = vld [vmem:[#allocation7 + $0x1e4] ss:$16 sps:$4 sm:$0xff]   ;;  %p4473_p5 = pnand %p4472_p10, %p4772_p3  ;;  %s4559_s19 = smov [#allocation11]  }
  0xbe   : > { %627 = vmatpush1.bf16.msra.mxu0 %v3992_v23  ;;  %v4082_v23 = vld [vmem:[#allocation7 + $0x128] ss:$16 sps:$4 sm:$0xff]   ;;  %s4475_s16 = sshll.u32 %s4559_s19, 4  ;;  %s4476_s16 = int_to_ptr.vmem [resolvable:$false] %s4475_s16 }
  0xbf   : > { %1723 = vmatprep.subr.bf16.mxu0 %v4027_v28  ;;  %740 = vmatpush1.bf16.msra.mxu1 %v4024_v41  ;;  %v4096_v28 = vld [vmem:[#allocation7 + $0x16c] ss:$16 sps:$4 sm:$0xff]   ;;  %v4106_v33 = vld [vmem:[#allocation7 + $0x1a8] ss:$16 sps:$4 sm:$0xff]   ;;  %p4474_p7 = pneg %p4473_p5  ;;  %s4477_s10 = scalar_lea.vmem %s4476_s16, 4096 }
  0xc0   : > { %1949 = vmatprep.subr.bf16.mxu1 %v4030_v42  ;;  %v4112_v37 = vld [vmem:[#allocation7 + $0x1c8] ss:$16 sps:$4 sm:$0xff]   ;;  %v4126_v42 = vld [vmem:[#allocation7 + $0x20c] ss:$16 sps:$4 sm:$0xff]   ;;  %p4478_p12 = scmp.lt.s32.totalorder %s5363_s7, %s4476_s16  ;;  %p4479_p1 = scmp.lt.s32.totalorder %s4477_s10, %s4471_s29 }
  0xc1   : > { %645 = vmatmul.mubr.bf16.vlgmr.msra.gmra.mrb[0].mxu0 %v3993_v26  ;;  %v4118_v41 = vld [vmem:[#allocation7 + $0x1e8] ss:$16 sps:$4 sm:$0xff]  }
  0xc2   : > { %654 = vmatprep.mubr.bf16.mxu0 %v4558_v0  ;;  %1724 = vmatpush1.bf16.msra.mxu0 %v4025_v30  ;;  %v4102_v30 = vld [vmem:[#allocation7 + $0x18c] ss:$16 sps:$4 sm:$0xff]   ;;  %p4480_p2 = por %p4479_p1, %p4478_p12 }
  0xc3   : > { %1725 = vmatprep.subr.bf16.mxu0 %v4033_v31  ;;  %758 = vmatmul.mubr.bf16.vlgmr.msra.gmra.mrb[0].mxu1 %v3993_v26  ;;  %v4021_v26 = vld [vmem:[%s4828_s17 + $0x38] sm:$0xff]  }
  0xc4   : > { %767 = vmatprep.mubr.bf16.mxu1 %v4558_v0  ;;  %1950 = vmatpush1.bf16.msra.mxu1 %v4028_v46  ;;  %v4100_v31 = vld [vmem:[#allocation7 + $0x188] ss:$16 sps:$4 sm:$0xff]   ;;  %v331_v46 = vld [vmem:[%s5415_s5] sm:$0xf]  ;;  %p4481_p13 = pnand %p4480_p2, %p4474_p7 }
  0xc5   : > { %1951 = vmatprep.subr.bf16.mxu1 %v4036_v47 }
  0xc6   : > { %1726 = vmatpush1.bf16.msra.mxu0 %v4031_v34  ;;  %v4111_v34 = vld [vmem:[#allocation7 + $0x1c4] ss:$16 sps:$4 sm:$0xff]  }
  0xc7   : > { %1727 = vmatprep.subr.bf16.mxu0 %v4039_v35  ;;  %v4114_v35 = vld [vmem:[#allocation7 + $0x1cc] ss:$16 sps:$4 sm:$0xff]  }
  0xc8   : > { %1952 = vmatpush1.bf16.msra.mxu1 %v4034_v50 }
  0xc9   : > { %655 = vmatmul.mubr.bf16.gmra.mrb[4].mxu0 %v3994_v36  ;;  %1953 = vmatprep.subr.bf16.mxu1 %v4042_v51 }
  0xca   : > { %664 = vmatprep.mubr.bf16.mxu0 %v4558_v0  ;;  %1728 = vmatpush1.bf16.msra.mxu0 %v4037_v39  ;;  %v4120_v39 = vld [vmem:[#allocation7 + $0x1ec] ss:$16 sps:$4 sm:$0xff]  }
  0xcb   : > { %1729 = vmatprep.subr.bf16.mxu0 %v4045_v40  ;;  %768 = vmatmul.mubr.bf16.gmra.mrb[4].mxu1 %v3994_v36  ;;  %v4109_v36 = vld [vmem:[#allocation7 + $0x1c0] ss:$16 sps:$4 sm:$0xff]  }
  0xcc   : > { %777 = vmatprep.mubr.bf16.mxu1 %v4558_v0  ;;  %1954 = vmatpush1.bf16.msra.mxu1 %v4040_v55  ;;  %v4115_v40 = vld [vmem:[#allocation7 + $0x1e0] ss:$16 sps:$4 sm:$0xff]  }
  0xcd   : > { %1955 = vmatprep.subr.bf16.mxu1 %v4048_v56 }
  0xce   : > { %1730 = vmatpush1.bf16.msra.mxu0 %v4043_v43  ;;  %v384_v43 = vlaneseq }
  0xcf   : > { %1731 = vmatprep.subr.bf16.mxu0 %v4051_v44 }
  0xd0   : > { %1956 = vmatpush1.bf16.msra.mxu1 %v4046_v59  ;;  %v4866_v44 = vshrl.u32 %v384_v43, 7 }
  0xd1   : > { %665 = vmatmul.mubr.bf16.gmra.mrb[8].mxu0 %v3995_v45  ;;  %1957 = vmatprep.subr.bf16.mxu1 %v4054_v60 }
  0xd2   : > { %674 = vmatprep.mubr.bf16.mxu0 %v4558_v0  ;;  %1732 = vmatpush1.bf16.msra.mxu0 %v4049_v48  ;;  %v4875_v47 = vsub.s32 1, %v4866_v44 }
  0xd3   : > { %1733 = vmatprep.subr.bf16.mxu0 %v4057_v49  ;;  %778 = vmatmul.mubr.bf16.gmra.mrb[8].mxu1 %v3995_v45  ;;  %v4869_v45 = vsub.s32 0, %v4866_v44 }
  0xd4   : > { %787 = vmatprep.mubr.bf16.mxu1 %v4558_v0  ;;  %1958 = vmatpush1.bf16.msra.mxu1 %v4052_v1  ;;  %v4881_v49 = vrot.slane %v331_v46, %v4875_v47 }
  0xd5   : > { %1959 = vmatprep.subr.bf16.mxu1 %v4060_v2  ;;  %v4878_v48 = vrot.slane %v331_v46, %v4869_v45  ;;  %v4121_v2 = vld [vmem:[#allocation7 + $0x200] ss:$16 sps:$4 sm:$0xff]  }
  0xd6   : > { %1734 = vmatpush1.bf16.msra.mxu0 %v4055_v52 }
  0xd7   : > { %1735 = vmatprep.subr.bf16.mxu0 %v4063_v53 }
  0xd8   : > { %1960 = vmatpush1.bf16.msra.mxu1 %v4058_v5 }
  0xd9   : > { %675 = vmatmul.mubr.bf16.gmra.mrb[12].mxu0 %v3996_v54  ;;  %1961 = vmatprep.subr.bf16.mxu1 %v4066_v6 }
  0xda   : > { %684 = vmatprep.mubr.bf16.mxu0 %v4558_v0  ;;  %1736 = vmatpush1.bf16.msra.mxu0 %v4061_v57 }
  0xdb   : > { %1737 = vmatprep.subr.bf16.mxu0 %v4069_v58  ;;  %788 = vmatmul.mubr.bf16.gmra.mrb[12].mxu1 %v3996_v54 }
  0xdc   : > { %797 = vmatprep.mubr.bf16.mxu1 %v4558_v0  ;;  %1962 = vmatpush1.bf16.msra.mxu1 %v4064_v10 }
  0xdd   : > { %1963 = vmatprep.subr.bf16.mxu1 %v4072_v11 }
  0xde   : > { %1738 = vmatpush1.bf16.msra.mxu0 %v4067_v61 }
  0xdf   : > { %1739 = vmatprep.subr.bf16.mxu0 %v4075_v62 }
  0xe0   : > { %1964 = vmatpush1.bf16.msra.mxu1 %v4070_v14 }
  0xe1   : > { %685 = vmatmul.mubr.bf16.gmra.mrb[16].mxu0 %v4000_v63  ;;  %1965 = vmatprep.subr.bf16.mxu1 %v4078_v15  ;;  %v4127_v15 = vld [vmem:[#allocation7 + $0x220] ss:$16 sps:$4 sm:$0xff]  }
  0xe2   : > { %694 = vmatprep.mubr.bf16.mxu0 %v4558_v0  ;;  %1740 = vmatpush1.bf16.msra.mxu0 %v4073_v3  ;;  %v4124_v3 = vld [vmem:[#allocation7 + $0x208] ss:$16 sps:$4 sm:$0xff]  }
  0xe3   : > { %1741 = vmatprep.subr.bf16.mxu0 %v4081_v4  ;;  %798 = vmatmul.mubr.bf16.gmra.mrb[16].mxu1 %v4000_v63  ;;  %v394_v4 = vsub.s32 2, %v4866_v44 }
  0xe4   : > { %807 = vmatprep.mubr.bf16.mxu1 %v4558_v0  ;;  %1966 = vmatpush1.bf16.msra.mxu1 %v4076_v19 }
  0xe5   : > { %1967 = vmatprep.subr.bf16.mxu1 %v4084_v20  ;;  %v4135_v20 = vld [vmem:[#allocation7 + $0x244] ss:$16 sps:$4 sm:$0xff]  }
  0xe6   : > { %1742 = vmatpush1.bf16.msra.mxu0 %v4079_v7  ;;  %v4129_v7 = vld [vmem:[#allocation7 + $0x224] ss:$16 sps:$4 sm:$0xff]  }
  0xe7   : > { %1743 = vmatprep.subr.bf16.mxu0 %v4087_v8  ;;  %v4132_v8 = vld [vmem:[#allocation7 + $0x22c] ss:$16 sps:$4 sm:$0xff]  }
  0xe8   : > { %1968 = vmatpush1.bf16.msra.mxu1 %v4082_v23 }
  0xe9   : > { %695 = vmatmul.mubr.bf16.gmra.mrb[20].mxu0 %v4007_v9  ;;  %1969 = vmatprep.subr.bf16.mxu1 %v4090_v24 }
  0xea   : > { %704 = vmatprep.mubr.bf16.mxu0 %v4558_v0  ;;  %1744 = vmatpush1.bf16.msra.mxu0 %v4085_v12 }
  0xeb   : > { %1745 = vmatprep.subr.bf16.mxu0 %v4093_v13  ;;  %808 = vmatmul.mubr.bf16.gmra.mrb[20].mxu1 %v4007_v9  ;;  %v398_v9 = vsub.s32 3, %v4866_v44 }
  0xec   : > { %817 = vmatprep.mubr.bf16.mxu1 %v4558_v0  ;;  %1970 = vmatpush1.bf16.msra.mxu1 %v4088_v27 }
  0xed   : > { %1971 = vmatprep.subr.bf16.mxu1 %v4096_v28 }
  0xee   : > { %1746 = vmatpush1.bf16.msra.mxu0 %v4091_v16  ;;  %v4130_v16 = vld [vmem:[#allocation7 + $0x228] ss:$16 sps:$4 sm:$0xff]  }
  0xef   : > { %1747 = vmatprep.subr.bf16.mxu0 %v4099_v17  ;;  %v4895_v17 = vrot.slane %v331_v46, %v394_v4 }
  0xf0   : > { %1972 = vmatpush1.bf16.msra.mxu1 %v4094_v29  ;;  %v4133_v29 = vld [vmem:[#allocation7 + $0x240] ss:$16 sps:$4 sm:$0xff]  }
  0xf1   : > { %705 = vmatmul.mubr.bf16.gmra.mrb[24].mxu0 %v4014_v18  ;;  %1973 = vmatprep.subr.bf16.mxu1 %v4102_v30  ;;  %v4136_v30 = vld [vmem:[#allocation7 + $0x248] ss:$16 sps:$4 sm:$0xff]  }
  0xf2   : > { %714 = vmatprep.mubr.bf16.mxu0 %v4558_v0  ;;  %1748 = vmatpush1.bf16.msra.mxu0 %v4097_v21  ;;  %v4138_v21 = vld [vmem:[#allocation7 + $0x24c] ss:$16 sps:$4 sm:$0xff]  }
  0xf3   : > { %1749 = vmatprep.subr.bf16.mxu0 %v4105_v22  ;;  %818 = vmatmul.mubr.bf16.gmra.mrb[24].mxu1 %v4014_v18  ;;  %v4899_v22 = vrot.slane %v331_v46, %v398_v9 }
  0xf4   : > { %827 = vmatprep.mubr.bf16.mxu1 %v4558_v0  ;;  %1974 = vmatpush1.bf16.msra.mxu1 %v4100_v31  ;;  %v4123_v0 = vld [vmem:[#allocation7 + $0x204] ss:$16 sps:$4 sm:$0xff]  }
  0xf5   : > { %1975 = vmatprep.subr.bf16.mxu1 %v4108_v32 }
  0xf6   : > { %1750 = vmatpush1.bf16.msra.mxu0 %v4103_v25 }
  0xf7   : > { %1751 = vmatprep.subr.bf16.mxu0 %v4111_v34 }
  0xf8   : > { %1976 = vmatpush1.bf16.msra.mxu1 %v4106_v33 }
  0xf9   : > { %715 = vmatmul.mubr.bf16.gmra.mrb[28].mxu0 %v4021_v26  ;;  %1977 = vmatprep.subr.bf16.mxu1 %v4114_v35  ;;  %v4141_v35 = vld [vmem:[#allocation7 + $0x264] ss:$16 sps:$4 sm:$0xff]  }
  0xfa   : > { %1752 = vmatpush1.bf16.msra.mxu0 %v4109_v36  ;;  %v4144_v36 = vld [vmem:[#allocation7 + $0x26c] ss:$16 sps:$4 sm:$0xff]  }
  0xfb   : > { %828 = vmatmul.mubr.bf16.gmra.mrb[28].mxu1 %v4021_v26  ;;  %1753 = vmatprep.subr.bf16.mxu0 %v4117_v38 }
  0xfc   : > { %1978 = vmatpush1.bf16.msra.mxu1 %v4112_v37 }
  0xfd   : > { %1979 = vmatprep.subr.bf16.mxu1 %v4120_v39 }
  0xfe   : > { %1754 = vmatpush1.bf16.msra.mxu0 %v4115_v40 }
  0xff   : > { %1836 = vmatprep.subr.bf16.mxu0 %v4123_v0 }
 0x100   : > { %1980 = vmatpush1.bf16.msra.mxu1 %v4118_v41 }
 0x101   : > { %2062 = vmatprep.subr.bf16.mxu1 %v4126_v42 }
 0x194   : > { %v646_v50 = vpop.f32.mrb[0].mxu0 }
 0x195   : > { %v647_v51 = vadd.f32 %v646_v50, %v4878_v48  ;;  %v648_v52 = vpop.f32.mrb[1].mxu0  ;;  %v4139_v50 = vld [vmem:[#allocation7 + $0x260] ss:$16 sps:$4 sm:$0xff]  }
 0x196   : > { %v649_v53 = vadd.f32 %v648_v52, %v4881_v49  ;;  %v650_v54 = vpop.f32.mrb[2].mxu0  ;;  %v759_v26 = vpop.f32.mrb[0].mxu1 }
 0x197   : > { %v651_v55 = vadd.f32 %v650_v54, %v4878_v48  ;;  %v652_v56 = vpop.f32.mrb[3].mxu0  ;;  %v838_v58 = vmax.f32 %v647_v51, 0.0  ;;  %v760_v31 = vadd.f32 %v759_v26, %v4895_v17  ;;  %v761_v32 = vpop.f32.mrb[1].mxu1  ;;  %v4142_v54 = vld [vmem:[#allocation7 + $0x268] ss:$16 sps:$4 sm:$0xff]  }
 0x198   : > { %v653_v57 = vadd.f32 %v652_v56, %v4881_v49  ;;  %v839_v60 = vmax.f32 %v649_v53, 0.0  ;;  %v762_v37 = vadd.f32 %v761_v32, %v4899_v22  ;;  %v763_v38 = vpop.f32.mrb[2].mxu1  ;;  %v4159_v32 = vld [vmem:[#allocation7 + $0x2c4] ss:$16 sps:$4 sm:$0xff]  }
 0x199   : > { %v842_v59 = vmax.f32 %v651_v55, 0.0  ;;  %v840_v41 = vmax.f32 %v760_v31, 0.0  ;;  %v764_v0 = vadd.f32 %v763_v38, %v4895_v17  ;;  %v765_v42 = vpop.f32.mrb[3].mxu1  ;;  %v4147_v55 = vld [vmem:[#allocation7 + $0x284] ss:$16 sps:$4 sm:$0xff]  }
 0x19a   : > { %v843_v61 = vmax.f32 %v653_v57, 0.0  ;;  %v841_v51 = vmax.f32 %v762_v37, 0.0  ;;  %v766_v52 = vadd.f32 %v765_v42, %v4899_v22  ;;  %v4154_v31 = vld [vmem:[#allocation7 + $0x2a8] ss:$16 sps:$4 sm:$0xff]  }
 0x19b   : > { %v902_v62 = vpack.c.bf16 %v842_v59, %v838_v58  ;;  %v844_v56 = vmax.f32 %v764_v0, 0.0  ;;  %v4150_v59 = vld [vmem:[#allocation7 + $0x28c] ss:$16 sps:$4 sm:$0xff]  }
 0x19c   : > { %v903_v63 = vpack.c.bf16 %v843_v61, %v839_v60  ;;  %v656_v1 = vpop.f32.mrb[4].mxu0  ;;  %v845_v60 = vmax.f32 %v766_v52, 0.0 }
 0x19d   : > { %v657_v5 = vadd.f32 %v656_v1, %v4878_v48  ;;  %v658_v6 = vpop.f32.mrb[5].mxu0 }
 0x19e   : > { %v659_v10 = vadd.f32 %v658_v6, %v4881_v49  ;;  %v660_v11 = vpop.f32.mrb[6].mxu0  ;;  %1755 = vmatprep.mubr.bf16.mxu0 %v903_v63  ;;  %1981 = vmatprep.mubr.bf16.mxu1 %v903_v63  ;;  %v4909_v63 = vpack.c.bf16 %v844_v56, %v840_v41  ;;  %v4165_v56 = vld [vmem:[#allocation7 + $0x2e4] ss:$16 sps:$4 sm:$0xff]  }
 0x19f   : > { %v661_v12 = vadd.f32 %v660_v11, %v4878_v48  ;;  %v662_v13 = vpop.f32.mrb[7].mxu0  ;;  %1756 = vmatmul.mubr.bf16.vlgmr.msra.gmra.mrb[32].mxu0 %v902_v62  ;;  %1982 = vmatmul.mubr.bf16.vlgmr.msra.gmra.mrb[32].mxu1 %v902_v62  ;;  %v846_v18 = vmax.f32 %v657_v5, 0.0 }
 0x1a0   : > { %v663_v14 = vadd.f32 %v662_v13, %v4881_v49  ;;  %1837 = vmatpush1.bf16.msra.mxu0 %v4121_v2  ;;  %2063 = vmatpush1.bf16.msra.mxu1 %v4124_v3  ;;  %v847_v23 = vmax.f32 %v659_v10, 0.0  ;;  %v4911_v2 = vpack.c.bf16 %v845_v60, %v841_v51  ;;  %v769_v3 = vpop.f32.mrb[4].mxu1  ;;  %v4160_v51 = vld [vmem:[#allocation7 + $0x2c8] ss:$16 sps:$4 sm:$0xff]  }
 0x1a1   : > { %v850_v19 = vmax.f32 %v661_v12, 0.0  ;;  %1838 = vmatprep.subr.bf16.mxu0 %v4129_v7  ;;  %2064 = vmatprep.subr.bf16.mxu1 %v4132_v8  ;;  %v4145_v7 = vld [vmem:[#allocation7 + $0x280] ss:$16 sps:$4 sm:$0xff]   ;;  %v4148_v8 = vld [vmem:[#allocation7 + $0x288] ss:$16 sps:$4 sm:$0xff]   ;;  %v770_v10 = vadd.f32 %v769_v3, %v4895_v17  ;;  %v771_v11 = vpop.f32.mrb[5].mxu1 }
 0x1a2   : > { %v851_v24 = vmax.f32 %v663_v14, 0.0  ;;  %v4153_v14 = vld [vmem:[#allocation7 + $0x2a4] ss:$16 sps:$4 sm:$0xff]  }
 0x1a3   : > { %v906_v25 = vpack.c.bf16 %v850_v19, %v846_v18  ;;  %v773_v18 = vpop.f32.mrb[6].mxu1 }
 0x1a4   : > { %v907_v27 = vpack.c.bf16 %v851_v24, %v847_v23  ;;  %1839 = vmatpush1.bf16.msra.mxu0 %v4127_v15  ;;  %v666_v28 = vpop.f32.mrb[8].mxu0  ;;  %2065 = vmatpush1.bf16.msra.mxu1 %v4130_v16  ;;  %v4156_v15 = vld [vmem:[#allocation7 + $0x2ac] ss:$16 sps:$4 sm:$0xff]   ;;  %v772_v16 = vadd.f32 %v771_v11, %v4899_v22  ;;  %v774_v23 = vadd.f32 %v773_v18, %v4895_v17  ;;  %v775_v24 = vpop.f32.mrb[7].mxu1 }
 0x1a5   : > { %v667_v33 = vadd.f32 %v666_v28, %v4878_v48  ;;  %v668_v34 = vpop.f32.mrb[9].mxu0  ;;  %1840 = vmatprep.subr.bf16.mxu0 %v4135_v20  ;;  %2066 = vmatprep.subr.bf16.mxu1 %v4138_v21  ;;  %v848_v21 = vmax.f32 %v770_v10, 0.0  ;;  %v4174_v18 = vld [vmem:[#allocation7 + $0x30c] ss:$16 sps:$4 sm:$0xff]  }
 0x1a6   : > { %v669_v39 = vadd.f32 %v668_v34, %v4881_v49  ;;  %v670_v40 = vpop.f32.mrb[10].mxu0  ;;  %1765 = vmatprep.mubr.bf16.mxu0 %v907_v27  ;;  %1991 = vmatprep.mubr.bf16.mxu1 %v907_v27  ;;  %v4151_v27 = vld [vmem:[#allocation7 + $0x2a0] ss:$16 sps:$4 sm:$0xff]   ;;  %v849_v28 = vmax.f32 %v772_v16, 0.0  ;;  %v779_v42 = vpop.f32.mrb[8].mxu1 }
 0x1a7   : > { %v671_v43 = vadd.f32 %v670_v40, %v4878_v48  ;;  %v672_v46 = vpop.f32.mrb[11].mxu0  ;;  %1766 = vmatmul.mubr.bf16.gmra.mrb[36].mxu0 %v906_v25  ;;  %1992 = vmatmul.mubr.bf16.gmra.mrb[36].mxu1 %v906_v25  ;;  %v854_v57 = vmax.f32 %v667_v33, 0.0  ;;  %v852_v33 = vmax.f32 %v774_v23, 0.0  ;;  %v780_v52 = vadd.f32 %v779_v42, %v4895_v17 }
 0x1a8   : > { %v673_v53 = vadd.f32 %v672_v46, %v4881_v49  ;;  %1841 = vmatpush1.bf16.msra.mxu0 %v4133_v29  ;;  %2067 = vmatpush1.bf16.msra.mxu1 %v4136_v30  ;;  %v855_v61 = vmax.f32 %v669_v39, 0.0  ;;  %v776_v29 = vadd.f32 %v775_v24, %v4899_v22 }
 0x1a9   : > { %v858_v58 = vmax.f32 %v671_v43, 0.0  ;;  %1842 = vmatprep.subr.bf16.mxu0 %v4141_v35  ;;  %2068 = vmatprep.subr.bf16.mxu1 %v4144_v36  ;;  %v4162_v36 = vld [vmem:[#allocation7 + $0x2cc] ss:$16 sps:$4 sm:$0xff]   ;;  %v4921_v40 = vpack.c.bf16 %v852_v33, %v848_v21 }
 0x1aa   : > { %v859_v62 = vmax.f32 %v673_v53, 0.0  ;;  %v853_v37 = vmax.f32 %v776_v29, 0.0  ;;  %v781_v53 = vpop.f32.mrb[9].mxu1  ;;  %v4169_v29 = vld [vmem:[#allocation7 + $0x300] ss:$16 sps:$4 sm:$0xff]  }
 0x1ab   : > { %v910_v1 = vpack.c.bf16 %v858_v58, %v854_v57  ;;  %v4168_v57 = vld [vmem:[#allocation7 + $0x2ec] ss:$16 sps:$4 sm:$0xff]   ;;  %v782_v58 = vadd.f32 %v781_v53, %v4899_v22 }
 0x1ac   : > { %v911_v5 = vpack.c.bf16 %v859_v62, %v855_v61  ;;  %1843 = vmatpush1.bf16.msra.mxu0 %v4139_v50  ;;  %v676_v6 = vpop.f32.mrb[12].mxu0  ;;  %2069 = vmatpush1.bf16.msra.mxu1 %v4142_v54  ;;  %v4923_v0 = vpack.c.bf16 %v853_v37, %v849_v28  ;;  %v4157_v50 = vld [vmem:[#allocation7 + $0x2c0] ss:$16 sps:$4 sm:$0xff]   ;;  %v856_v62 = vmax.f32 %v780_v52, 0.0 }
 0x1ad   : > { %v677_v12 = vadd.f32 %v676_v6, %v4878_v48  ;;  %v678_v13 = vpop.f32.mrb[13].mxu0  ;;  %1844 = vmatprep.subr.bf16.mxu0 %v4147_v55  ;;  %2070 = vmatprep.subr.bf16.mxu1 %v4150_v59  ;;  %v783_v59 = vpop.f32.mrb[10].mxu1  ;;  %v4175_v52 = vld [vmem:[#allocation7 + $0x320] ss:$16 sps:$4 sm:$0xff]  }
 0x1ae   : > { %v679_v19 = vadd.f32 %v678_v13, %v4881_v49  ;;  %v680_v20 = vpop.f32.mrb[14].mxu0  ;;  %1775 = vmatprep.mubr.bf16.mxu0 %v911_v5  ;;  %2001 = vmatprep.mubr.bf16.mxu1 %v911_v5  ;;  %v785_v3 = vpop.f32.mrb[11].mxu1  ;;  %v4171_v13 = vld [vmem:[#allocation7 + $0x304] ss:$16 sps:$4 sm:$0xff]  }
 0x1af   : > { %v681_v25 = vadd.f32 %v680_v20, %v4878_v48  ;;  %v682_v26 = vpop.f32.mrb[15].mxu0  ;;  %1776 = vmatmul.mubr.bf16.gmra.mrb[40].mxu0 %v910_v1  ;;  %2002 = vmatmul.mubr.bf16.gmra.mrb[40].mxu1 %v910_v1  ;;  %v862_v34 = vmax.f32 %v677_v12, 0.0  ;;  %v784_v1 = vadd.f32 %v783_v59, %v4895_v17  ;;  %v786_v10 = vadd.f32 %v785_v3, %v4899_v22  ;;  %v4166_v12 = vld [vmem:[#allocation7 + $0x2e8] ss:$16 sps:$4 sm:$0xff]  }
 0x1b0   : > { %v683_v30 = vadd.f32 %v682_v26, %v4881_v49  ;;  %1845 = vmatpush1.bf16.msra.mxu0 %v4145_v7  ;;  %2071 = vmatpush1.bf16.msra.mxu1 %v4148_v8  ;;  %v863_v38 = vmax.f32 %v679_v19, 0.0  ;;  %v4163_v7 = vld [vmem:[#allocation7 + $0x2e0] ss:$16 sps:$4 sm:$0xff]   ;;  %v857_v8 = vmax.f32 %v782_v58, 0.0  ;;  %v789_v26 = vpop.f32.mrb[12].mxu1 }
 0x1b1   : > { %v866_v35 = vmax.f32 %v681_v25, 0.0  ;;  %1846 = vmatprep.subr.bf16.mxu0 %v4153_v14  ;;  %2072 = vmatprep.subr.bf16.mxu1 %v4156_v15  ;;  %v860_v14 = vmax.f32 %v784_v1, 0.0  ;;  %v861_v19 = vmax.f32 %v786_v10, 0.0 }
 0x1b2   : > { %v867_v39 = vmax.f32 %v683_v30, 0.0  ;;  %v4172_v30 = vld [vmem:[#allocation7 + $0x308] ss:$16 sps:$4 sm:$0xff]  }
 0x1b3   : > { %v914_v41 = vpack.c.bf16 %v866_v35, %v862_v34  ;;  %v4933_v23 = vpack.c.bf16 %v860_v14, %v856_v62  ;;  %v4935_v25 = vpack.c.bf16 %v861_v19, %v857_v8  ;;  %v4177_v35 = vld [vmem:[#allocation7 + $0x324] ss:$16 sps:$4 sm:$0xff]  }
 0x1b4   : > { %v915_v43 = vpack.c.bf16 %v867_v39, %v863_v38  ;;  %1847 = vmatpush1.bf16.msra.mxu0 %v4151_v27  ;;  %v686_v46 = vpop.f32.mrb[16].mxu0  ;;  %2073 = vmatpush1.bf16.msra.mxu1 %v4154_v31  ;;  %v790_v31 = vadd.f32 %v789_v26, %v4895_v17  ;;  %v4189_v19 = vld [vmem:[#allocation7 + $0x364] ss:$16 sps:$4 sm:$0xff]  }
 0x1b5   : > { %v687_v54 = vadd.f32 %v686_v46, %v4878_v48  ;;  %v688_v55 = vpop.f32.mrb[17].mxu0  ;;  %1848 = vmatprep.subr.bf16.mxu0 %v4159_v32  ;;  %2074 = vmatprep.subr.bf16.mxu1 %v4162_v36  ;;  %v791_v32 = vpop.f32.mrb[13].mxu1  ;;  %v4180_v36 = vld [vmem:[#allocation7 + $0x32c] ss:$16 sps:$4 sm:$0xff]  }
 0x1b6   : > { %v689_v60 = vadd.f32 %v688_v55, %v4881_v49  ;;  %v690_v61 = vpop.f32.mrb[18].mxu0  ;;  %1785 = vmatprep.mubr.bf16.mxu0 %v915_v43  ;;  %2011 = vmatprep.mubr.bf16.mxu1 %v915_v43  ;;  %v792_v37 = vadd.f32 %v791_v32, %v4899_v22  ;;  %v793_v38 = vpop.f32.mrb[14].mxu1  ;;  %v864_v42 = vmax.f32 %v790_v31, 0.0 }
 0x1b7   : > { %v691_v5 = vadd.f32 %v690_v61, %v4878_v48  ;;  %v692_v6 = vpop.f32.mrb[19].mxu0  ;;  %1786 = vmatmul.mubr.bf16.gmra.mrb[44].mxu0 %v914_v41  ;;  %2012 = vmatmul.mubr.bf16.gmra.mrb[44].mxu1 %v914_v41  ;;  %v870_v15 = vmax.f32 %v687_v54, 0.0  ;;  %v794_v43 = vadd.f32 %v793_v38, %v4895_v17  ;;  %v795_v46 = vpop.f32.mrb[15].mxu1  ;;  %v4186_v61 = vld [vmem:[#allocation7 + $0x34c] ss:$16 sps:$4 sm:$0xff]  }
 0x1b8   : > { %v693_v11 = vadd.f32 %v692_v6, %v4881_v49  ;;  %1849 = vmatpush1.bf16.msra.mxu0 %v4157_v50  ;;  %2075 = vmatpush1.bf16.msra.mxu1 %v4160_v51  ;;  %v871_v20 = vmax.f32 %v689_v60, 0.0  ;;  %v865_v53 = vmax.f32 %v792_v37, 0.0  ;;  %v796_v54 = vadd.f32 %v795_v46, %v4899_v22  ;;  %v799_v8 = vpop.f32.mrb[16].mxu1  ;;  %v4190_v37 = vld [vmem:[#allocation7 + $0x368] ss:$16 sps:$4 sm:$0xff]  }
 0x1b9   : > { %v874_v16 = vmax.f32 %v691_v5, 0.0  ;;  %1850 = vmatprep.subr.bf16.mxu0 %v4165_v56  ;;  %2076 = vmatprep.subr.bf16.mxu1 %v4168_v57  ;;  %v4178_v56 = vld [vmem:[#allocation7 + $0x328] ss:$16 sps:$4 sm:$0xff]   ;;  %v4183_v57 = vld [vmem:[#allocation7 + $0x344] ss:$16 sps:$4 sm:$0xff]   ;;  %v868_v58 = vmax.f32 %v794_v43, 0.0  ;;  %v800_v14 = vadd.f32 %v799_v8, %v4895_v17 }
 0x1ba   : > { %v875_v21 = vmax.f32 %v693_v11, 0.0  ;;  %v869_v62 = vmax.f32 %v796_v54, 0.0  ;;  %v4195_v38 = vld [vmem:[#allocation7 + $0x384] ss:$16 sps:$4 sm:$0xff]   ;;  %v4198_v43 = vld [vmem:[#allocation7 + $0x38c] ss:$16 sps:$4 sm:$0xff]  }
 0x1bb   : > { %v918_v24 = vpack.c.bf16 %v874_v16, %v870_v15  ;;  %v4945_v5 = vpack.c.bf16 %v868_v58, %v864_v42  ;;  %v801_v15 = vpop.f32.mrb[17].mxu1  ;;  %v4193_v58 = vld [vmem:[#allocation7 + $0x380] ss:$16 sps:$4 sm:$0xff]  }
 0x1bc   : > { %v919_v27 = vpack.c.bf16 %v875_v21, %v871_v20  ;;  %1851 = vmatpush1.bf16.msra.mxu0 %v4163_v7  ;;  %v696_v28 = vpop.f32.mrb[20].mxu0  ;;  %2077 = vmatpush1.bf16.msra.mxu1 %v4166_v12  ;;  %v4947_v7 = vpack.c.bf16 %v869_v62, %v865_v53  ;;  %v4181_v12 = vld [vmem:[#allocation7 + $0x340] ss:$16 sps:$4 sm:$0xff]   ;;  %v4192_v20 = vld [vmem:[#allocation7 + $0x36c] ss:$16 sps:$4 sm:$0xff]   ;;  %v802_v21 = vadd.f32 %v801_v15, %v4899_v22 }
 0x1bd   : > { %v697_v33 = vadd.f32 %v696_v28, %v4878_v48  ;;  %v698_v34 = vpop.f32.mrb[21].mxu0  ;;  %1852 = vmatprep.subr.bf16.mxu0 %v4171_v13  ;;  %2078 = vmatprep.subr.bf16.mxu1 %v4174_v18  ;;  %v4184_v13 = vld [vmem:[#allocation7 + $0x348] ss:$16 sps:$4 sm:$0xff]   ;;  %v872_v28 = vmax.f32 %v800_v14, 0.0 }
 0x1be   : > { %v699_v39 = vadd.f32 %v698_v34, %v4881_v49  ;;  %v700_v41 = vpop.f32.mrb[22].mxu0  ;;  %1795 = vmatprep.mubr.bf16.mxu0 %v919_v27  ;;  %2021 = vmatprep.mubr.bf16.mxu1 %v919_v27  ;;  %v873_v34 = vmax.f32 %v802_v21, 0.0 }
 0x1bf   : > { %v701_v50 = vadd.f32 %v700_v41, %v4878_v48  ;;  %v702_v51 = vpop.f32.mrb[23].mxu0  ;;  %1796 = vmatmul.mubr.bf16.gmra.mrb[48].mxu0 %v918_v24  ;;  %2022 = vmatmul.mubr.bf16.gmra.mrb[48].mxu1 %v918_v24  ;;  %v878_v59 = vmax.f32 %v697_v33, 0.0  ;;  %v803_v24 = vpop.f32.mrb[18].mxu1  ;;  %v4187_v33 = vld [vmem:[#allocation7 + $0x360] ss:$16 sps:$4 sm:$0xff]  }
 0x1c0   : > { %v703_v55 = vadd.f32 %v702_v51, %v4881_v49  ;;  %1853 = vmatpush1.bf16.msra.mxu0 %v4169_v29  ;;  %2079 = vmatpush1.bf16.msra.mxu1 %v4172_v30  ;;  %v879_v1 = vmax.f32 %v699_v39, 0.0  ;;  %v804_v29 = vadd.f32 %v803_v24, %v4895_v17  ;;  %v805_v30 = vpop.f32.mrb[19].mxu1 }
 0x1c1   : > { %v882_v60 = vmax.f32 %v701_v50, 0.0  ;;  %1854 = vmatprep.subr.bf16.mxu0 %v4177_v35  ;;  %2080 = vmatprep.subr.bf16.mxu1 %v4180_v36  ;;  %v806_v35 = vadd.f32 %v805_v30, %v4899_v22 }
 0x1c2   : > { %v883_v3 = vmax.f32 %v703_v55, 0.0  ;;  %v876_v39 = vmax.f32 %v804_v29, 0.0  ;;  %v809_v55 = vpop.f32.mrb[20].mxu1 }
 0x1c3   : > { %v922_v6 = vpack.c.bf16 %v882_v60, %v878_v59  ;;  %v877_v46 = vmax.f32 %v806_v35, 0.0  ;;  %v4196_v59 = vld [vmem:[#allocation7 + $0x388] ss:$16 sps:$4 sm:$0xff]   ;;  %v810_v60 = vadd.f32 %v809_v55, %v4895_v17 }
 0x1c4   : > { %v923_v10 = vpack.c.bf16 %v883_v3, %v879_v1  ;;  %1855 = vmatpush1.bf16.msra.mxu0 %v4175_v52  ;;  %v706_v11 = vpop.f32.mrb[24].mxu0  ;;  %2081 = vmatpush1.bf16.msra.mxu1 %v4178_v56  ;;  %v4957_v52 = vpack.c.bf16 %v876_v39, %v872_v28  ;;  %v4201_v3 = vld [vmem:[#allocation7 + $0x3a4] ss:$16 sps:$4 sm:$0xff]   ;;  %v4208_v39 = vld [vmem:[#allocation7 + $0x3c8] ss:$16 sps:$4 sm:$0xff]  }
 0x1c5   : > { %v707_v16 = vadd.f32 %v706_v11, %v4878_v48  ;;  %v708_v18 = vpop.f32.mrb[25].mxu0  ;;  %1856 = vmatprep.subr.bf16.mxu0 %v4183_v57  ;;  %2082 = vmatprep.subr.bf16.mxu1 %v4186_v61  ;;  %v4959_v54 = vpack.c.bf16 %v877_v46, %v873_v34  ;;  %v811_v61 = vpop.f32.mrb[21].mxu1 }
 0x1c6   : > { %v709_v26 = vadd.f32 %v708_v18, %v4881_v49  ;;  %v710_v27 = vpop.f32.mrb[26].mxu0  ;;  %1805 = vmatprep.mubr.bf16.mxu0 %v923_v10  ;;  %2031 = vmatprep.mubr.bf16.mxu1 %v923_v10  ;;  %v812_v8 = vadd.f32 %v811_v61, %v4899_v22  ;;  %v813_v10 = vpop.f32.mrb[22].mxu1 }
 0x1c7   : > { %v711_v31 = vadd.f32 %v710_v27, %v4878_v48  ;;  %v712_v32 = vpop.f32.mrb[27].mxu0  ;;  %1806 = vmatmul.mubr.bf16.gmra.mrb[52].mxu0 %v922_v6  ;;  %2032 = vmatmul.mubr.bf16.gmra.mrb[52].mxu1 %v922_v6  ;;  %v886_v41 = vmax.f32 %v707_v16, 0.0  ;;  %v4204_v6 = vld [vmem:[#allocation7 + $0x3ac] ss:$16 sps:$4 sm:$0xff]   ;;  %v814_v14 = vadd.f32 %v813_v10, %v4895_v17  ;;  %v815_v15 = vpop.f32.mrb[23].mxu1 }
 0x1c8   : > { %v713_v36 = vadd.f32 %v712_v32, %v4881_v49  ;;  %1857 = vmatpush1.bf16.msra.mxu0 %v4181_v12  ;;  %2083 = vmatpush1.bf16.msra.mxu1 %v4184_v13  ;;  %v887_v50 = vmax.f32 %v709_v26, 0.0  ;;  %v880_v13 = vmax.f32 %v810_v60, 0.0  ;;  %v816_v21 = vadd.f32 %v815_v15, %v4899_v22  ;;  %v4202_v26 = vld [vmem:[#allocation7 + $0x3a8] ss:$16 sps:$4 sm:$0xff]   ;;  %v4207_v27 = vld [vmem:[#allocation7 + $0x3c4] ss:$16 sps:$4 sm:$0xff]  }
 0x1c9   : > { %v890_v42 = vmax.f32 %v711_v31, 0.0  ;;  %1858 = vmatprep.subr.bf16.mxu0 %v4189_v19  ;;  %2084 = vmatprep.subr.bf16.mxu1 %v4192_v20  ;;  %v4199_v19 = vld [vmem:[#allocation7 + $0x3a0] ss:$16 sps:$4 sm:$0xff]   ;;  %v881_v20 = vmax.f32 %v812_v8, 0.0  ;;  %v884_v28 = vmax.f32 %v814_v14, 0.0 }
 0x1ca   : > { %v891_v51 = vmax.f32 %v713_v36, 0.0  ;;  %v4210_v31 = vld [vmem:[#allocation7 + $0x3cc] ss:$16 sps:$4 sm:$0xff]   ;;  %v4214_v60 = vld [vmem:[#allocation7 + $0x3e8] ss:$16 sps:$4 sm:$0xff]  }
 0x1cb   : > { %v926_v53 = vpack.c.bf16 %v890_v42, %v886_v41  ;;  %v4969_v34 = vpack.c.bf16 %v884_v28, %v880_v13  ;;  %v4217_v15 = vld [vmem:[#allocation8] ss:$8 sps:$4 sm:$0xff]  }
 0x1cc   : > { %v927_v56 = vpack.c.bf16 %v891_v51, %v887_v50  ;;  %1859 = vmatpush1.bf16.msra.mxu0 %v4187_v33  ;;  %v716_v57 = vpop.f32.mrb[28].mxu0  ;;  %2085 = vmatpush1.bf16.msra.mxu1 %v4190_v37  ;;  %v819_v37 = vpop.f32.mrb[24].mxu1  ;;  %v4216_v51 = vld [vmem:[#allocation7 + $0x3ec] ss:$16 sps:$4 sm:$0xff]  }
 0x1cd   : > { %v717_v62 = vadd.f32 %v716_v57, %v4878_v48  ;;  %v718_v1 = vpop.f32.mrb[29].mxu0  ;;  %1860 = vmatprep.subr.bf16.mxu0 %v4195_v38  ;;  %2086 = vmatprep.subr.bf16.mxu1 %v4198_v43  ;;  %v4205_v38 = vld [vmem:[#allocation7 + $0x3c0] ss:$16 sps:$4 sm:$0xff]   ;;  %v820_v41 = vadd.f32 %v819_v37, %v4895_v17  ;;  %v821_v42 = vpop.f32.mrb[25].mxu1  ;;  %v4213_v43 = vld [vmem:[#allocation7 + $0x3e4] ss:$16 sps:$4 sm:$0xff]  }
 0x1ce   : > { %v719_v11 = vadd.f32 %v718_v1, %v4881_v49  ;;  %v720_v12 = vpop.f32.mrb[30].mxu0  ;;  %1815 = vmatprep.mubr.bf16.mxu0 %v927_v56  ;;  %2041 = vmatprep.mubr.bf16.mxu1 %v927_v56  ;;  %v822_v46 = vadd.f32 %v821_v42, %v4899_v22  ;;  %v823_v50 = vpop.f32.mrb[26].mxu1  ;;  %v4219_v1 = vld [vmem:[#allocation8 + $0x4] ss:$8 sps:$4 sm:$0xff]   ;;  %v5019_v37 = vld [vmem:[#allocation8 + $0x130] ss:$8 sps:$4 sm:$0xff]  }
 0x1cf   : > { %v721_v16 = vadd.f32 %v720_v12, %v4878_v48  ;;  %v722_v18 = vpop.f32.mrb[31].mxu0  ;;  %1816 = vmatmul.mubr.bf16.gmra.mrb[56].mxu0 %v926_v53  ;;  %2042 = vmatmul.mubr.bf16.gmra.mrb[56].mxu1 %v926_v53  ;;  %v894_v29 = vmax.f32 %v717_v62, 0.0  ;;  %v885_v48 = vmax.f32 %v816_v21, 0.0  ;;  %v888_v53 = vmax.f32 %v820_v41, 0.0  ;;  %v825_v56 = vpop.f32.mrb[27].mxu1 }
 0x1d0   : > { %v723_v24 = vadd.f32 %v722_v18, %v4881_v49  ;;  %1861 = vmatpush1.bf16.msra.mxu0 %v4193_v58  ;;  %2087 = vmatpush1.bf16.msra.mxu1 %v4196_v59  ;;  %v895_v32 = vmax.f32 %v719_v11, 0.0  ;;  %v824_v55 = vadd.f32 %v823_v50, %v4895_v17  ;;  %v889_v57 = vmax.f32 %v822_v46, 0.0  ;;  %v4211_v59 = vld [vmem:[#allocation7 + $0x3e0] ss:$16 sps:$4 sm:$0xff]   ;;  %v829_v10 = vpop.f32.mrb[28].mxu1 }
 0x1d1   : > { %v898_v30 = vmax.f32 %v721_v16, 0.0  ;;  %1862 = vmatprep.subr.bf16.mxu0 %v4201_v3  ;;  %2088 = vmatprep.subr.bf16.mxu1 %v4204_v6  ;;  %v4971_v36 = vpack.c.bf16 %v885_v48, %v881_v20  ;;  %v826_v58 = vadd.f32 %v825_v56, %v4899_v22  ;;  %v4978_v3 = vld [vmem:[#allocation8 + $0x104] ss:$8 sps:$4 sm:$0xff]   ;;  %v830_v11 = vadd.f32 %v829_v10, %v4895_v17  ;;  %v831_v12 = vpop.f32.mrb[29].mxu1  ;;  %v4987_v16 = vld [vmem:[#allocation8 + $0x100] ss:$8 sps:$4 sm:$0xff]  }
 0x1d2   : > { %v899_v33 = vmax.f32 %v723_v24, 0.0  ;;  %v892_v61 = vmax.f32 %v824_v55, 0.0  ;;  %v832_v13 = vadd.f32 %v831_v12, %v4899_v22  ;;  %v833_v14 = vpop.f32.mrb[30].mxu1  ;;  %v4222_v20 = vld [vmem:[#allocation8 + $0x14] ss:$8 sps:$4 sm:$0xff]  }
 0x1d3   : > { %v930_v35 = vpack.c.bf16 %v898_v30, %v894_v29  ;;  %v893_v62 = vmax.f32 %v826_v58, 0.0  ;;  %v834_v18 = vadd.f32 %v833_v14, %v4895_v17  ;;  %v4991_v21 = vld [vmem:[#allocation8 + $0x114] ss:$8 sps:$4 sm:$0xff]   ;;  %v4220_v29 = vld [vmem:[#allocation8 + $0x10] ss:$8 sps:$4 sm:$0xff]  }
 0x1d4   : > { %v931_v49 = vpack.c.bf16 %v899_v33, %v895_v32  ;;  %1863 = vmatpush1.bf16.msra.mxu0 %v4199_v19  ;;  %2089 = vmatpush1.bf16.msra.mxu1 %v4202_v26  ;;  %v4981_v6 = vpack.c.bf16 %v892_v61, %v888_v53  ;;  %v835_v19 = vpop.f32.mrb[31].mxu1  ;;  %v897_v24 = vmax.f32 %v832_v13, 0.0  ;;  %v4999_v17 = vld [vmem:[#allocation8 + $0x110] ss:$8 sps:$4 sm:$0xff]   ;;  %v5009_v48 = vld [vmem:[#allocation8 + $0x120] ss:$8 sps:$4 sm:$0xff]  }
 0x1d5   : > { %1864 = vmatprep.subr.bf16.mxu0 %v4207_v27  ;;  %2090 = vmatprep.subr.bf16.mxu1 %v4210_v31  ;;  %v4983_v8 = vpack.c.bf16 %v893_v62, %v889_v57  ;;  %v836_v26 = vadd.f32 %v835_v19, %v4899_v22  ;;  %v900_v27 = vmax.f32 %v834_v18, 0.0  ;;  %v4225_v31 = vld [vmem:[#allocation8 + $0x24] ss:$8 sps:$4 sm:$0xff]   ;;  %v4228_v32 = vld [vmem:[#allocation8 + $0x34] ss:$8 sps:$4 sm:$0xff]  }
 0x1d6   : > { %1825 = vmatprep.mubr.bf16.mxu0 %v931_v49  ;;  %2051 = vmatprep.mubr.bf16.mxu1 %v931_v49  ;;  %v5012_v33 = vld [vmem:[#allocation8 + $0x134] ss:$8 sps:$4 sm:$0xff]   ;;  %v4231_v49 = vld [vmem:[#allocation8 + $0x44] ss:$8 sps:$4 sm:$0xff]   ;;  %v4232_v42 = vld [vmem:[#allocation8 + $0x50] ss:$8 sps:$4 sm:$0xff]  }
 0x1d7   : > { %1826 = vmatmul.mubr.bf16.gmra.mrb[60].mxu0 %v930_v35  ;;  %2052 = vmatmul.mubr.bf16.gmra.mrb[60].mxu1 %v930_v35  ;;  %v901_v28 = vmax.f32 %v836_v26, 0.0  ;;  %v4226_v35 = vld [vmem:[#allocation8 + $0x30] ss:$8 sps:$4 sm:$0xff]   ;;  %v5028_v41 = vld [vmem:[#allocation8 + $0x154] ss:$8 sps:$4 sm:$0xff]  }
 0x1d8   : > { %1865 = vmatpush1.bf16.msra.mxu0 %v4205_v38  ;;  %2091 = vmatpush1.bf16.msra.mxu1 %v4208_v39  ;;  %v5022_v38 = vld [vmem:[#allocation8 + $0x144] ss:$8 sps:$4 sm:$0xff]   ;;  %v4229_v39 = vld [vmem:[#allocation8 + $0x40] ss:$8 sps:$4 sm:$0xff]   ;;  %v4249_v55 = vld [vmem:[#allocation8 + $0x94] ss:$8 sps:$4 sm:$0xff]  }
 0x1d9   : > { %1866 = vmatprep.subr.bf16.mxu0 %v4213_v43  ;;  %1868 = vmatprep.mubr.bf16.mxu0 %v4911_v2  ;;  %v5006_v22 = vpack.c.bf16 %v901_v28, %v897_v24  ;;  %v5035_v43 = vld [vmem:[#allocation8 + $0x150] ss:$8 sps:$4 sm:$0xff]   ;;  %v4237_v46 = vld [vmem:[#allocation8 + $0x64] ss:$8 sps:$4 sm:$0xff]   ;;  %v4235_v50 = vld [vmem:[#allocation8 + $0x60] ss:$8 sps:$4 sm:$0xff]  }
 0x1da   : > { %2092 = vmatprep.subr.bf16.mxu1 %v4216_v51  ;;  %2094 = vmatprep.mubr.bf16.mxu1 %v4911_v2  ;;  %v896_v2 = vmax.f32 %v830_v11, 0.0  ;;  %v4243_v51 = vld [vmem:[#allocation8 + $0x84] ss:$8 sps:$4 sm:$0xff]   ;;  %v4241_v53 = vld [vmem:[#allocation8 + $0x80] ss:$8 sps:$4 sm:$0xff]  }
 0x1db   : > { %v4253_v56 = vld [vmem:[#allocation8 + $0xa0] ss:$8 sps:$4 sm:$0xff]   ;;  %v4261_v57 = vld [vmem:[#allocation8 + $0xb4] ss:$8 sps:$4 sm:$0xff]   ;;  %v5057_v61 = vld [vmem:[#allocation8 + $0x164] ss:$8 sps:$4 sm:$0xff]  }
 0x1dc   : > { %1867 = vmatpush1.bf16.msra.mxu0 %v4211_v59  ;;  %2093 = vmatpush1.bf16.msra.mxu1 %v4214_v60  ;;  %v5001_v30 = vpack.c.bf16 %v900_v27, %v896_v2  ;;  %v4265_v58 = vld [vmem:[#allocation8 + $0xc0] ss:$8 sps:$4 sm:$0xff]   ;;  %v4273_v59 = vld [vmem:[#allocation8 + $0xd4] ss:$8 sps:$4 sm:$0xff]   ;;  %v4279_v60 = vld [vmem:[#allocation8 + $0xe4] ss:$8 sps:$4 sm:$0xff]  }
 0x1dd   : > { %2666 = vmatprep.subr.bf16.mxu0 %v4219_v1  ;;  %3649 = vmatprep.subr.bf16.mxu1 %v4978_v3  ;;  %v4277_v62 = vld [vmem:[#allocation8 + $0xe0] ss:$8 sps:$4 sm:$0xff]   ;;  %v4283_v10 = vld [vmem:[#allocation8 + $0xf0] ss:$8 sps:$4 sm:$0xff]   ;;  %v5070_v12 = vld [vmem:[#allocation8 + $0x184] ss:$8 sps:$4 sm:$0xff]  }
 0x1de   : > { %v5059_v1 = vld [vmem:[#allocation8 + $0x160] ss:$8 sps:$4 sm:$0xff]   ;;  %v5065_v11 = vld [vmem:[#allocation8 + $0x170] ss:$8 sps:$4 sm:$0xff]   ;;  %v5076_v14 = vld [vmem:[#allocation8 + $0x194] ss:$8 sps:$4 sm:$0xff]  }
 0x1df   : > { %1869 = vmatmul.mubr.bf16.vlgmr.msra.gmra.mrb[32].mxu0 %v4909_v63  ;;  %2095 = vmatmul.mubr.bf16.vlgmr.msra.gmra.mrb[32].mxu1 %v4909_v63  ;;  %v5004_v63 = vld [vmem:[#allocation8 + $0x124] ss:$8 sps:$4 sm:$0xff]   ;;  %v5072_v13 = vld [vmem:[#allocation8 + $0x180] ss:$8 sps:$4 sm:$0xff]   ;;  %v5090_v19 = vld [vmem:[#allocation8 + $0x1b0] ss:$8 sps:$4 sm:$0xff]  }
 0x1e0   : > { %1878 = vmatprep.mubr.bf16.mxu0 %v4923_v0  ;;  %2104 = vmatprep.mubr.bf16.mxu1 %v4923_v0  ;;  %v4223_v0 = vld [vmem:[#allocation8 + $0x20] ss:$8 sps:$4 sm:$0xff]   ;;  %v5082_v2 = vld [vmem:[#allocation8 + $0x1a4] ss:$8 sps:$4 sm:$0xff]   ;;  %v5100_v26 = vld [vmem:[#allocation8 + $0x1d4] ss:$8 sps:$4 sm:$0xff]  }
 0x1e1   : > { %2667 = vmatpush1.bf16.msra.mxu0 %v4217_v15  ;;  %3665 = vmatpush1.bf16.msra.mxu1 %v4987_v16  ;;  %v5078_v15 = vld [vmem:[#allocation8 + $0x190] ss:$8 sps:$4 sm:$0xff]   ;;  %v5084_v18 = vld [vmem:[#allocation8 + $0x1a0] ss:$8 sps:$4 sm:$0xff]   ;;  %v5106_v28 = vld [vmem:[#allocation8 + $0x1e4] ss:$8 sps:$4 sm:$0xff]  }
 0x1e2   : > { %2668 = vmatprep.subr.bf16.mxu0 %v4222_v20  ;;  %3650 = vmatprep.subr.bf16.mxu1 %v4991_v21  ;;  %v5094_v20 = vld [vmem:[#allocation8 + $0x1c4] ss:$8 sps:$4 sm:$0xff]   ;;  %v5096_v24 = vld [vmem:[#allocation8 + $0x1c0] ss:$8 sps:$4 sm:$0xff]   ;;  %v5102_v27 = vld [vmem:[#allocation8 + $0x1d0] ss:$8 sps:$4 sm:$0xff]  }
 0x1e5   : > { %2669 = vmatpush1.bf16.msra.mxu0 %v4220_v29  ;;  %3666 = vmatpush1.bf16.msra.mxu1 %v4999_v17  ;;  %v5108_v29 = vld [vmem:[#allocation8 + $0x1e0] ss:$8 sps:$4 sm:$0xff]  }
 0x1e6   : > { %2670 = vmatprep.subr.bf16.mxu0 %v4225_v31  ;;  %3651 = vmatprep.subr.bf16.mxu1 %v5004_v63  ;;  %v5114_v31 = vld [vmem:[#allocation8 + $0x1f0] ss:$8 sps:$4 sm:$0xff]  }
 0x1e7   : > { %1879 = vmatmul.mubr.bf16.gmra.mrb[36].mxu0 %v4921_v40  ;;  %2105 = vmatmul.mubr.bf16.gmra.mrb[36].mxu1 %v4921_v40  ;;  %v5025_v40 = vld [vmem:[#allocation8 + $0x140] ss:$8 sps:$4 sm:$0xff]  }
 0x1e8   : > { %1888 = vmatprep.mubr.bf16.mxu0 %v4935_v25  ;;  %2114 = vmatprep.mubr.bf16.mxu1 %v4935_v25  ;;  %v4234_v25 = vld [vmem:[#allocation8 + $0x54] ss:$8 sps:$4 sm:$0xff]  }
 0x1e9   : > { %2671 = vmatpush1.bf16.msra.mxu0 %v4223_v0  ;;  %3667 = vmatpush1.bf16.msra.mxu1 %v5009_v48 }
 0x1ea   : > { %2672 = vmatprep.subr.bf16.mxu0 %v4228_v32  ;;  %3652 = vmatprep.subr.bf16.mxu1 %v5012_v33 }
 0x1ed   : > { %2673 = vmatpush1.bf16.msra.mxu0 %v4226_v35  ;;  %3668 = vmatpush1.bf16.msra.mxu1 %v5019_v37 }
 0x1ee   : > { %2674 = vmatprep.subr.bf16.mxu0 %v4231_v49  ;;  %3653 = vmatprep.subr.bf16.mxu1 %v5022_v38 }
 0x1ef   : > { %1889 = vmatmul.mubr.bf16.gmra.mrb[40].mxu0 %v4933_v23  ;;  %2115 = vmatmul.mubr.bf16.gmra.mrb[40].mxu1 %v4933_v23  ;;  %v4240_v23 = vld [vmem:[#allocation8 + $0x74] ss:$8 sps:$4 sm:$0xff]  }
 0x1f0   : > { %1898 = vmatprep.mubr.bf16.mxu0 %v4947_v7  ;;  %2124 = vmatprep.mubr.bf16.mxu1 %v4947_v7  ;;  %v4238_v7 = vld [vmem:[#allocation8 + $0x70] ss:$8 sps:$4 sm:$0xff]  }
 0x1f1   : > { %2675 = vmatpush1.bf16.msra.mxu0 %v4229_v39  ;;  %3669 = vmatpush1.bf16.msra.mxu1 %v5025_v40 }
 0x1f2   : > { %2676 = vmatprep.subr.bf16.mxu0 %v4234_v25  ;;  %3654 = vmatprep.subr.bf16.mxu1 %v5028_v41 }
 0x1f5   : > { %2677 = vmatpush1.bf16.msra.mxu0 %v4232_v42  ;;  %3670 = vmatpush1.bf16.msra.mxu1 %v5035_v43 }
 0x1f6   : > { %2678 = vmatprep.subr.bf16.mxu0 %v4237_v46  ;;  %3655 = vmatprep.subr.bf16.mxu1 %v5057_v61 }
 0x1f7   : > { %1899 = vmatmul.mubr.bf16.gmra.mrb[44].mxu0 %v4945_v5  ;;  %2125 = vmatmul.mubr.bf16.gmra.mrb[44].mxu1 %v4945_v5  ;;  %v4247_v5 = vld [vmem:[#allocation8 + $0x90] ss:$8 sps:$4 sm:$0xff]  }
 0x1f8   : > { %1908 = vmatprep.mubr.bf16.mxu0 %v4959_v54  ;;  %2134 = vmatprep.mubr.bf16.mxu1 %v4959_v54  ;;  %v4255_v54 = vld [vmem:[#allocation8 + $0xa4] ss:$8 sps:$4 sm:$0xff]  }
 0x1f9   : > { %2679 = vmatpush1.bf16.msra.mxu0 %v4235_v50  ;;  %3671 = vmatpush1.bf16.msra.mxu1 %v5059_v1 }
 0x1fa   : > { %2680 = vmatprep.subr.bf16.mxu0 %v4240_v23 }
 0x1fd   : > { %2681 = vmatpush1.bf16.msra.mxu0 %v4238_v7 }
 0x1fe   : > { %2682 = vmatprep.subr.bf16.mxu0 %v4243_v51 }
 0x1ff   : > { %1909 = vmatmul.mubr.bf16.gmra.mrb[48].mxu0 %v4957_v52  ;;  %2135 = vmatmul.mubr.bf16.gmra.mrb[48].mxu1 %v4957_v52  ;;  %v4259_v52 = vld [vmem:[#allocation8 + $0xb0] ss:$8 sps:$4 sm:$0xff]  }
 0x200   : > { %1918 = vmatprep.mubr.bf16.mxu0 %v4971_v36  ;;  %2144 = vmatprep.mubr.bf16.mxu1 %v4971_v36  ;;  %v4267_v36 = vld [vmem:[#allocation8 + $0xc4] ss:$8 sps:$4 sm:$0xff]  }
 0x201   : > { %2683 = vmatpush1.bf16.msra.mxu0 %v4241_v53 }
 0x202   : > { %2684 = vmatprep.subr.bf16.mxu0 %v4249_v55 }
 0x205   : > { %2685 = vmatpush1.bf16.msra.mxu0 %v4247_v5 }
 0x206   : > { %2686 = vmatprep.subr.bf16.mxu0 %v4255_v54 }
 0x207   : > { %1919 = vmatmul.mubr.bf16.gmra.mrb[52].mxu0 %v4969_v34  ;;  %2145 = vmatmul.mubr.bf16.gmra.mrb[52].mxu1 %v4969_v34  ;;  %v4271_v34 = vld [vmem:[#allocation8 + $0xd0] ss:$8 sps:$4 sm:$0xff]  }
 0x208   : > { %1928 = vmatprep.mubr.bf16.mxu0 %v4983_v8  ;;  %2154 = vmatprep.mubr.bf16.mxu1 %v4983_v8  ;;  %v5063_v8 = vld [vmem:[#allocation8 + $0x174] ss:$8 sps:$4 sm:$0xff]  }
 0x209   : > { %2687 = vmatpush1.bf16.msra.mxu0 %v4253_v56  ;;  %3656 = vmatprep.subr.bf16.mxu1 %v5063_v8 }
 0x20a   : > { %2688 = vmatprep.subr.bf16.mxu0 %v4261_v57  ;;  %3672 = vmatpush1.bf16.msra.mxu1 %v5065_v11 }
 0x20b   : > { %3657 = vmatprep.subr.bf16.mxu1 %v5070_v12 }
 0x20d   : > { %2689 = vmatpush1.bf16.msra.mxu0 %v4259_v52 }
 0x20e   : > { %2690 = vmatprep.subr.bf16.mxu0 %v4267_v36  ;;  %3673 = vmatpush1.bf16.msra.mxu1 %v5072_v13 }
 0x20f   : > { %1929 = vmatmul.mubr.bf16.gmra.mrb[56].mxu0 %v4981_v6  ;;  %2155 = vmatmul.mubr.bf16.gmra.mrb[56].mxu1 %v4981_v6  ;;  %v4285_v6 = vld [vmem:[#allocation8 + $0xf4] ss:$8 sps:$4 sm:$0xff]  }
 0x210   : > { %1938 = vmatprep.mubr.bf16.mxu0 %v5006_v22  ;;  %2164 = vmatprep.mubr.bf16.mxu1 %v5006_v22  ;;  %v332_v22 = vld [vmem:[%s5415_s5 + $0x4] sm:$0xf] }
 0x211   : > { %2691 = vmatpush1.bf16.msra.mxu0 %v4265_v58  ;;  %3658 = vmatprep.subr.bf16.mxu1 %v5076_v14  ;;  %v5122_v0 = vrot.slane %v332_v22, %v4869_v45  ;;  %v5126_v32 = vrot.slane %v332_v22, %v394_v4  ;;  %v5129_v35 = vrot.slane %v332_v22, %v4875_v47 }
 0x212   : > { %2692 = vmatprep.subr.bf16.mxu0 %v4273_v59  ;;  %3674 = vmatpush1.bf16.msra.mxu1 %v5078_v15  ;;  %v5133_v49 = vrot.slane %v332_v22, %v398_v9 }
 0x213   : > { %3659 = vmatprep.subr.bf16.mxu1 %v5082_v2 }
 0x215   : > { %2693 = vmatpush1.bf16.msra.mxu0 %v4271_v34 }
 0x216   : > { %2694 = vmatprep.subr.bf16.mxu0 %v4279_v60  ;;  %3675 = vmatpush1.bf16.msra.mxu1 %v5084_v18 }
 0x217   : > { %1939 = vmatmul.mubr.bf16.gmra.mrb[60].mxu0 %v5001_v30  ;;  %2165 = vmatmul.mubr.bf16.gmra.mrb[60].mxu1 %v5001_v30  ;;  %v5112_v30 = vld [vmem:[#allocation8 + $0x1f4] ss:$8 sps:$4 sm:$0xff]  }
 0x219   : > { %2695 = vmatpush1.bf16.msra.mxu0 %v4277_v62 }
 0x21a   : > { %2696 = vmatprep.subr.bf16.mxu0 %v4285_v6 }
 0x21d   : > { %2697 = vmatpush1.bf16.msra.mxu0 %v4283_v10 }
 0x21e   : > { %2779 = vmatprep.subr.bf16.mxu0 %v4978_v3  ;;  %v5088_v3 = vld [vmem:[#allocation8 + $0x1b4] ss:$8 sps:$4 sm:$0xff]  }
 0x21f   : > { %3660 = vmatprep.subr.bf16.mxu1 %v5088_v3 }
 0x220   : > { %3676 = vmatpush1.bf16.msra.mxu1 %v5090_v19 }
 0x221   : > { %3661 = vmatprep.subr.bf16.mxu1 %v5094_v20 }
 0x224   : > { %3677 = vmatpush1.bf16.msra.mxu1 %v5096_v24 }
 0x225   : > { %3662 = vmatprep.subr.bf16.mxu1 %v5100_v26 }
 0x228   : > { %3678 = vmatpush1.bf16.msra.mxu1 %v5102_v27 }
 0x229   : > { %3663 = vmatprep.subr.bf16.mxu1 %v5106_v28 }
 0x22c   : > { %3679 = vmatpush1.bf16.msra.mxu1 %v5108_v29 }
 0x22d   : > { %3664 = vmatprep.subr.bf16.mxu1 %v5112_v30 }
 0x230   : > { %3680 = vmatpush1.bf16.msra.mxu1 %v5114_v31 }
 0x2b2   : > { %v1870_v39 = vpop.f32.mrb[32].mxu0  ;;  %v2096_v25 = vpop.f32.mrb[32].mxu1 }
 0x2b3   : > { %v3681_v42 = vadd.f32 %v1870_v39, %v5122_v0  ;;  %v3713_v46 = vadd.f32 %v2096_v25, %v5126_v32  ;;  %v1872_v50 = vpop.f32.mrb[33].mxu0  ;;  %v2098_v23 = vpop.f32.mrb[33].mxu1 }
 0x2b4   : > { %v3682_v7 = vadd.f32 %v1872_v50, %v5129_v35  ;;  %v3714_v4 = vadd.f32 %v2098_v23, %v5133_v49  ;;  %v1874_v51 = vpop.f32.mrb[34].mxu0  ;;  %v2100_v53 = vpop.f32.mrb[34].mxu1 }
 0x2b5   : > { %v3683_v55 = vadd.f32 %v1874_v51, %v5122_v0  ;;  %v3715_v44 = vadd.f32 %v2100_v53, %v5126_v32  ;;  %v1876_v9 = vpop.f32.mrb[35].mxu0  ;;  %v2102_v5 = vpop.f32.mrb[35].mxu1  ;;  %v2175_v57 = vmax.f32 %v3681_v42, 0.0  ;;  %v2177_v52 = vmax.f32 %v3713_v46, 0.0 }
 0x2b6   : > { %v3684_v54 = vadd.f32 %v1876_v9, %v5129_v35  ;;  %v3716_v56 = vadd.f32 %v2102_v5, %v5133_v49  ;;  %v2176_v59 = vmax.f32 %v3682_v7, 0.0  ;;  %v2178_v34 = vmax.f32 %v3714_v4, 0.0 }
 0x2b7   : > { %v2179_v36 = vmax.f32 %v3683_v55, 0.0  ;;  %v2181_v58 = vmax.f32 %v3715_v44, 0.0 }
 0x2b8   : > { %v2180_v60 = vmax.f32 %v3684_v54, 0.0  ;;  %v2182_v62 = vmax.f32 %v3716_v56, 0.0 }
 0x2b9   : > { %v2239_v6 = vpack.c.bf16 %v2179_v36, %v2175_v57  ;;  %v5143_v10 = vpack.c.bf16 %v2181_v58, %v2177_v52 }
 0x2ba   : > { %v2240_v22 = vpack.c.bf16 %v2180_v60, %v2176_v59  ;;  %v5145_v39 = vpack.c.bf16 %v2182_v62, %v2178_v34  ;;  %v1880_v25 = vpop.f32.mrb[36].mxu0  ;;  %v2106_v50 = vpop.f32.mrb[36].mxu1 }
 0x2bb   : > { %v3685_v23 = vadd.f32 %v1880_v25, %v5122_v0  ;;  %v3717_v51 = vadd.f32 %v2106_v50, %v5126_v32  ;;  %v1882_v42 = vpop.f32.mrb[37].mxu0  ;;  %v2108_v46 = vpop.f32.mrb[37].mxu1 }
 0x2bc   : > { %v3686_v53 = vadd.f32 %v1882_v42, %v5129_v35  ;;  %v3718_v7 = vadd.f32 %v2108_v46, %v5133_v49  ;;  %v1884_v4 = vpop.f32.mrb[38].mxu0  ;;  %v2110_v55 = vpop.f32.mrb[38].mxu1  ;;  %2698 = vmatprep.mubr.bf16.mxu0 %v2240_v22 }
 0x2bd   : > { %v3687_v44 = vadd.f32 %v1884_v4, %v5122_v0  ;;  %v3719_v9 = vadd.f32 %v2110_v55, %v5126_v32  ;;  %v1886_v5 = vpop.f32.mrb[39].mxu0  ;;  %v2112_v54 = vpop.f32.mrb[39].mxu1  ;;  %2699 = vmatmul.mubr.bf16.vlgmr.msra.gmra.mrb[64].mxu0 %v2239_v6  ;;  %v2183_v52 = vmax.f32 %v3685_v23, 0.0  ;;  %v2185_v36 = vmax.f32 %v3717_v51, 0.0 }
 0x2be   : > { %v3688_v56 = vadd.f32 %v1886_v5, %v5129_v35  ;;  %v3720_v57 = vadd.f32 %v2112_v54, %v5133_v49  ;;  %2780 = vmatpush1.bf16.msra.mxu0 %v4987_v16  ;;  %v2184_v34 = vmax.f32 %v3686_v53, 0.0  ;;  %v2186_v60 = vmax.f32 %v3718_v7, 0.0 }
 0x2bf   : > { %v2187_v58 = vmax.f32 %v3687_v44, 0.0  ;;  %v2189_v59 = vmax.f32 %v3719_v9, 0.0  ;;  %2781 = vmatprep.subr.bf16.mxu0 %v4991_v21 }
 0x2c0   : > { %v2188_v62 = vmax.f32 %v3688_v56, 0.0  ;;  %v2190_v22 = vmax.f32 %v3720_v57, 0.0 }
 0x2c1   : > { %v2243_v25 = vpack.c.bf16 %v2187_v58, %v2183_v52  ;;  %v5157_v50 = vpack.c.bf16 %v2189_v59, %v2185_v36 }
 0x2c2   : > { %v2244_v6 = vpack.c.bf16 %v2188_v62, %v2184_v34  ;;  %v5159_v42 = vpack.c.bf16 %v2190_v22, %v2186_v60  ;;  %2782 = vmatpush1.bf16.msra.mxu0 %v4999_v17  ;;  %v1890_v46 = vpop.f32.mrb[40].mxu0  ;;  %v2116_v16 = vpop.f32.mrb[40].mxu1 }
 0x2c3   : > { %v3689_v23 = vadd.f32 %v1890_v46, %v5122_v0  ;;  %v3721_v51 = vadd.f32 %v2116_v16, %v5126_v32  ;;  %v1892_v4 = vpop.f32.mrb[41].mxu0  ;;  %v2118_v21 = vpop.f32.mrb[41].mxu1  ;;  %2783 = vmatprep.subr.bf16.mxu0 %v5004_v63 }
 0x2c4   : > { %v3690_v53 = vadd.f32 %v1892_v4, %v5129_v35  ;;  %v3722_v7 = vadd.f32 %v2118_v21, %v5133_v49  ;;  %v1894_v55 = vpop.f32.mrb[42].mxu0  ;;  %v2120_v44 = vpop.f32.mrb[42].mxu1  ;;  %2708 = vmatprep.mubr.bf16.mxu0 %v2244_v6 }
 0x2c5   : > { %v3691_v9 = vadd.f32 %v1894_v55, %v5122_v0  ;;  %v3723_v17 = vadd.f32 %v2120_v44, %v5126_v32  ;;  %v1896_v5 = vpop.f32.mrb[43].mxu0  ;;  %v2122_v54 = vpop.f32.mrb[43].mxu1  ;;  %2709 = vmatmul.mubr.bf16.gmra.mrb[68].mxu0 %v2243_v25  ;;  %v2191_v63 = vmax.f32 %v3689_v23, 0.0  ;;  %v2193_v52 = vmax.f32 %v3721_v51, 0.0 }
 0x2c6   : > { %v3692_v56 = vadd.f32 %v1896_v5, %v5129_v35  ;;  %v3724_v57 = vadd.f32 %v2122_v54, %v5133_v49  ;;  %2784 = vmatpush1.bf16.msra.mxu0 %v5009_v48  ;;  %v2192_v59 = vmax.f32 %v3690_v53, 0.0  ;;  %v2194_v34 = vmax.f32 %v3722_v7, 0.0 }
 0x2c7   : > { %v2195_v36 = vmax.f32 %v3691_v9, 0.0  ;;  %v2197_v58 = vmax.f32 %v3723_v17, 0.0  ;;  %2785 = vmatprep.subr.bf16.mxu0 %v5012_v33 }
 0x2c8   : > { %v2196_v60 = vmax.f32 %v3692_v56, 0.0  ;;  %v2198_v62 = vmax.f32 %v3724_v57, 0.0 }
 0x2c9   : > { %v2247_v22 = vpack.c.bf16 %v2195_v36, %v2191_v63  ;;  %v5173_v6 = vpack.c.bf16 %v2197_v58, %v2193_v52 }
 0x2ca   : > { %v2248_v25 = vpack.c.bf16 %v2196_v60, %v2192_v59  ;;  %v5175_v46 = vpack.c.bf16 %v2198_v62, %v2194_v34  ;;  %2786 = vmatpush1.bf16.msra.mxu0 %v5019_v37  ;;  %v1900_v16 = vpop.f32.mrb[44].mxu0  ;;  %v2126_v48 = vpop.f32.mrb[44].mxu1 }
 0x2cb   : > { %v3693_v23 = vadd.f32 %v1900_v16, %v5122_v0  ;;  %v3725_v51 = vadd.f32 %v2126_v48, %v5126_v32  ;;  %v1902_v4 = vpop.f32.mrb[45].mxu0  ;;  %v2128_v33 = vpop.f32.mrb[45].mxu1  ;;  %2787 = vmatprep.subr.bf16.mxu0 %v5022_v38 }
 0x2cc   : > { %v3694_v21 = vadd.f32 %v1902_v4, %v5129_v35  ;;  %v3726_v53 = vadd.f32 %v2128_v33, %v5133_v49  ;;  %v1904_v7 = vpop.f32.mrb[46].mxu0  ;;  %v2130_v55 = vpop.f32.mrb[46].mxu1  ;;  %2718 = vmatprep.mubr.bf16.mxu0 %v2248_v25 }
 0x2cd   : > { %v3695_v44 = vadd.f32 %v1904_v7, %v5122_v0  ;;  %v3727_v37 = vadd.f32 %v2130_v55, %v5126_v32  ;;  %v1906_v9 = vpop.f32.mrb[47].mxu0  ;;  %v2132_v17 = vpop.f32.mrb[47].mxu1  ;;  %2719 = vmatmul.mubr.bf16.gmra.mrb[72].mxu0 %v2247_v22  ;;  %v2199_v38 = vmax.f32 %v3693_v23, 0.0  ;;  %v2201_v56 = vmax.f32 %v3725_v51, 0.0 }
 0x2ce   : > { %v3696_v5 = vadd.f32 %v1906_v9, %v5129_v35  ;;  %v3728_v54 = vadd.f32 %v2132_v17, %v5133_v49  ;;  %2788 = vmatpush1.bf16.msra.mxu0 %v5025_v40  ;;  %v2200_v52 = vmax.f32 %v3694_v21, 0.0  ;;  %v2202_v36 = vmax.f32 %v3726_v53, 0.0 }
 0x2cf   : > { %v2203_v57 = vmax.f32 %v3695_v44, 0.0  ;;  %v2205_v63 = vmax.f32 %v3727_v37, 0.0  ;;  %2789 = vmatprep.subr.bf16.mxu0 %v5028_v41 }
 0x2d0   : > { %v2204_v58 = vmax.f32 %v3696_v5, 0.0  ;;  %v2206_v59 = vmax.f32 %v3728_v54, 0.0 }
 0x2d1   : > { %v2251_v34 = vpack.c.bf16 %v2203_v57, %v2199_v38  ;;  %v5189_v60 = vpack.c.bf16 %v2205_v63, %v2201_v56 }
 0x2d2   : > { %v2252_v62 = vpack.c.bf16 %v2204_v58, %v2200_v52  ;;  %v5191_v22 = vpack.c.bf16 %v2206_v59, %v2202_v36  ;;  %2790 = vmatpush1.bf16.msra.mxu0 %v5035_v43  ;;  %v1910_v25 = vpop.f32.mrb[48].mxu0  ;;  %v2136_v40 = vpop.f32.mrb[48].mxu1 }
 0x2d3   : > { %v3697_v16 = vadd.f32 %v1910_v25, %v5122_v0  ;;  %v3729_v48 = vadd.f32 %v2136_v40, %v5126_v32  ;;  %v1912_v23 = vpop.f32.mrb[49].mxu0  ;;  %v2138_v41 = vpop.f32.mrb[49].mxu1  ;;  %2791 = vmatprep.subr.bf16.mxu0 %v5057_v61 }
 0x2d4   : > { %v3698_v51 = vadd.f32 %v1912_v23, %v5129_v35  ;;  %v3730_v4 = vadd.f32 %v2138_v41, %v5133_v49  ;;  %v1914_v33 = vpop.f32.mrb[50].mxu0  ;;  %v2140_v21 = vpop.f32.mrb[50].mxu1  ;;  %2728 = vmatprep.mubr.bf16.mxu0 %v2252_v62 }
 0x2d5   : > { %v3699_v53 = vadd.f32 %v1914_v33, %v5122_v0  ;;  %v3731_v43 = vadd.f32 %v2140_v21, %v5126_v32  ;;  %v1916_v7 = vpop.f32.mrb[51].mxu0  ;;  %v2142_v55 = vpop.f32.mrb[51].mxu1  ;;  %2729 = vmatmul.mubr.bf16.gmra.mrb[76].mxu0 %v2251_v34  ;;  %v2207_v61 = vmax.f32 %v3697_v16, 0.0  ;;  %v2209_v9 = vmax.f32 %v3729_v48, 0.0 }
 0x2d6   : > { %v3700_v44 = vadd.f32 %v1916_v7, %v5129_v35  ;;  %v3732_v37 = vadd.f32 %v2142_v55, %v5133_v49  ;;  %2792 = vmatpush1.bf16.msra.mxu0 %v5059_v1  ;;  %v2208_v54 = vmax.f32 %v3698_v51, 0.0  ;;  %v2210_v38 = vmax.f32 %v3730_v4, 0.0 }
 0x2d7   : > { %v2211_v17 = vmax.f32 %v3699_v53, 0.0  ;;  %v2213_v5 = vmax.f32 %v3731_v43, 0.0  ;;  %2793 = vmatprep.subr.bf16.mxu0 %v5063_v8 }
 0x2d8   : > { %v2212_v56 = vmax.f32 %v3700_v44, 0.0  ;;  %v2214_v57 = vmax.f32 %v3732_v37, 0.0 }
 0x2d9   : > { %v2255_v63 = vpack.c.bf16 %v2211_v17, %v2207_v61  ;;  %v2257_v52 = vpack.c.bf16 %v2213_v5, %v2209_v9 }
 0x2da   : > { %v2256_v36 = vpack.c.bf16 %v2212_v56, %v2208_v54  ;;  %v2258_v58 = vpack.c.bf16 %v2214_v57, %v2210_v38  ;;  %2794 = vmatpush1.bf16.msra.mxu0 %v5065_v11  ;;  %v1920_v59 = vpop.f32.mrb[52].mxu0  ;;  %v2146_v34 = vpop.f32.mrb[52].mxu1 }
 0x2db   : > { %v3701_v1 = vadd.f32 %v1920_v59, %v5122_v0  ;;  %v3733_v62 = vadd.f32 %v2146_v34, %v5126_v32  ;;  %v1922_v25 = vpop.f32.mrb[53].mxu0  ;;  %v2148_v40 = vpop.f32.mrb[53].mxu1  ;;  %2795 = vmatprep.subr.bf16.mxu0 %v5070_v12 }
 0x2dc   : > { %v3702_v8 = vadd.f32 %v1922_v25, %v5129_v35  ;;  %v3734_v16 = vadd.f32 %v2148_v40, %v5133_v49  ;;  %v1924_v48 = vpop.f32.mrb[54].mxu0  ;;  %v2150_v23 = vpop.f32.mrb[54].mxu1  ;;  %2738 = vmatprep.mubr.bf16.mxu0 %v2256_v36  ;;  %2851 = vmatprep.mubr.bf16.mxu1 %v2258_v58 }
 0x2dd   : > { %v3703_v11 = vadd.f32 %v1924_v48, %v5122_v0  ;;  %v3735_v41 = vadd.f32 %v2150_v23, %v5126_v32  ;;  %v1926_v51 = vpop.f32.mrb[55].mxu0  ;;  %v2152_v4 = vpop.f32.mrb[55].mxu1  ;;  %2739 = vmatmul.mubr.bf16.gmra.mrb[80].mxu0 %v2255_v63  ;;  %2852 = vmatmul.mubr.bf16.vlgmr.msra.gmra.mrb[64].mxu1 %v2257_v52  ;;  %v2215_v21 = vmax.f32 %v3701_v1, 0.0  ;;  %v2217_v53 = vmax.f32 %v3733_v62, 0.0 }
 0x2de   : > { %v3704_v33 = vadd.f32 %v1926_v51, %v5129_v35  ;;  %v3736_v12 = vadd.f32 %v2152_v4, %v5133_v49  ;;  %2796 = vmatpush1.bf16.msra.mxu0 %v5072_v13  ;;  %v2216_v55 = vmax.f32 %v3702_v8, 0.0  ;;  %v2218_v44 = vmax.f32 %v3734_v16, 0.0 }
 0x2df   : > { %v2219_v43 = vmax.f32 %v3703_v11, 0.0  ;;  %v2221_v7 = vmax.f32 %v3735_v41, 0.0  ;;  %2797 = vmatprep.subr.bf16.mxu0 %v5076_v14 }
 0x2e0   : > { %v2220_v37 = vmax.f32 %v3704_v33, 0.0  ;;  %v2222_v61 = vmax.f32 %v3736_v12, 0.0 }
 0x2e1   : > { %v2259_v9 = vpack.c.bf16 %v2219_v43, %v2215_v21  ;;  %v2261_v17 = vpack.c.bf16 %v2221_v7, %v2217_v53 }
 0x2e2   : > { %v2260_v5 = vpack.c.bf16 %v2220_v37, %v2216_v55  ;;  %v2262_v54 = vpack.c.bf16 %v2222_v61, %v2218_v44  ;;  %2798 = vmatpush1.bf16.msra.mxu0 %v5078_v15  ;;  %v1930_v38 = vpop.f32.mrb[56].mxu0  ;;  %v2156_v56 = vpop.f32.mrb[56].mxu1 }
 0x2e3   : > { %v3705_v13 = vadd.f32 %v1930_v38, %v5122_v0  ;;  %v3737_v57 = vadd.f32 %v2156_v56, %v5126_v32  ;;  %v1932_v63 = vpop.f32.mrb[57].mxu0  ;;  %v2158_v52 = vpop.f32.mrb[57].mxu1  ;;  %2799 = vmatprep.subr.bf16.mxu0 %v5082_v2 }
 0x2e4   : > { %v3706_v14 = vadd.f32 %v1932_v63, %v5129_v35  ;;  %v3738_v36 = vadd.f32 %v2158_v52, %v5133_v49  ;;  %v1934_v58 = vpop.f32.mrb[58].mxu0  ;;  %v2160_v59 = vpop.f32.mrb[58].mxu1  ;;  %2748 = vmatprep.mubr.bf16.mxu0 %v2260_v5  ;;  %2861 = vmatprep.mubr.bf16.mxu1 %v2262_v54 }
 0x2e5   : > { %v3707_v15 = vadd.f32 %v1934_v58, %v5122_v0  ;;  %v3739_v34 = vadd.f32 %v2160_v59, %v5126_v32  ;;  %v1936_v1 = vpop.f32.mrb[59].mxu0  ;;  %v2162_v62 = vpop.f32.mrb[59].mxu1  ;;  %2749 = vmatmul.mubr.bf16.gmra.mrb[84].mxu0 %v2259_v9  ;;  %2862 = vmatmul.mubr.bf16.gmra.mrb[68].mxu1 %v2261_v17  ;;  %v2223_v40 = vmax.f32 %v3705_v13, 0.0  ;;  %v2225_v8 = vmax.f32 %v3737_v57, 0.0 }
 0x2e6   : > { %v3708_v25 = vadd.f32 %v1936_v1, %v5129_v35  ;;  %v3740_v2 = vadd.f32 %v2162_v62, %v5133_v49  ;;  %2800 = vmatpush1.bf16.msra.mxu0 %v5084_v18  ;;  %v2224_v23 = vmax.f32 %v3706_v14, 0.0  ;;  %v2226_v11 = vmax.f32 %v3738_v36, 0.0 }
 0x2e7   : > { %v2227_v16 = vmax.f32 %v3707_v15, 0.0  ;;  %v2229_v48 = vmax.f32 %v3739_v34, 0.0  ;;  %2801 = vmatprep.subr.bf16.mxu0 %v5088_v3 }
 0x2e8   : > { %v2228_v41 = vmax.f32 %v3708_v25, 0.0  ;;  %v2230_v51 = vmax.f32 %v3740_v2, 0.0 }
 0x2e9   : > { %v2263_v4 = vpack.c.bf16 %v2227_v16, %v2223_v40  ;;  %v2265_v33 = vpack.c.bf16 %v2229_v48, %v2225_v8 }
 0x2ea   : > { %v2264_v12 = vpack.c.bf16 %v2228_v41, %v2224_v23  ;;  %v2266_v21 = vpack.c.bf16 %v2230_v51, %v2226_v11  ;;  %2802 = vmatpush1.bf16.msra.mxu0 %v5090_v19  ;;  %v1940_v53 = vpop.f32.mrb[60].mxu0  ;;  %v2166_v43 = vpop.f32.mrb[60].mxu1 }
 0x2eb   : > { %v3709_v18 = vadd.f32 %v1940_v53, %v5122_v0  ;;  %v3741_v7 = vadd.f32 %v2166_v43, %v5126_v32  ;;  %v1942_v55 = vpop.f32.mrb[61].mxu0  ;;  %v2168_v44 = vpop.f32.mrb[61].mxu1  ;;  %2803 = vmatprep.subr.bf16.mxu0 %v5094_v20 }
 0x2ec   : > { %v3710_v3 = vadd.f32 %v1942_v55, %v5129_v35  ;;  %v3742_v37 = vadd.f32 %v2168_v44, %v5133_v49  ;;  %v1944_v61 = vpop.f32.mrb[62].mxu0  ;;  %v2170_v9 = vpop.f32.mrb[62].mxu1  ;;  %2758 = vmatprep.mubr.bf16.mxu0 %v2264_v12  ;;  %2871 = vmatprep.mubr.bf16.mxu1 %v2266_v21 }
 0x2ed   : > { %v3711_v19 = vadd.f32 %v1944_v61, %v5122_v0  ;;  %v3743_v17 = vadd.f32 %v2170_v9, %v5126_v32  ;;  %v1946_v5 = vpop.f32.mrb[63].mxu0  ;;  %v2172_v54 = vpop.f32.mrb[63].mxu1  ;;  %2759 = vmatmul.mubr.bf16.gmra.mrb[88].mxu0 %v2263_v4  ;;  %2872 = vmatmul.mubr.bf16.gmra.mrb[72].mxu1 %v2265_v33  ;;  %v2231_v56 = vmax.f32 %v3709_v18, 0.0  ;;  %v2233_v13 = vmax.f32 %v3741_v7, 0.0 }
 0x2ee   : > { %v3712_v38 = vadd.f32 %v1946_v5, %v5129_v35  ;;  %v3744_v20 = vadd.f32 %v2172_v54, %v5133_v49  ;;  %2804 = vmatpush1.bf16.msra.mxu0 %v5096_v24  ;;  %v2232_v52 = vmax.f32 %v3710_v3, 0.0  ;;  %v2234_v0 = vmax.f32 %v3742_v37, 0.0  ;;  %v4313_v24 = vld [vmem:[#allocation10 + $0x40] sm:$0xff]   ;;  %v4320_v35 = vld [vmem:[#allocation10 + $0x18] sm:$0xff]  }
 0x2ef   : > { %v2235_v57 = vmax.f32 %v3711_v19, 0.0  ;;  %v2237_v63 = vmax.f32 %v3743_v17, 0.0  ;;  %2805 = vmatprep.subr.bf16.mxu0 %v5100_v26  ;;  %v4314_v26 = vld [vmem:[#allocation10] sm:$0xff]   ;;  %3585 = vmatprep.subr.bf16.mxu1 %v4313_v24 }
 0x2f0   : > { %v2236_v14 = vmax.f32 %v3712_v38, 0.0  ;;  %v2238_v32 = vmax.f32 %v3744_v20, 0.0  ;;  %3586 = vmatpush3.bf16.msra.mxu1 %v4314_v26  ;;  %v4321_v49 = vld [vmem:[#allocation10 + $0x60] sm:$0xff]  }
 0x2f1   : > { %v2267_v36 = vpack.c.bf16 %v2235_v57, %v2231_v56  ;;  %v2269_v58 = vpack.c.bf16 %v2237_v63, %v2233_v13 }
 0x2f2   : > { %v2268_v59 = vpack.c.bf16 %v2236_v14, %v2232_v52  ;;  %v2270_v15 = vpack.c.bf16 %v2238_v32, %v2234_v0  ;;  %2806 = vmatpush1.bf16.msra.mxu0 %v5102_v27  ;;  %v4315_v27 = vld [vmem:[#allocation10 + $0x48] sm:$0xff]  }
 0x2f3   : > { %2807 = vmatprep.subr.bf16.mxu0 %v5106_v28  ;;  %v4316_v28 = vld [vmem:[#allocation10 + $0x8] sm:$0xff]   ;;  %3587 = vmatprep.subr.bf16.mxu1 %v4315_v27 }
 0x2f4   : > { %2768 = vmatprep.mubr.bf16.mxu0 %v2268_v59  ;;  %2881 = vmatprep.mubr.bf16.mxu1 %v2270_v15 }
 0x2f5   : > { %2769 = vmatmul.mubr.bf16.gmra.mrb[92].mxu0 %v2267_v36  ;;  %2882 = vmatmul.mubr.bf16.gmra.mrb[76].mxu1 %v2269_v58 }
 0x2f6   : > { %2808 = vmatpush1.bf16.msra.mxu0 %v5108_v29  ;;  %2811 = vmatprep.mubr.bf16.mxu0 %v5145_v39  ;;  %v4317_v29 = vld [vmem:[#allocation10 + $0x50] sm:$0xff]   ;;  %v4323_v39 = vld [vmem:[#allocation10 + $0x68] sm:$0xff]  }
 0x2f7   : > { %2809 = vmatprep.subr.bf16.mxu0 %v5112_v30  ;;  %3588 = vmatpush3.bf16.msra.mxu1 %v4316_v28  ;;  %v4318_v30 = vld [vmem:[#allocation10 + $0x10] sm:$0xff]  }
 0x2f8   : > { %3589 = vmatprep.subr.bf16.mxu1 %v4317_v29 }
 0x2fa   : > { %2810 = vmatpush1.bf16.msra.mxu0 %v5114_v31  ;;  %v4319_v31 = vld [vmem:[#allocation10 + $0x58] sm:$0xff]  }
 0x2fb   : > { %3590 = vmatpush3.bf16.msra.mxu1 %v4318_v30 }
 0x2fc   : > { %3591 = vmatprep.subr.bf16.mxu1 %v4319_v31 }
 0x2fd   : > { %2812 = vmatmul.mubr.bf16.vlgmr.msra.gmra.mrb[64].mxu0 %v5143_v10  ;;  %v4322_v10 = vld [vmem:[#allocation10 + $0x20] sm:$0xff]  }
 0x2fe   : > { %2821 = vmatprep.mubr.bf16.mxu0 %v5159_v42  ;;  %v4325_v42 = vld [vmem:[#allocation10 + $0x70] sm:$0xff]  }
 0x2ff   : > { %3592 = vmatpush3.bf16.msra.mxu1 %v4320_v35 }
 0x300   : > { %3593 = vmatprep.subr.bf16.mxu1 %v4321_v49 }
 0x303   : > { %3594 = vmatpush3.bf16.msra.mxu1 %v4322_v10 }
 0x304   : > { %3595 = vmatprep.subr.bf16.mxu1 %v4323_v39 }
 0x305   : > { %2822 = vmatmul.mubr.bf16.gmra.mrb[68].mxu0 %v5157_v50  ;;  %v4324_v50 = vld [vmem:[#allocation10 + $0x28] sm:$0xff]  }
 0x306   : > { %2831 = vmatprep.mubr.bf16.mxu0 %v5175_v46  ;;  %v4327_v46 = vld [vmem:[#allocation10 + $0x78] sm:$0xff]  }
 0x307   : > { %3596 = vmatpush3.bf16.msra.mxu1 %v4324_v50 }
 0x308   : > { %3597 = vmatprep.subr.bf16.mxu1 %v4325_v42 }
 0x30d   : > { %2832 = vmatmul.mubr.bf16.gmra.mrb[72].mxu0 %v5173_v6  ;;  %v4326_v6 = vld [vmem:[#allocation10 + $0x30] sm:$0xff]  }
 0x30e   : > { %2841 = vmatprep.mubr.bf16.mxu0 %v5191_v22  ;;  %3598 = vmatpush3.bf16.msra.mxu1 %v4326_v6  ;;  %v333_v22 = vld [vmem:[%s5415_s5 + $0x8] sm:$0x3] }
 0x30f   : > { %3599 = vmatprep.subr.bf16.mxu1 %v4327_v46  ;;  %v5258_v34 = vrot.slane %v333_v22, %v4869_v45  ;;  %v5261_v1 = vrot.slane %v333_v22, %v4875_v47 }
 0x315   : > { %2842 = vmatmul.mubr.bf16.gmra.mrb[76].mxu0 %v5189_v60  ;;  %v4328_v60 = vld [vmem:[#allocation10 + $0x38] sm:$0xff]  }
 0x316   : > { %3600 = vmatpush3.bf16.msra.mxu1 %v4328_v60 }
 0x3b0   : > { %v2740_v62 = vpop.f32.mrb[80].mxu0  ;;  %v2853_v25 = vpop.f32.mrb[64].mxu1 }
 0x3b1   : > { %v2741_v2 = vadd.f32 %v2740_v62, %v5258_v34  ;;  %v2742_v40 = vpop.f32.mrb[81].mxu0  ;;  %v2855_v8 = vpop.f32.mrb[65].mxu1 }
 0x3b2   : > { %v2743_v16 = vadd.f32 %v2742_v40, %v5261_v1  ;;  %v2744_v48 = vpop.f32.mrb[82].mxu0  ;;  %v2857_v23 = vpop.f32.mrb[66].mxu1 }
 0x3b3   : > { %v2854_v11 = vadd.f32 %v2853_v25, %v2741_v2  ;;  %v2745_v41 = vadd.f32 %v2744_v48, %v5258_v34  ;;  %v2746_v51 = vpop.f32.mrb[83].mxu0  ;;  %v2859_v4 = vpop.f32.mrb[67].mxu1 }
 0x3b4   : > { %v2856_v45 = vadd.f32 %v2855_v8, %v2743_v16  ;;  %v2747_v33 = vadd.f32 %v2746_v51, %v5261_v1 }
 0x3b5   : > { %v2858_v47 = vadd.f32 %v2857_v23, %v2745_v41  ;;  %v2908_v21 = vmax.f32 %v2854_v11, 0.0 }
 0x3b6   : > { %v2860_v12 = vadd.f32 %v2859_v4, %v2747_v33  ;;  %v2909_v43 = vmax.f32 %v2856_v45, 0.0 }
 0x3b7   : > { %v2910_v53 = vmax.f32 %v2858_v47, 0.0 }
 0x3b8   : > { %v2911_v18 = vmax.f32 %v2860_v12, 0.0  ;;  %v2750_v7 = vpop.f32.mrb[84].mxu0  ;;  %v2863_v55 = vpop.f32.mrb[68].mxu1 }
 0x3b9   : > { %v5267_v44 = vpack.c.bf16 %v2910_v53, %v2908_v21  ;;  %v2751_v3 = vadd.f32 %v2750_v7, %v5258_v34  ;;  %v2752_v37 = vpop.f32.mrb[85].mxu0  ;;  %v2865_v61 = vpop.f32.mrb[69].mxu1 }
 0x3ba   : > { %v5270_v9 = vpack.c.bf16 %v2911_v18, %v2909_v43  ;;  %v2753_v19 = vadd.f32 %v2752_v37, %v5261_v1  ;;  %v2754_v17 = vpop.f32.mrb[86].mxu0  ;;  %v2867_v5 = vpop.f32.mrb[70].mxu1 }
 0x3bb   : > { %v2864_v54 = vadd.f32 %v2863_v55, %v2751_v3  ;;  %v2755_v38 = vadd.f32 %v2754_v17, %v5258_v34  ;;  %v2756_v20 = vpop.f32.mrb[87].mxu0  ;;  %v2869_v56 = vpop.f32.mrb[71].mxu1 }
 0x3bc   : > { %v2866_v13 = vadd.f32 %v2865_v61, %v2753_v19  ;;  %v2757_v57 = vadd.f32 %v2756_v20, %v5261_v1 }
 0x3bd   : > { %v2868_v63 = vadd.f32 %v2867_v5, %v2755_v38  ;;  %v2912_v0 = vmax.f32 %v2864_v54, 0.0 }
 0x3be   : > { %v2870_v52 = vadd.f32 %v2869_v56, %v2757_v57  ;;  %v2913_v32 = vmax.f32 %v2866_v13, 0.0 }
 0x3bf   : > { %v2914_v14 = vmax.f32 %v2868_v63, 0.0 }
 0x3c0   : > { %v2915_v36 = vmax.f32 %v2870_v52, 0.0  ;;  %v2760_v58 = vpop.f32.mrb[88].mxu0  ;;  %v2873_v59 = vpop.f32.mrb[72].mxu1 }
 0x3c1   : > { %v5275_v15 = vpack.c.bf16 %v2914_v14, %v2912_v0  ;;  %v2761_v24 = vadd.f32 %v2760_v58, %v5258_v34  ;;  %v2762_v26 = vpop.f32.mrb[89].mxu0  ;;  %v2875_v27 = vpop.f32.mrb[73].mxu1 }
 0x3c2   : > { %v5278_v28 = vpack.c.bf16 %v2915_v36, %v2913_v32  ;;  %v2763_v29 = vadd.f32 %v2762_v26, %v5261_v1  ;;  %v2764_v30 = vpop.f32.mrb[90].mxu0  ;;  %v2877_v31 = vpop.f32.mrb[74].mxu1 }
 0x3c3   : > { %v2874_v35 = vadd.f32 %v2873_v59, %v2761_v24  ;;  %v2765_v49 = vadd.f32 %v2764_v30, %v5258_v34  ;;  %v2766_v10 = vpop.f32.mrb[91].mxu0  ;;  %v2879_v39 = vpop.f32.mrb[75].mxu1 }
 0x3c4   : > { %v2876_v50 = vadd.f32 %v2875_v27, %v2763_v29  ;;  %v2767_v42 = vadd.f32 %v2766_v10, %v5261_v1 }
 0x3c5   : > { %v2878_v6 = vadd.f32 %v2877_v31, %v2765_v49  ;;  %v2916_v60 = vmax.f32 %v2874_v35, 0.0 }
 0x3c6   : > { %v2880_v46 = vadd.f32 %v2879_v39, %v2767_v42  ;;  %v2917_v62 = vmax.f32 %v2876_v50, 0.0 }
 0x3c7   : > { %v2918_v22 = vmax.f32 %v2878_v6, 0.0 }
 0x3c8   : > { %v2919_v25 = vmax.f32 %v2880_v46, 0.0  ;;  %v2770_v2 = vpop.f32.mrb[92].mxu0  ;;  %v2883_v40 = vpop.f32.mrb[76].mxu1 }
 0x3c9   : > { %v5283_v8 = vpack.c.bf16 %v2918_v22, %v2916_v60  ;;  %v2771_v16 = vadd.f32 %v2770_v2, %v5258_v34  ;;  %v2772_v48 = vpop.f32.mrb[93].mxu0  ;;  %v2885_v23 = vpop.f32.mrb[77].mxu1 }
 0x3ca   : > { %v5286_v11 = vpack.c.bf16 %v2919_v25, %v2917_v62  ;;  %v2773_v41 = vadd.f32 %v2772_v48, %v5261_v1  ;;  %v2774_v51 = vpop.f32.mrb[94].mxu0  ;;  %v2887_v4 = vpop.f32.mrb[78].mxu1 }
 0x3cb   : > { %v2884_v45 = vadd.f32 %v2883_v40, %v2771_v16  ;;  %v2775_v33 = vadd.f32 %v2774_v51, %v5258_v34  ;;  %v2776_v47 = vpop.f32.mrb[95].mxu0  ;;  %v2889_v12 = vpop.f32.mrb[79].mxu1 }
 0x3cc   : > { %v2886_v21 = vadd.f32 %v2885_v23, %v2773_v41  ;;  %v2777_v53 = vadd.f32 %v2776_v47, %v5261_v1 }
 0x3cd   : > { %v2888_v43 = vadd.f32 %v2887_v4, %v2775_v33  ;;  %v2920_v7 = vmax.f32 %v2884_v45, 0.0 }
 0x3ce   : > { %v2890_v18 = vadd.f32 %v2889_v12, %v2777_v53  ;;  %v2921_v3 = vmax.f32 %v2886_v21, 0.0 }
 0x3cf   : > { %v2922_v55 = vmax.f32 %v2888_v43, 0.0 }
 0x3d0   : > { %v2923_v37 = vmax.f32 %v2890_v18, 0.0  ;;  %v2813_v61 = vpop.f32.mrb[64].mxu0 }
 0x3d1   : > { %v5291_v19 = vpack.c.bf16 %v2922_v55, %v2920_v7  ;;  %v3745_v17 = vadd.f32 %v2813_v61, %v5258_v34  ;;  %v2815_v5 = vpop.f32.mrb[65].mxu0 }
 0x3d2   : > { %v5294_v54 = vpack.c.bf16 %v2923_v37, %v2921_v3  ;;  %v3746_v38 = vadd.f32 %v2815_v5, %v5261_v1  ;;  %v2817_v20 = vpop.f32.mrb[66].mxu0 }
 0x3d3   : > { %v3747_v56 = vadd.f32 %v2817_v20, %v5258_v34  ;;  %v2819_v13 = vpop.f32.mrb[67].mxu0  ;;  %v2892_v63 = vmax.f32 %v3745_v17, 0.0 }
 0x3d4   : > { %v3748_v57 = vadd.f32 %v2819_v13, %v5261_v1  ;;  %v2893_v0 = vmax.f32 %v3746_v38, 0.0 }
 0x3d5   : > { %v2894_v52 = vmax.f32 %v3747_v56, 0.0 }
 0x3d6   : > { %v2895_v14 = vmax.f32 %v3748_v57, 0.0 }
 0x3d7   : > { %v2924_v32 = vpack.c.bf16 %v2894_v52, %v2892_v63 }
 0x3d8   : > { %v2925_v36 = vpack.c.bf16 %v2895_v14, %v2893_v0  ;;  %v2823_v58 = vpop.f32.mrb[68].mxu0 }
 0x3d9   : > { %v3749_v59 = vadd.f32 %v2823_v58, %v5258_v34  ;;  %v2825_v24 = vpop.f32.mrb[69].mxu0 }
 0x3da   : > { %v3750_v26 = vadd.f32 %v2825_v24, %v5261_v1  ;;  %v2827_v27 = vpop.f32.mrb[70].mxu0  ;;  %3106 = vmatprep.mubr.bf16.mxu1 %v2925_v36 }
 0x3db   : > { %v3751_v29 = vadd.f32 %v2827_v27, %v5258_v34  ;;  %v2829_v30 = vpop.f32.mrb[71].mxu0  ;;  %3107 = vmatmul.mubr.bf16.vlgmr.msra.gmra.mrb[80].mxu1 %v2924_v32  ;;  %v2896_v35 = vmax.f32 %v3749_v59, 0.0 }
 0x3dc   : > { %v3752_v31 = vadd.f32 %v2829_v30, %v5261_v1  ;;  %v2897_v10 = vmax.f32 %v3750_v26, 0.0 }
 0x3dd   : > { %v2898_v49 = vmax.f32 %v3751_v29, 0.0 }
 0x3de   : > { %v2899_v39 = vmax.f32 %v3752_v31, 0.0 }
 0x3df   : > { %v2926_v50 = vpack.c.bf16 %v2898_v49, %v2896_v35 }
 0x3e0   : > { %v2927_v42 = vpack.c.bf16 %v2899_v39, %v2897_v10  ;;  %v2833_v6 = vpop.f32.mrb[72].mxu0 }
 0x3e1   : > { %v3753_v46 = vadd.f32 %v2833_v6, %v5258_v34  ;;  %v2835_v60 = vpop.f32.mrb[73].mxu0 }
 0x3e2   : > { %v3754_v22 = vadd.f32 %v2835_v60, %v5261_v1  ;;  %v2837_v62 = vpop.f32.mrb[74].mxu0  ;;  %3114 = vmatprep.mubr.bf16.mxu1 %v2927_v42 }
 0x3e3   : > { %v3755_v25 = vadd.f32 %v2837_v62, %v5258_v34  ;;  %v2839_v2 = vpop.f32.mrb[75].mxu0  ;;  %3115 = vmatmul.mubr.bf16.gmra.mrb[84].mxu1 %v2926_v50  ;;  %v2900_v16 = vmax.f32 %v3753_v46, 0.0 }
 0x3e4   : > { %v3756_v40 = vadd.f32 %v2839_v2, %v5261_v1  ;;  %v2901_v23 = vmax.f32 %v3754_v22, 0.0 }
 0x3e5   : > { %v2902_v48 = vmax.f32 %v3755_v25, 0.0 }
 0x3e6   : > { %v2903_v41 = vmax.f32 %v3756_v40, 0.0 }
 0x3e7   : > { %v2928_v51 = vpack.c.bf16 %v2902_v48, %v2900_v16 }
 0x3e8   : > { %v2929_v4 = vpack.c.bf16 %v2903_v41, %v2901_v23  ;;  %v2843_v45 = vpop.f32.mrb[76].mxu0 }
 0x3e9   : > { %v3757_v33 = vadd.f32 %v2843_v45, %v5258_v34  ;;  %v2845_v47 = vpop.f32.mrb[77].mxu0 }
 0x3ea   : > { %v3758_v12 = vadd.f32 %v2845_v47, %v5261_v1  ;;  %v2847_v21 = vpop.f32.mrb[78].mxu0  ;;  %3122 = vmatprep.mubr.bf16.mxu1 %v2929_v4 }
 0x3eb   : > { %v3759_v53 = vadd.f32 %v2847_v21, %v5258_v34  ;;  %v2849_v43 = vpop.f32.mrb[79].mxu0  ;;  %3123 = vmatmul.mubr.bf16.gmra.mrb[88].mxu1 %v2928_v51  ;;  %v2904_v7 = vmax.f32 %v3757_v33, 0.0 }
 0x3ec   : > { %v3760_v18 = vadd.f32 %v2849_v43, %v5261_v1  ;;  %v2905_v3 = vmax.f32 %v3758_v12, 0.0  ;;  %v5323_v1 = vld [vmem:[%s5415_s5 + $0xa] ss:$0 sm:$0xff] }
 0x3ed   : > { %v2906_v55 = vmax.f32 %v3759_v53, 0.0 }
 0x3ee   : > { %v2907_v37 = vmax.f32 %v3760_v18, 0.0 }
 0x3ef   : > { %v2930_v61 = vpack.c.bf16 %v2906_v55, %v2904_v7 }
 0x3f0   : > { %v2931_v17 = vpack.c.bf16 %v2907_v37, %v2905_v3 }
 0x3f2   : > { %3130 = vmatprep.mubr.bf16.mxu1 %v2931_v17 }
 0x3f3   : > { %3131 = vmatmul.mubr.bf16.gmra.mrb[92].mxu1 %v2930_v61 }
 0x3f4   : > { %3138 = vmatprep.mubr.bf16.mxu1 %v5270_v9 }
 0x3fb   : > { %3139 = vmatmul.mubr.bf16.gmra.mrb[96].mxu1 %v5267_v44 }
 0x3fc   : > { %3146 = vmatprep.mubr.bf16.mxu1 %v5278_v28 }
 0x403   : > { %3147 = vmatmul.mubr.bf16.gmra.mrb[100].mxu1 %v5275_v15 }
 0x404   : > { %3154 = vmatprep.mubr.bf16.mxu1 %v5286_v11 }
 0x40b   : > { %3155 = vmatmul.mubr.bf16.gmra.mrb[104].mxu1 %v5283_v8 }
 0x40c   : > { %3162 = vmatprep.mubr.bf16.mxu1 %v5294_v54 }
 0x413   : > { %3163 = vmatmul.mubr.bf16.gmra.mrb[108].mxu1 %v5291_v19 }
 0x4ae   : > { %v3601_v34 = vpop.f32.mrb[80].mxu1 }
 0x4af   : > { %v3602_v44 = vpop.f32.mrb[81].mxu1 }
 0x4b0   : > { %v3603_v9 = vadd.f32 %v3602_v44, %v3601_v34  ;;  %v3604_v28 = vpop.f32.mrb[82].mxu1 }
 0x4b1   : > { %v3605_v5 = vpop.f32.mrb[83].mxu1 }
 0x4b2   : > { %v3109_v15 = vadd.f32 %v3603_v9, %v5323_v1  ;;  %v3606_v11 = vadd.f32 %v3605_v5, %v3604_v28 }
 0x4b4   : > { %3171 = vst [vmem:[%s5326_s15] sm:$0xff] %v3109_v15  ;;  %v3112_v8 = vadd.f32 %v3606_v11, %v5323_v1 }
 0x4b6   : > { %3172 = vst [vmem:[%s5326_s15 + $0x8] sm:$0xff] %v3112_v8  ;;  %v3607_v19 = vpop.f32.mrb[84].mxu1 }
 0x4b7   : > { %v3608_v54 = vpop.f32.mrb[85].mxu1 }
 0x4b8   : > { %v3609_v38 = vadd.f32 %v3608_v54, %v3607_v19  ;;  %v3610_v20 = vpop.f32.mrb[86].mxu1 }
 0x4b9   : > { %v3611_v56 = vpop.f32.mrb[87].mxu1 }
 0x4ba   : > { %v3117_v13 = vadd.f32 %v3609_v38, %v5323_v1  ;;  %v3612_v57 = vadd.f32 %v3611_v56, %v3610_v20 }
 0x4bc   : > { %3173 = vst [vmem:[%s5326_s15 + $0x10] sm:$0xff] %v3117_v13  ;;  %v3120_v63 = vadd.f32 %v3612_v57, %v5323_v1 }
 0x4be   : > { %3174 = vst [vmem:[%s5326_s15 + $0x18] sm:$0xff] %v3120_v63  ;;  %v3613_v52 = vpop.f32.mrb[88].mxu1 }
 0x4bf   : > { %v3614_v0 = vpop.f32.mrb[89].mxu1 }
 0x4c0   : > { %v3615_v14 = vadd.f32 %v3614_v0, %v3613_v52  ;;  %v3616_v32 = vpop.f32.mrb[90].mxu1 }
 0x4c1   : > { %v3617_v36 = vpop.f32.mrb[91].mxu1 }
 0x4c2   : > { %v3125_v58 = vadd.f32 %v3615_v14, %v5323_v1  ;;  %v3618_v59 = vadd.f32 %v3617_v36, %v3616_v32 }
 0x4c4   : > { %3175 = vst [vmem:[%s5326_s15 + $0x20] sm:$0xff] %v3125_v58  ;;  %v3128_v24 = vadd.f32 %v3618_v59, %v5323_v1 }
 0x4c6   : > { %3176 = vst [vmem:[%s5326_s15 + $0x28] sm:$0xff] %v3128_v24  ;;  %v3619_v26 = vpop.f32.mrb[92].mxu1 }
 0x4c7   : > { %v3620_v27 = vpop.f32.mrb[93].mxu1 }
 0x4c8   : > { %v3621_v29 = vadd.f32 %v3620_v27, %v3619_v26  ;;  %v3622_v30 = vpop.f32.mrb[94].mxu1 }
 0x4c9   : > { %v3623_v31 = vpop.f32.mrb[95].mxu1 }
 0x4ca   : > { %v3133_v35 = vadd.f32 %v3621_v29, %v5323_v1  ;;  %v3624_v49 = vadd.f32 %v3623_v31, %v3622_v30 }
 0x4cc   : > { %3177 = vst [vmem:[%s5326_s15 + $0x30] sm:$0xff] %v3133_v35  ;;  %v3136_v10 = vadd.f32 %v3624_v49, %v5323_v1 }
 0x4ce   : > { %3178 = vst [vmem:[%s5326_s15 + $0x38] sm:$0xff] %v3136_v10  ;;  %v3625_v39 = vpop.f32.mrb[96].mxu1 }
 0x4cf   : > { %v3626_v50 = vpop.f32.mrb[97].mxu1 }
 0x4d0   : > { %v3627_v42 = vadd.f32 %v3626_v50, %v3625_v39  ;;  %v3628_v6 = vpop.f32.mrb[98].mxu1 }
 0x4d1   : > { %v3629_v46 = vpop.f32.mrb[99].mxu1 }
 0x4d2   : > { %v3141_v60 = vadd.f32 %v3627_v42, %v5323_v1  ;;  %v3630_v22 = vadd.f32 %v3629_v46, %v3628_v6 }
 0x4d4   : > { %3179 = vst [vmem:[%s5326_s15 + $0x40] sm:$0xff] %v3141_v60  ;;  %v3144_v62 = vadd.f32 %v3630_v22, %v5323_v1 }
 0x4d6   : > { %3180 = vst [vmem:[%s5326_s15 + $0x48] sm:$0xff] %v3144_v62  ;;  %v3631_v25 = vpop.f32.mrb[100].mxu1 }
 0x4d7   : > { %v3632_v2 = vpop.f32.mrb[101].mxu1 }
 0x4d8   : > { %v3633_v40 = vadd.f32 %v3632_v2, %v3631_v25  ;;  %v3634_v16 = vpop.f32.mrb[102].mxu1 }
 0x4d9   : > { %v3635_v48 = vpop.f32.mrb[103].mxu1 }
 0x4da   : > { %v3149_v23 = vadd.f32 %v3633_v40, %v5323_v1  ;;  %v3636_v41 = vadd.f32 %v3635_v48, %v3634_v16 }
 0x4dc   : > { %3181 = vst [vmem:[%s5326_s15 + $0x50] sm:$0xff] %v3149_v23  ;;  %v3152_v51 = vadd.f32 %v3636_v41, %v5323_v1 }
 0x4de   : > { %3182 = vst [vmem:[%s5326_s15 + $0x58] sm:$0xff] %v3152_v51  ;;  %v3637_v4 = vpop.f32.mrb[104].mxu1 }
 0x4df   : > { %v3638_v45 = vpop.f32.mrb[105].mxu1 }
 0x4e0   : > { %v3639_v33 = vadd.f32 %v3638_v45, %v3637_v4  ;;  %v3640_v47 = vpop.f32.mrb[106].mxu1 }
 0x4e1   : > { %v3641_v12 = vpop.f32.mrb[107].mxu1 }
 0x4e2   : > { %v3157_v21 = vadd.f32 %v3639_v33, %v5323_v1  ;;  %v3642_v53 = vadd.f32 %v3641_v12, %v3640_v47 }
 0x4e4   : > { %3183 = vst [vmem:[%s5326_s15 + $0x60] sm:$0xff] %v3157_v21  ;;  %v3160_v43 = vadd.f32 %v3642_v53, %v5323_v1 }
 0x4e6   : > { %3184 = vst [vmem:[%s5326_s15 + $0x68] sm:$0xff] %v3160_v43  ;;  %v3643_v18 = vpop.f32.mrb[108].mxu1 }
 0x4e7   : > { %v3644_v7 = vpop.f32.mrb[109].mxu1 }
 0x4e8   : > { %v3645_v55 = vadd.f32 %v3644_v7, %v3643_v18  ;;  %v3646_v3 = vpop.f32.mrb[110].mxu1 }
 0x4e9   : > { %v3647_v37 = vpop.f32.mrb[111].mxu1 }
 0x4ea   : > { %v3165_v61 = vadd.f32 %v3645_v55, %v5323_v1  ;;  %v3648_v17 = vadd.f32 %v3647_v37, %v3646_v3 }
 0x4ec   : > { %3185 = vst [vmem:[%s5326_s15 + $0x70] sm:$0xff] %v3165_v61  ;;  %v3168_v34 = vadd.f32 %v3648_v17, %v5323_v1 }
 0x4ee   : > { %3186 = vst [vmem:[%s5326_s15 + $0x78] sm:$0xff] %v3168_v34 }
 0x4ef   : > { %4484 = shalt.err (!%p4481_p13)
}
 0x4f0   : > { %s4485_s20 = scalar_lea.hbm %s5361_s27, 2048  ;;  %s4489_s18 = scalar_lea.hbm %s5416_s6, 4096 }
 0x4f1   : > { %p4486_p9 = scmp.ne.s32.totalorder %s5361_s27, %s4485_s20  ;;  %p4490_p6 = scmp.lt.u32.totalorder %s5361_s27, %s5416_s6 }
 0x4f2   : > { %p4491_p4 = scmp.lt.u32.totalorder %s4489_s18, %s4485_s20  ;;  %p4493_p10 = scmp.lt.u32.totalorder %s4485_s20, %s5361_s27 }
 0x4f3   : > { %p4487_p0 = pnand %p4486_p9, %p4772_p3 }
 0x4f4   : > { %p4492_p8 = por %p4491_p4, %p4490_p6 }
 0x4f5   : > { %p4488_p11 = pneg %p4487_p0 }
 0x4f6   : > { %p4494_p5 = por %p4493_p10, %p4492_p8 }
 0x4f8   : > { %p4495_p7 = pnand %p4494_p5, %p4488_p11 }
 0x4fa   : > { %4498 = shalt.err (!%p4495_p7)
}
 0x4fb   : > { %s4560_s13 = smov 128   ;;  %s4561_s17 = smov 8  }
 0x4fc   : > { %3891 = dma.vmem_to_hbm [thread:$0]  (%p4772_p3), %s5363_s7, 2048, %s5361_s27, %s3188_s25, %s4560_s13, %s4560_s13, %s4561_s17  }
 0x4fd PF: > { %s3216_s29 = sand.u32 1, %s4533_s21   ;;  %p5438_p12 = scmp.ne.s32.totalorder %s5423_s28, 0 }
 0x4fe   : > { %p5439_p1 = scmp.ge.s32.totalorder %s4545_s24, 2  ;;  %s3217_s19 = scalar_lea.sflag [#allocation4], %s3216_s29 }
 0x500   : > { %p3911_p2 = pnand %p5439_p1, %p5438_p12 }
 0x502   : > { %4528 = dma.done.wait (!%p3911_p2), %s3217_s19, 2048  }
 0x503   : > { %4530 = vsyncadd (!%p3911_p2), %s3217_s19, 4294965248  ;;  %p21_p13 = scmp.ge.s32.totalorder %s4759_s30, 4   ;;  %s5440_s21 = smov %s4537_s22 }
 0x504   : > { %s5441_s22 = smov %s4541_s23  ;;  %s5442_s23 = smov %s4768_s14 }
 0x505   : > { %s5443_s24 = smov %s4759_s30  ;;  %23 = sbr.rel (!%p21_p13) target bundleno = 7 (0x7), region = 105 }
 0x50c   :  { %3222 = vsyncpa [#allocation3], 1 }
 0x50d   :  { %3224 = vsyncpa [#allocation3 + $0x1], 1 }
 0x50e   :  { %3225 = vsyncpa [#allocation6], 1 }
 0x50f   :  { %3226 = vsyncpa [#allocation9], 1 }
 0x510   :  { %3227 = vsyncpa [#allocation4], 1 }
 0x511   :  { %3229 = vsyncpa [#allocation4 + $0x1], 1 }

// kernel: tpu_custom_call.1
= control target key start
LH: loop header
LB: loop body
LE: loop exit
PB: predicated region body
PF: predicated region fallthrough
CT: control target
= control target key end

     0   :  { %11 = vsyncpa [#allocation3], 0  ;;  %s5410_s0 = inlined_call_operand.hbm [shape: bf16[256,128], index: 0, kind: input, shape index: {}]   ;;  %s5411_s1 = inlined_call_operand.hbm [shape: bf16[128,512], index: 1, kind: input, shape index: {}]   ;;  %s5412_s2 = inlined_call_operand.hbm [shape: bf16[512,512], index: 2, kind: input, shape index: {}]   ;;  %s5413_s3 = inlined_call_operand.hbm [shape: bf16[512,256], index: 3, kind: input, shape index: {}]   ;;  %s5414_s4 = inlined_call_operand.hbm [shape: bf16[256,128], index: 4, kind: input, shape index: {}]   ;;  %s5415_s5 = inlined_call_operand.vmem [shape: f32[1,1408], index: 5, kind: input, shape index: {}]   ;;  %s5416_s6 = inlined_call_operand.hbm [shape: f32[256,128], index: 6, kind: output, shape index: {}]  }
   0x1   :  { %13 = vsyncpa [#allocation3 + $0x1], 0 }
   0x2   :  { %14 = vsyncpa [#allocation6], 0 }
   0x3   :  { %15 = vsyncpa [#allocation9], 0 }
   0x4   :  { %16 = vsyncpa [#allocation4], 0 }
   0x5   :  { %18 = vsyncpa [#allocation4 + $0x1], 0  ;;  %s4597_s21 = smov 0   ;;  %s4599_s22 = smov 0  }
   0x6   :  { %s4601_s23 = smov 0   ;;  %s4603_s24 = smov 0  }
   0x7 LB: > { %s4618_s25 = sadd.s32 4294967295, %s4545_s24   ;;  %s3312_s26 = sadd.s32 4294967294, %s4545_s24   ;;  %s4545_s24 = sphi %s4603_s24, %s5443_s24   ;;  %s4541_s23 = sphi %s4601_s23, %s5442_s23   ;;  %s4537_s22 = sphi %s4599_s22, %s5441_s22   ;;  %s4533_s21 = sphi %s4597_s21, %s5440_s21  }
   0x8   : > { %p44_p0 = scmp.ne.s32.totalorder %s4537_s22, %s4533_s21  ;;  %p5417_p1 = scmp.eq.s32.totalorder %s4618_s25, 0 }
   0x9   : > { %p179_p3 = scmp.eq.s32.totalorder %s3312_s26, 1  ;;  %p3313_p5 = scmp.ge.s32.totalorder %s4545_s24, 1 }
   0xa   : > { %p4627_p4 = por %p5417_p1, %p44_p0  ;;  %p186_p7 = scmp.lt.s32.totalorder %s4545_s24, 3 }
   0xb   : > { %p4632_p6 = por %p179_p3, %p44_p0  ;;  %s4547_s30 = smov [#allocation5]  }
   0xc   : > { %s5422_s27 = scalar_select %p4627_p4, 1, 0 }
   0xd   : > { %s5423_s28 = scalar_select %p4632_p6, 1, 0 }
   0xe   : > { %p4637_p8 = pnand %p3313_p5, %p186_p7  ;;  %s198_s7 = sshll.u32 %s4547_s30, 4  ;;  %s4641_s7 = int_to_ptr.vmem [resolvable:$true] %s198_s7 }
   0xf   : > { %s4548_s9 = smov [#allocation8]   ;;  %s4329_s13 = scalar_lea.hbm %s5411_s1, 4096 }
  0x10   : > { %s5424_s29 = scalar_select %p4637_p8, 1, 0 }
  0x11   : > { %p3893_p9 = pneg %p4637_p8  ;;  %s224_s10 = sshll.u32 %s4548_s9, 4  ;;  %s4652_s10 = int_to_ptr.vmem [resolvable:$true] %s224_s10 }
  0x12   : > { %p4330_p12 = scmp.ne.s32.totalorder %s5411_s1, %s4329_s13  ;;  %p4336_p5 = scmp.lt.u32.totalorder %s4329_s13, %s5411_s1 }
  0x13   : > { %p4648_p11 = pnand %p3893_p9, %p5417_p1 }
  0x15   : > { %p4662_p13 = pneg %p4648_p11 }
  0x17   : > { %p4332_p0 = pnand %p4662_p13, %p4330_p12 }
  0x19   : > { %p4333_p3 = pneg %p4332_p0 }
  0x1b   : > { %p4338_p7 = pnand %p4336_p5, %p4333_p3 }
  0x1d   : > { %4341 = shalt.err (!%p4338_p7)
}
  0x1e   : > { %s4342_s19 = scalar_lea.vmem %s4641_s7, 4096  ;;  %p4350_p2 = scmp.lt.s32.totalorder %s4641_s7, %s4641_s7 }
  0x1f   : > { %p4343_p9 = scmp.ne.s32.totalorder %s4641_s7, %s4342_s19  ;;  %p4351_p6 = scmp.lt.s32.totalorder %s4342_s19, %s4342_s19 }
  0x21   : > { %p4345_p10 = pnand %p4343_p9, %p4662_p13  ;;  %p4352_p12 = por %p4351_p6, %p4350_p2 }
  0x23   : > { %p4346_p1 = pneg %p4345_p10 }
  0x25   : > { %p4353_p0 = pnand %p4352_p12, %p4346_p1 }
  0x27   : > { %4356 = shalt.err (!%p4353_p0)
}
  0x28   : > { %s5418_s20 = smov 256   ;;  %s5419_s26 = smov 16  }
  0x29   : > { %3896 = dma.hbm_to_vmem [thread:$0]  (!%p4648_p11), %s5411_s1, 4096, %s4641_s7, [#allocation6], %s5418_s20, %s5418_s20, %s5419_s26  }
  0x2a   : > { %s4357_s13 = scalar_lea.hbm %s5413_s3, 8192 }
  0x2b   : > { %p4358_p1 = scmp.ne.s32.totalorder %s5413_s3, %s4357_s13  ;;  %p4364_p10 = scmp.lt.u32.totalorder %s4357_s13, %s5413_s3 }
  0x2d   : > { %p4360_p2 = pnand %p4358_p1, %p4662_p13 }
  0x2f   : > { %p4361_p6 = pneg %p4360_p2 }
  0x31   : > { %p4366_p3 = pnand %p4364_p10, %p4361_p6 }
  0x33   : > { %4369 = shalt.err (!%p4366_p3)
}
  0x34   : > { %s4370_s7 = scalar_lea.vmem %s4652_s10, 8192  ;;  %p4378_p12 = scmp.lt.s32.totalorder %s4652_s10, %s4652_s10 }
  0x35   : > { %p4371_p5 = scmp.ne.s32.totalorder %s4652_s10, %s4370_s7  ;;  %p4379_p0 = scmp.lt.s32.totalorder %s4370_s7, %s4370_s7 }
  0x37   : > { %p4373_p7 = pnand %p4371_p5, %p4662_p13  ;;  %p4380_p1 = por %p4379_p0, %p4378_p12 }
  0x39   : > { %p4374_p9 = pneg %p4373_p7 }
  0x3b   : > { %p4381_p2 = pnand %p4380_p1, %p4374_p9 }
  0x3d   : > { %4384 = shalt.err (!%p4381_p2)
}
  0x3e   : > { %s4551_s19 = smov 128   ;;  %s4552_s30 = smov 8  }
  0x3f   : > { %3902 = dma.hbm_to_vmem [thread:$0]  (!%p4648_p11), %s5413_s3, 8192, %s4652_s10, [#allocation9], %s4551_s19, %s4551_s19, %s4552_s30  }
  0x40   : > { %s4553_s12 = smov [#allocation7]   ;;  %s4554_s14 = smov [#allocation10]  }
  0x41   : > { %s211_s13 = sshll.u32 %s4553_s12, 4  ;;  %s237_s15 = sshll.u32 %s4554_s14, 4  ;;  %s212_s13 = int_to_ptr.vmem [resolvable:$true] %s211_s13  ;;  %s4709_s15 = int_to_ptr.vmem [resolvable:$true] %s237_s15 }
  0x42   : > { %s4385_s7 = scalar_lea.hbm %s5412_s2, 16384 }
  0x43   : > { %p4386_p6 = scmp.ne.s32.totalorder %s5412_s2, %s4385_s7  ;;  %p4392_p5 = scmp.lt.u32.totalorder %s4385_s7, %s5412_s2 }
  0x45   : > { %p4388_p10 = pnand %p4386_p6, %p4662_p13 }
  0x47   : > { %p4389_p3 = pneg %p4388_p10 }
  0x49   : > { %p4394_p7 = pnand %p4392_p5, %p4389_p3 }
  0x4b   : > { %4397 = shalt.err (!%p4394_p7)
}
  0x4c   : > { %s4398_s19 = scalar_lea.vmem %s212_s13, 16384  ;;  %p4406_p1 = scmp.lt.s32.totalorder %s212_s13, %s212_s13 }
  0x4d   : > { %p4399_p9 = scmp.ne.s32.totalorder %s212_s13, %s4398_s19  ;;  %p4407_p2 = scmp.lt.s32.totalorder %s4398_s19, %s4398_s19 }
  0x4f   : > { %p4401_p12 = pnand %p4399_p9, %p4662_p13  ;;  %p4408_p4 = por %p4407_p2, %p4406_p1 }
  0x51   : > { %p4402_p0 = pneg %p4401_p12 }
  0x53   : > { %p4409_p8 = pnand %p4408_p4, %p4402_p0 }
  0x55   : > { %4412 = shalt.err (!%p4409_p8)
}
  0x56   : > { %s5427_s20 = smov 16   ;;  %s5428_s26 = smov 256  }
  0x57   : > { %3899 = dma.hbm_to_vmem [thread:$0]  (!%p4648_p11), %s5412_s2, 16384, %s212_s13, [#allocation6], %s5428_s26, %s5428_s26, %s5427_s20  }
  0x58   : > { %s4413_s17 = scalar_lea.hbm %s5414_s4, 2048 }
  0x59   : > { %p4414_p6 = scmp.ne.s32.totalorder %s5414_s4, %s4413_s17  ;;  %p4420_p10 = scmp.lt.u32.totalorder %s4413_s17, %s5414_s4 }
  0x5b   : > { %p4416_p4 = pnand %p4414_p6, %p4662_p13 }
  0x5d   : > { %p4417_p8 = pneg %p4416_p4 }
  0x5f   : > { %p4422_p3 = pnand %p4420_p10, %p4417_p8 }
  0x61   : > { %4425 = shalt.err (!%p4422_p3)
}
  0x62   : > { %s4426_s13 = scalar_lea.vmem %s4709_s15, 2048  ;;  %p4434_p12 = scmp.lt.s32.totalorder %s4709_s15, %s4709_s15 }
  0x63   : > { %p4427_p5 = scmp.ne.s32.totalorder %s4709_s15, %s4426_s13  ;;  %p4435_p0 = scmp.lt.s32.totalorder %s4426_s13, %s4426_s13 }
  0x65   : > { %p4429_p7 = pnand %p4427_p5, %p4662_p13  ;;  %p4436_p1 = por %p4435_p0, %p4434_p12 }
  0x67   : > { %p4430_p9 = pneg %p4429_p7 }
  0x69   : > { %p4437_p2 = pnand %p4436_p1, %p4430_p9 }
  0x6b   : > { %4440 = shalt.err (!%p4437_p2)
}
  0x6c   : > { %s4555_s19 = smov 64   ;;  %s4556_s16 = smov 4  }
  0x6d   : > { %3905 = dma.hbm_to_vmem [thread:$0]  (!%p4648_p11), %s5414_s4, 2048, %s4709_s15, [#allocation9], %s4555_s19, %s4555_s19, %s4556_s16  }
  0x6e   : > { %s4759_s30 = sadd.s32 1, %s4545_s24   ;;  %s31_s12 = sadd.s32 1, %s4541_s23 }
  0x6f   : > { %s28_s11 = ssub.s32 %s4545_s24, %s4759_s30  ;;  %p38_p6 = scmp.ne.s32.totalorder %s4541_s23, %s4537_s22 }
  0x70   : > { %p29_p13 = scmp.eq.s32.totalorder %s28_s11, 0  ;;  %p39_p4 = scmp.eq.s32.totalorder %s4545_s24, 0 }
  0x71   : > { %p5429_p10 = scmp.eq.s32.totalorder %s4618_s25, 1  ;;  %p3918_p5 = scmp.lt.s32.totalorder %s4545_s24, 2 }
  0x72   : > { %s4768_s14 = scalar_select %p29_p13, %s4541_s23, %s31_s12  }
  0x73   : > { %p40_p8 = por %p39_p4, %p38_p6  ;;  %p4772_p3 = por %p5429_p10, %p38_p6 }
  0x74   : > { %s254_s17 = sand.u32 1, %s4541_s23   ;;  %s3583_s15 = sshll.u32 %s4545_s24, 10 }
  0x75   : > { %s3319_s18 = sshll.u32 %s254_s17, 6  ;;  %s4782_s10 = scalar_lea.hbm %s5410_s0, %s3583_s15 }
  0x76   : > { %s258_s13 = scalar_lea.vmem [#allocation2], %s3319_s18  ;;  %p4786_p11 = pnand %p3918_p5, %p40_p8 }
  0x77   : > { %s265_s20 = sshll.u32 %s258_s13, 4  ;;  %s4790_s11 = scalar_lea.sflag [#allocation3], %s254_s17  ;;  %s4784_s20 = int_to_ptr.vmem [resolvable:$true] %s265_s20 }
  0x78   : > { %s4441_s12 = scalar_lea.hbm %s4782_s10, 1024  ;;  %p4443_p9 = pneg %p4786_p11 }
  0x79   : > { %p4442_p7 = scmp.ne.s32.totalorder %s4782_s10, %s4441_s12  ;;  %s4446_s7 = scalar_lea.hbm %s5410_s0, 2048 }
  0x7a   : > { %p4447_p1 = scmp.lt.u32.totalorder %s4782_s10, %s5410_s0  ;;  %p4448_p2 = scmp.lt.u32.totalorder %s4446_s7, %s4441_s12 }
  0x7b   : > { %p4444_p12 = pnand %p4443_p9, %p4442_p7  ;;  %p4450_p6 = scmp.lt.u32.totalorder %s4441_s12, %s4782_s10 }
  0x7c   : > { %p4449_p13 = por %p4448_p2, %p4447_p1 }
  0x7d   : > { %p4445_p0 = pneg %p4444_p12 }
  0x7e   : > { %p4451_p4 = por %p4450_p6, %p4449_p13 }
  0x80   : > { %p4452_p8 = pnand %p4451_p4, %p4445_p0 }
  0x82   : > { %4455 = shalt.err (!%p4452_p8)
}
  0x83   : > { %s4456_s17 = scalar_lea.vmem %s4784_s20, 1024  ;;  %s4557_s18 = smov [#allocation2]  }
  0x84   : > { %p4457_p10 = scmp.ne.s32.totalorder %s4784_s20, %s4456_s17  ;;  %s4461_s15 = sshll.u32 %s4557_s18, 4  ;;  %s4462_s15 = int_to_ptr.vmem [resolvable:$false] %s4461_s15 }
  0x85   : > { %s4463_s9 = scalar_lea.vmem %s4462_s15, 2048  ;;  %p4464_p12 = scmp.lt.s32.totalorder %s4784_s20, %s4462_s15 }
  0x86   : > { %p4459_p5 = pnand %p4457_p10, %p4443_p9  ;;  %p4465_p1 = scmp.lt.s32.totalorder %s4463_s9, %s4456_s17 }
  0x88   : > { %p4460_p7 = pneg %p4459_p5  ;;  %p4466_p2 = por %p4465_p1, %p4464_p12 }
  0x8a   : > { %p4467_p13 = pnand %p4466_p2, %p4460_p7 }
  0x8c   : > { %4470 = shalt.err (!%p4467_p13)
}
  0x8d   : > { %3909 = dma.hbm_to_vmem [thread:$0]  (!%p4786_p11), %s4782_s10, 1024, %s4784_s20, %s4790_s11, %s4555_s19, %s4555_s19, %s4556_s16  }
  0x8e   : > { %p5432_p9 = scmp.ne.s32.totalorder %s5424_s29, 0 }
  0x8f   : > { %s4824_s12 = sand.u32 (!%p5432_p9), 1, %s4537_s22   ;;  %p5433_p0 = scmp.ne.s32.totalorder (!%p5432_p9), %s5422_s27, 0 }
  0x90   : > { %277 = sbr.rel (%p5432_p9) target bundleno = 1277 (0x4fd), region = 44  ;;  %s3323_s7 = sshll.u32 (!%p5432_p9), %s4824_s12, 6 }
  0x91   : > { %s280_s13 = scalar_lea.sflag (!%p5432_p9), [#allocation3], %s4824_s12  ;;  %s4828_s17 = scalar_lea.vmem (!%p5432_p9), [#allocation2], %s3323_s7 }
  0x97   : > { %4516 = dma.done.wait (%p5433_p0), %s280_s13, 1024  }
  0x98   : > { %4518 = vsyncadd (%p5433_p0), %s280_s13, 4294966272  ;;  %p5434_p11 = scmp.eq.s32.totalorder %s4618_s25, 0 }
  0x9a   : > { %4520 = dma.done.wait (%p5434_p11), [#allocation6], 20480   ;;  %p5435_p6 = pmov %p5434_p11 }
  0x9c   : > { %4522 = vsyncadd (%p5435_p6), [#allocation6], 4294946816  ;;  %p5436_p4 = pmov %p5435_p6 }
  0x9e   : > { %4524 = dma.done.wait (%p5436_p4), [#allocation9], 10240   ;;  %p5437_p8 = pmov %p5436_p4 }
  0x9f   : > { %v4558_v0 = vmov 0   ;;  %v3969_v1 = vld [vmem:[#allocation5 + $0x4] ss:$16 sps:$4 sm:$0xff]   ;;  %v3971_v2 = vld [vmem:[#allocation5] ss:$16 sps:$4 sm:$0xff]   ;;  %v3994_v36 = vld [vmem:[%s4828_s17 + $0x8] sm:$0xff]  }
  0xa0   : > { %4526 = vsyncadd (%p5437_p8), [#allocation9], 4294957056  ;;  %644 = vmatprep.mubr.bf16.mxu0 %v4558_v0  ;;  %757 = vmatprep.mubr.bf16.mxu1 %v4558_v0  ;;  %v3972_v3 = vld [vmem:[#allocation5 + $0x24] ss:$16 sps:$4 sm:$0xff]   ;;  %v3974_v4 = vld [vmem:[#allocation5 + $0x20] ss:$16 sps:$4 sm:$0xff]  }
  0xa1   : > { %612 = vmatprep.subr.bf16.mxu0 %v3969_v1  ;;  %v3975_v5 = vld [vmem:[#allocation5 + $0x44] ss:$16 sps:$4 sm:$0xff]   ;;  %v3977_v6 = vld [vmem:[#allocation5 + $0x40] ss:$16 sps:$4 sm:$0xff]   ;;  %v3997_v11 = vld [vmem:[#allocation5 + $0xc] ss:$16 sps:$4 sm:$0xff]  }
  0xa2   : > { %613 = vmatpush1.bf16.msra.mxu0 %v3971_v2  ;;  %v3978_v7 = vld [vmem:[#allocation5 + $0x64] ss:$16 sps:$4 sm:$0xff]   ;;  %v3980_v8 = vld [vmem:[#allocation5 + $0x60] ss:$16 sps:$4 sm:$0xff]   ;;  %v3999_v12 = vld [vmem:[#allocation5 + $0x8] ss:$16 sps:$4 sm:$0xff]   ;;  %725 = vmatprep.subr.bf16.mxu1 %v3997_v11 }
  0xa3   : > { %614 = vmatprep.subr.bf16.mxu0 %v3972_v3  ;;  %v3981_v9 = vld [vmem:[#allocation5 + $0x84] ss:$16 sps:$4 sm:$0xff]   ;;  %v3983_v10 = vld [vmem:[#allocation5 + $0x80] ss:$16 sps:$4 sm:$0xff]   ;;  %v4001_v14 = vld [vmem:[#allocation5 + $0x2c] ss:$16 sps:$4 sm:$0xff]   ;;  %726 = vmatpush1.bf16.msra.mxu1 %v3999_v12 }
  0xa4   : > { %v3984_v13 = vld [vmem:[#allocation5 + $0xa4] ss:$16 sps:$4 sm:$0xff]   ;;  %v4003_v15 = vld [vmem:[#allocation5 + $0x28] ss:$16 sps:$4 sm:$0xff]   ;;  %v3986_v16 = vld [vmem:[#allocation5 + $0xa0] ss:$16 sps:$4 sm:$0xff]   ;;  %727 = vmatprep.subr.bf16.mxu1 %v4001_v14 }
  0xa5   : > { %v4004_v17 = vld [vmem:[#allocation5 + $0x4c] ss:$16 sps:$4 sm:$0xff]   ;;  %v3987_v18 = vld [vmem:[#allocation5 + $0xc4] ss:$16 sps:$4 sm:$0xff]   ;;  %v3989_v19 = vld [vmem:[#allocation5 + $0xc0] ss:$16 sps:$4 sm:$0xff]  }
  0xa6   : > { %615 = vmatpush1.bf16.msra.mxu0 %v3974_v4  ;;  %v4006_v20 = vld [vmem:[#allocation5 + $0x48] ss:$16 sps:$4 sm:$0xff]   ;;  %v4008_v21 = vld [vmem:[#allocation5 + $0x6c] ss:$16 sps:$4 sm:$0xff]   ;;  %v3990_v22 = vld [vmem:[#allocation5 + $0xe4] ss:$16 sps:$4 sm:$0xff]  }
  0xa7   : > { %616 = vmatprep.subr.bf16.mxu0 %v3975_v5  ;;  %728 = vmatpush1.bf16.msra.mxu1 %v4003_v15  ;;  %v3992_v23 = vld [vmem:[#allocation5 + $0xe0] ss:$16 sps:$4 sm:$0xff]   ;;  %v4010_v24 = vld [vmem:[#allocation5 + $0x68] ss:$16 sps:$4 sm:$0xff]   ;;  %v4011_v25 = vld [vmem:[#allocation5 + $0x8c] ss:$16 sps:$4 sm:$0xff]  }
  0xa8   : > { %729 = vmatprep.subr.bf16.mxu1 %v4004_v17  ;;  %v3993_v26 = vld [vmem:[%s4828_s17] sm:$0xff]   ;;  %v4013_v27 = vld [vmem:[#allocation5 + $0x88] ss:$16 sps:$4 sm:$0xff]   ;;  %v4015_v29 = vld [vmem:[#allocation5 + $0xac] ss:$16 sps:$4 sm:$0xff]   ;;  %s3328_s26 = sshll.u32 %s4824_s12, 7 }
  0xa9   : > { %v4027_v28 = vld [vmem:[#allocation7 + $0x4] ss:$16 sps:$4 sm:$0xff]   ;;  %v4025_v30 = vld [vmem:[#allocation7] ss:$16 sps:$4 sm:$0xff]   ;;  %v4017_v32 = vld [vmem:[#allocation5 + $0xa8] ss:$16 sps:$4 sm:$0xff]  }
  0xaa   : > { %617 = vmatpush1.bf16.msra.mxu0 %v3977_v6  ;;  %v4033_v31 = vld [vmem:[#allocation7 + $0x24] ss:$16 sps:$4 sm:$0xff]   ;;  %v4018_v33 = vld [vmem:[#allocation5 + $0xcc] ss:$16 sps:$4 sm:$0xff]   ;;  %v4031_v34 = vld [vmem:[#allocation7 + $0x20] ss:$16 sps:$4 sm:$0xff]  }
  0xab   : > { %618 = vmatprep.subr.bf16.mxu0 %v3978_v7  ;;  %730 = vmatpush1.bf16.msra.mxu1 %v4006_v20  ;;  %v4039_v35 = vld [vmem:[#allocation7 + $0x44] ss:$16 sps:$4 sm:$0xff]   ;;  %v4020_v37 = vld [vmem:[#allocation5 + $0xc8] ss:$16 sps:$4 sm:$0xff]   ;;  %v4022_v38 = vld [vmem:[#allocation5 + $0xec] ss:$16 sps:$4 sm:$0xff]  }
  0xac   : > { %731 = vmatprep.subr.bf16.mxu1 %v4008_v21  ;;  %v4037_v39 = vld [vmem:[#allocation7 + $0x40] ss:$16 sps:$4 sm:$0xff]   ;;  %v4045_v40 = vld [vmem:[#allocation7 + $0x64] ss:$16 sps:$4 sm:$0xff]   ;;  %v4024_v41 = vld [vmem:[#allocation5 + $0xe8] ss:$16 sps:$4 sm:$0xff]  }
  0xad   : > { %v4030_v42 = vld [vmem:[#allocation7 + $0xc] ss:$16 sps:$4 sm:$0xff]   ;;  %v4043_v43 = vld [vmem:[#allocation7 + $0x60] ss:$16 sps:$4 sm:$0xff]   ;;  %v4051_v44 = vld [vmem:[#allocation7 + $0x84] ss:$16 sps:$4 sm:$0xff]  }
  0xae   : > { %619 = vmatpush1.bf16.msra.mxu0 %v3980_v8  ;;  %v3995_v45 = vld [vmem:[%s4828_s17 + $0x10] sm:$0xff]   ;;  %v4028_v46 = vld [vmem:[#allocation7 + $0x8] ss:$16 sps:$4 sm:$0xff]   ;;  %v4036_v47 = vld [vmem:[#allocation7 + $0x2c] ss:$16 sps:$4 sm:$0xff]   ;;  %s5326_s15 = scalar_lea.vmem [#allocation11], %s3328_s26 }
  0xaf   : > { %620 = vmatprep.subr.bf16.mxu0 %v3981_v9  ;;  %732 = vmatpush1.bf16.msra.mxu1 %v4010_v24  ;;  %v4049_v48 = vld [vmem:[#allocation7 + $0x80] ss:$16 sps:$4 sm:$0xff]   ;;  %v4057_v49 = vld [vmem:[#allocation7 + $0xa4] ss:$16 sps:$4 sm:$0xff]   ;;  %v4034_v50 = vld [vmem:[#allocation7 + $0x28] ss:$16 sps:$4 sm:$0xff]  }
  0xb0   : > { %733 = vmatprep.subr.bf16.mxu1 %v4011_v25  ;;  %v4042_v51 = vld [vmem:[#allocation7 + $0x4c] ss:$16 sps:$4 sm:$0xff]   ;;  %v4055_v52 = vld [vmem:[#allocation7 + $0xa0] ss:$16 sps:$4 sm:$0xff]   ;;  %v4063_v53 = vld [vmem:[#allocation7 + $0xc4] ss:$16 sps:$4 sm:$0xff]  }
  0xb1   : > { %v3996_v54 = vld [vmem:[%s4828_s17 + $0x18] sm:$0xff]   ;;  %v4061_v57 = vld [vmem:[#allocation7 + $0xc0] ss:$16 sps:$4 sm:$0xff]   ;;  %v4069_v58 = vld [vmem:[#allocation7 + $0xe4] ss:$16 sps:$4 sm:$0xff]   ;;  %s3584_s9 = sshll.u32 %s4618_s25, 11 }
  0xb2   : > { %621 = vmatpush1.bf16.msra.mxu0 %v3983_v10  ;;  %v4040_v55 = vld [vmem:[#allocation7 + $0x48] ss:$16 sps:$4 sm:$0xff]   ;;  %v4048_v56 = vld [vmem:[#allocation7 + $0x6c] ss:$16 sps:$4 sm:$0xff]   ;;  %v4067_v61 = vld [vmem:[#allocation7 + $0xe0] ss:$16 sps:$4 sm:$0xff]   ;;  %s5361_s27 = scalar_lea.hbm %s5416_s6, %s3584_s9 }
  0xb3   : > { %622 = vmatprep.subr.bf16.mxu0 %v3984_v13  ;;  %734 = vmatpush1.bf16.msra.mxu1 %v4013_v27  ;;  %v4046_v59 = vld [vmem:[#allocation7 + $0x68] ss:$16 sps:$4 sm:$0xff]   ;;  %v4054_v60 = vld [vmem:[#allocation7 + $0x8c] ss:$16 sps:$4 sm:$0xff]   ;;  %v4075_v62 = vld [vmem:[#allocation7 + $0x104] ss:$16 sps:$4 sm:$0xff]  }
  0xb4   : > { %735 = vmatprep.subr.bf16.mxu1 %v4015_v29  ;;  %v4000_v63 = vld [vmem:[%s4828_s17 + $0x20] sm:$0xff]   ;;  %v4052_v1 = vld [vmem:[#allocation7 + $0x88] ss:$16 sps:$4 sm:$0xff]   ;;  %v4060_v2 = vld [vmem:[#allocation7 + $0xac] ss:$16 sps:$4 sm:$0xff]   ;;  %s3201_s7 = sshll.u32 %s5326_s15, 4  ;;  %s5363_s7 = int_to_ptr.vmem [resolvable:$true] %s3201_s7 }
  0xb5   : > { %v4073_v3 = vld [vmem:[#allocation7 + $0x100] ss:$16 sps:$4 sm:$0xff]   ;;  %v4081_v4 = vld [vmem:[#allocation7 + $0x124] ss:$16 sps:$4 sm:$0xff]   ;;  %v4058_v5 = vld [vmem:[#allocation7 + $0xa8] ss:$16 sps:$4 sm:$0xff]  }
  0xb6   : > { %623 = vmatpush1.bf16.msra.mxu0 %v3986_v16  ;;  %v4066_v6 = vld [vmem:[#allocation7 + $0xcc] ss:$16 sps:$4 sm:$0xff]   ;;  %v4079_v7 = vld [vmem:[#allocation7 + $0x120] ss:$16 sps:$4 sm:$0xff]   ;;  %v4087_v8 = vld [vmem:[#allocation7 + $0x144] ss:$16 sps:$4 sm:$0xff]  }
  0xb7   : > { %624 = vmatprep.subr.bf16.mxu0 %v3987_v18  ;;  %736 = vmatpush1.bf16.msra.mxu1 %v4017_v32  ;;  %v4007_v9 = vld [vmem:[%s4828_s17 + $0x28] sm:$0xff]   ;;  %v4085_v12 = vld [vmem:[#allocation7 + $0x140] ss:$16 sps:$4 sm:$0xff]   ;;  %v4093_v13 = vld [vmem:[#allocation7 + $0x164] ss:$16 sps:$4 sm:$0xff]   ;;  %s3188_s25 = scalar_lea.sflag [#allocation4], %s4824_s12 }
  0xb8   : > { %737 = vmatprep.subr.bf16.mxu1 %v4018_v33  ;;  %v4064_v10 = vld [vmem:[#allocation7 + $0xc8] ss:$16 sps:$4 sm:$0xff]   ;;  %v4072_v11 = vld [vmem:[#allocation7 + $0xec] ss:$16 sps:$4 sm:$0xff]   ;;  %v4091_v16 = vld [vmem:[#allocation7 + $0x160] ss:$16 sps:$4 sm:$0xff]  }
  0xb9   : > { %v4070_v14 = vld [vmem:[#allocation7 + $0xe8] ss:$16 sps:$4 sm:$0xff]   ;;  %v4078_v15 = vld [vmem:[#allocation7 + $0x10c] ss:$16 sps:$4 sm:$0xff]   ;;  %v4099_v17 = vld [vmem:[#allocation7 + $0x184] ss:$16 sps:$4 sm:$0xff]  }
  0xba   : > { %625 = vmatpush1.bf16.msra.mxu0 %v3989_v19  ;;  %v4014_v18 = vld [vmem:[%s4828_s17 + $0x30] sm:$0xff]   ;;  %v4076_v19 = vld [vmem:[#allocation7 + $0x108] ss:$16 sps:$4 sm:$0xff]   ;;  %v4084_v20 = vld [vmem:[#allocation7 + $0x12c] ss:$16 sps:$4 sm:$0xff]   ;;  %s4471_s29 = scalar_lea.vmem %s5363_s7, 2048 }
  0xbb   : > { %626 = vmatprep.subr.bf16.mxu0 %v3990_v22  ;;  %738 = vmatpush1.bf16.msra.mxu1 %v4020_v37  ;;  %v4097_v21 = vld [vmem:[#allocation7 + $0x180] ss:$16 sps:$4 sm:$0xff]   ;;  %v4105_v22 = vld [vmem:[#allocation7 + $0x1a4] ss:$16 sps:$4 sm:$0xff]   ;;  %v4090_v24 = vld [vmem:[#allocation7 + $0x14c] ss:$16 sps:$4 sm:$0xff]   ;;  %p4472_p10 = scmp.ne.s32.totalorder %s5363_s7, %s4471_s29 }
  0xbc   : > { %739 = vmatprep.subr.bf16.mxu1 %v4022_v38  ;;  %v4103_v25 = vld [vmem:[#allocation7 + $0x1a0] ss:$16 sps:$4 sm:$0xff]   ;;  %v4088_v27 = vld [vmem:[#allocation7 + $0x148] ss:$16 sps:$4 sm:$0xff]   ;;  %v4108_v32 = vld [vmem:[#allocation7 + $0x1ac] ss:$16 sps:$4 sm:$0xff]  }
  0xbd   : > { %v4094_v29 = vld [vmem:[#allocation7 + $0x168] ss:$16 sps:$4 sm:$0xff]   ;;  %v4117_v38 = vld [vmem:[#allocation7 + $0x1e4] ss:$16 sps:$4 sm:$0xff]   ;;  %p4473_p5 = pnand %p4472_p10, %p4772_p3  ;;  %s4559_s19 = smov [#allocation11]  }
  0xbe   : > { %627 = vmatpush1.bf16.msra.mxu0 %v3992_v23  ;;  %v4082_v23 = vld [vmem:[#allocation7 + $0x128] ss:$16 sps:$4 sm:$0xff]   ;;  %s4475_s16 = sshll.u32 %s4559_s19, 4  ;;  %s4476_s16 = int_to_ptr.vmem [resolvable:$false] %s4475_s16 }
  0xbf   : > { %1723 = vmatprep.subr.bf16.mxu0 %v4027_v28  ;;  %740 = vmatpush1.bf16.msra.mxu1 %v4024_v41  ;;  %v4096_v28 = vld [vmem:[#allocation7 + $0x16c] ss:$16 sps:$4 sm:$0xff]   ;;  %v4106_v33 = vld [vmem:[#allocation7 + $0x1a8] ss:$16 sps:$4 sm:$0xff]   ;;  %p4474_p7 = pneg %p4473_p5  ;;  %s4477_s10 = scalar_lea.vmem %s4476_s16, 4096 }
  0xc0   : > { %1949 = vmatprep.subr.bf16.mxu1 %v4030_v42  ;;  %v4112_v37 = vld [vmem:[#allocation7 + $0x1c8] ss:$16 sps:$4 sm:$0xff]   ;;  %v4126_v42 = vld [vmem:[#allocation7 + $0x20c] ss:$16 sps:$4 sm:$0xff]   ;;  %p4478_p12 = scmp.lt.s32.totalorder %s5363_s7, %s4476_s16  ;;  %p4479_p1 = scmp.lt.s32.totalorder %s4477_s10, %s4471_s29 }
  0xc1   : > { %645 = vmatmul.mubr.bf16.vlgmr.msra.gmra.mrb[0].mxu0 %v3993_v26  ;;  %v4118_v41 = vld [vmem:[#allocation7 + $0x1e8] ss:$16 sps:$4 sm:$0xff]  }
  0xc2   : > { %654 = vmatprep.mubr.bf16.mxu0 %v4558_v0  ;;  %1724 = vmatpush1.bf16.msra.mxu0 %v4025_v30  ;;  %v4102_v30 = vld [vmem:[#allocation7 + $0x18c] ss:$16 sps:$4 sm:$0xff]   ;;  %p4480_p2 = por %p4479_p1, %p4478_p12 }
  0xc3   : > { %1725 = vmatprep.subr.bf16.mxu0 %v4033_v31  ;;  %758 = vmatmul.mubr.bf16.vlgmr.msra.gmra.mrb[0].mxu1 %v3993_v26  ;;  %v4021_v26 = vld [vmem:[%s4828_s17 + $0x38] sm:$0xff]  }
  0xc4   : > { %767 = vmatprep.mubr.bf16.mxu1 %v4558_v0  ;;  %1950 = vmatpush1.bf16.msra.mxu1 %v4028_v46  ;;  %v4100_v31 = vld [vmem:[#allocation7 + $0x188] ss:$16 sps:$4 sm:$0xff]   ;;  %v331_v46 = vld [vmem:[%s5415_s5] sm:$0xf]  ;;  %p4481_p13 = pnand %p4480_p2, %p4474_p7 }
  0xc5   : > { %1951 = vmatprep.subr.bf16.mxu1 %v4036_v47 }
  0xc6   : > { %1726 = vmatpush1.bf16.msra.mxu0 %v4031_v34  ;;  %v4111_v34 = vld [vmem:[#allocation7 + $0x1c4] ss:$16 sps:$4 sm:$0xff]  }
  0xc7   : > { %1727 = vmatprep.subr.bf16.mxu0 %v4039_v35  ;;  %v4114_v35 = vld [vmem:[#allocation7 + $0x1cc] ss:$16 sps:$4 sm:$0xff]  }
  0xc8   : > { %1952 = vmatpush1.bf16.msra.mxu1 %v4034_v50 }
  0xc9   : > { %655 = vmatmul.mubr.bf16.gmra.mrb[4].mxu0 %v3994_v36  ;;  %1953 = vmatprep.subr.bf16.mxu1 %v4042_v51 }
  0xca   : > { %664 = vmatprep.mubr.bf16.mxu0 %v4558_v0  ;;  %1728 = vmatpush1.bf16.msra.mxu0 %v4037_v39  ;;  %v4120_v39 = vld [vmem:[#allocation7 + $0x1ec] ss:$16 sps:$4 sm:$0xff]  }
  0xcb   : > { %1729 = vmatprep.subr.bf16.mxu0 %v4045_v40  ;;  %768 = vmatmul.mubr.bf16.gmra.mrb[4].mxu1 %v3994_v36  ;;  %v4109_v36 = vld [vmem:[#allocation7 + $0x1c0] ss:$16 sps:$4 sm:$0xff]  }
  0xcc   : > { %777 = vmatprep.mubr.bf16.mxu1 %v4558_v0  ;;  %1954 = vmatpush1.bf16.msra.mxu1 %v4040_v55  ;;  %v4115_v40 = vld [vmem:[#allocation7 + $0x1e0] ss:$16 sps:$4 sm:$0xff]  }
  0xcd   : > { %1955 = vmatprep.subr.bf16.mxu1 %v4048_v56 }
  0xce   : > { %1730 = vmatpush1.bf16.msra.mxu0 %v4043_v43  ;;  %v384_v43 = vlaneseq }
  0xcf   : > { %1731 = vmatprep.subr.bf16.mxu0 %v4051_v44 }
  0xd0   : > { %1956 = vmatpush1.bf16.msra.mxu1 %v4046_v59  ;;  %v4866_v44 = vshrl.u32 %v384_v43, 7 }
  0xd1   : > { %665 = vmatmul.mubr.bf16.gmra.mrb[8].mxu0 %v3995_v45  ;;  %1957 = vmatprep.subr.bf16.mxu1 %v4054_v60 }
  0xd2   : > { %674 = vmatprep.mubr.bf16.mxu0 %v4558_v0  ;;  %1732 = vmatpush1.bf16.msra.mxu0 %v4049_v48  ;;  %v4875_v47 = vsub.s32 1, %v4866_v44 }
  0xd3   : > { %1733 = vmatprep.subr.bf16.mxu0 %v4057_v49  ;;  %778 = vmatmul.mubr.bf16.gmra.mrb[8].mxu1 %v3995_v45  ;;  %v4869_v45 = vsub.s32 0, %v4866_v44 }
  0xd4   : > { %787 = vmatprep.mubr.bf16.mxu1 %v4558_v0  ;;  %1958 = vmatpush1.bf16.msra.mxu1 %v4052_v1  ;;  %v4881_v49 = vrot.slane %v331_v46, %v4875_v47 }
  0xd5   : > { %1959 = vmatprep.subr.bf16.mxu1 %v4060_v2  ;;  %v4878_v48 = vrot.slane %v331_v46, %v4869_v45  ;;  %v4121_v2 = vld [vmem:[#allocation7 + $0x200] ss:$16 sps:$4 sm:$0xff]  }
  0xd6   : > { %1734 = vmatpush1.bf16.msra.mxu0 %v4055_v52 }
  0xd7   : > { %1735 = vmatprep.subr.bf16.mxu0 %v4063_v53 }
  0xd8   : > { %1960 = vmatpush1.bf16.msra.mxu1 %v4058_v5 }
  0xd9   : > { %675 = vmatmul.mubr.bf16.gmra.mrb[12].mxu0 %v3996_v54  ;;  %1961 = vmatprep.subr.bf16.mxu1 %v4066_v6 }
  0xda   : > { %684 = vmatprep.mubr.bf16.mxu0 %v4558_v0  ;;  %1736 = vmatpush1.bf16.msra.mxu0 %v4061_v57 }
  0xdb   : > { %1737 = vmatprep.subr.bf16.mxu0 %v4069_v58  ;;  %788 = vmatmul.mubr.bf16.gmra.mrb[12].mxu1 %v3996_v54 }
  0xdc   : > { %797 = vmatprep.mubr.bf16.mxu1 %v4558_v0  ;;  %1962 = vmatpush1.bf16.msra.mxu1 %v4064_v10 }
  0xdd   : > { %1963 = vmatprep.subr.bf16.mxu1 %v4072_v11 }
  0xde   : > { %1738 = vmatpush1.bf16.msra.mxu0 %v4067_v61 }
  0xdf   : > { %1739 = vmatprep.subr.bf16.mxu0 %v4075_v62 }
  0xe0   : > { %1964 = vmatpush1.bf16.msra.mxu1 %v4070_v14 }
  0xe1   : > { %685 = vmatmul.mubr.bf16.gmra.mrb[16].mxu0 %v4000_v63  ;;  %1965 = vmatprep.subr.bf16.mxu1 %v4078_v15  ;;  %v4127_v15 = vld [vmem:[#allocation7 + $0x220] ss:$16 sps:$4 sm:$0xff]  }
  0xe2   : > { %694 = vmatprep.mubr.bf16.mxu0 %v4558_v0  ;;  %1740 = vmatpush1.bf16.msra.mxu0 %v4073_v3  ;;  %v4124_v3 = vld [vmem:[#allocation7 + $0x208] ss:$16 sps:$4 sm:$0xff]  }
  0xe3   : > { %1741 = vmatprep.subr.bf16.mxu0 %v4081_v4  ;;  %798 = vmatmul.mubr.bf16.gmra.mrb[16].mxu1 %v4000_v63  ;;  %v394_v4 = vsub.s32 2, %v4866_v44 }
  0xe4   : > { %807 = vmatprep.mubr.bf16.mxu1 %v4558_v0  ;;  %1966 = vmatpush1.bf16.msra.mxu1 %v4076_v19 }
  0xe5   : > { %1967 = vmatprep.subr.bf16.mxu1 %v4084_v20  ;;  %v4135_v20 = vld [vmem:[#allocation7 + $0x244] ss:$16 sps:$4 sm:$0xff]  }
  0xe6   : > { %1742 = vmatpush1.bf16.msra.mxu0 %v4079_v7  ;;  %v4129_v7 = vld [vmem:[#allocation7 + $0x224] ss:$16 sps:$4 sm:$0xff]  }
  0xe7   : > { %1743 = vmatprep.subr.bf16.mxu0 %v4087_v8  ;;  %v4132_v8 = vld [vmem:[#allocation7 + $0x22c] ss:$16 sps:$4 sm:$0xff]  }
  0xe8   : > { %1968 = vmatpush1.bf16.msra.mxu1 %v4082_v23 }
  0xe9   : > { %695 = vmatmul.mubr.bf16.gmra.mrb[20].mxu0 %v4007_v9  ;;  %1969 = vmatprep.subr.bf16.mxu1 %v4090_v24 }
  0xea   : > { %704 = vmatprep.mubr.bf16.mxu0 %v4558_v0  ;;  %1744 = vmatpush1.bf16.msra.mxu0 %v4085_v12 }
  0xeb   : > { %1745 = vmatprep.subr.bf16.mxu0 %v4093_v13  ;;  %808 = vmatmul.mubr.bf16.gmra.mrb[20].mxu1 %v4007_v9  ;;  %v398_v9 = vsub.s32 3, %v4866_v44 }
  0xec   : > { %817 = vmatprep.mubr.bf16.mxu1 %v4558_v0  ;;  %1970 = vmatpush1.bf16.msra.mxu1 %v4088_v27 }
  0xed   : > { %1971 = vmatprep.subr.bf16.mxu1 %v4096_v28 }
  0xee   : > { %1746 = vmatpush1.bf16.msra.mxu0 %v4091_v16  ;;  %v4130_v16 = vld [vmem:[#allocation7 + $0x228] ss:$16 sps:$4 sm:$0xff]  }
  0xef   : > { %1747 = vmatprep.subr.bf16.mxu0 %v4099_v17  ;;  %v4895_v17 = vrot.slane %v331_v46, %v394_v4 }
  0xf0   : > { %1972 = vmatpush1.bf16.msra.mxu1 %v4094_v29  ;;  %v4133_v29 = vld [vmem:[#allocation7 + $0x240] ss:$16 sps:$4 sm:$0xff]  }
  0xf1   : > { %705 = vmatmul.mubr.bf16.gmra.mrb[24].mxu0 %v4014_v18  ;;  %1973 = vmatprep.subr.bf16.mxu1 %v4102_v30  ;;  %v4136_v30 = vld [vmem:[#allocation7 + $0x248] ss:$16 sps:$4 sm:$0xff]  }
  0xf2   : > { %714 = vmatprep.mubr.bf16.mxu0 %v4558_v0  ;;  %1748 = vmatpush1.bf16.msra.mxu0 %v4097_v21  ;;  %v4138_v21 = vld [vmem:[#allocation7 + $0x24c] ss:$16 sps:$4 sm:$0xff]  }
  0xf3   : > { %1749 = vmatprep.subr.bf16.mxu0 %v4105_v22  ;;  %818 = vmatmul.mubr.bf16.gmra.mrb[24].mxu1 %v4014_v18  ;;  %v4899_v22 = vrot.slane %v331_v46, %v398_v9 }
  0xf4   : > { %827 = vmatprep.mubr.bf16.mxu1 %v4558_v0  ;;  %1974 = vmatpush1.bf16.msra.mxu1 %v4100_v31  ;;  %v4123_v0 = vld [vmem:[#allocation7 + $0x204] ss:$16 sps:$4 sm:$0xff]  }
  0xf5   : > { %1975 = vmatprep.subr.bf16.mxu1 %v4108_v32 }
  0xf6   : > { %1750 = vmatpush1.bf16.msra.mxu0 %v4103_v25 }
  0xf7   : > { %1751 = vmatprep.subr.bf16.mxu0 %v4111_v34 }
  0xf8   : > { %1976 = vmatpush1.bf16.msra.mxu1 %v4106_v33 }
  0xf9   : > { %715 = vmatmul.mubr.bf16.gmra.mrb[28].mxu0 %v4021_v26  ;;  %1977 = vmatprep.subr.bf16.mxu1 %v4114_v35  ;;  %v4141_v35 = vld [vmem:[#allocation7 + $0x264] ss:$16 sps:$4 sm:$0xff]  }
  0xfa   : > { %1752 = vmatpush1.bf16.msra.mxu0 %v4109_v36  ;;  %v4144_v36 = vld [vmem:[#allocation7 + $0x26c] ss:$16 sps:$4 sm:$0xff]  }
  0xfb   : > { %828 = vmatmul.mubr.bf16.gmra.mrb[28].mxu1 %v4021_v26  ;;  %1753 = vmatprep.subr.bf16.mxu0 %v4117_v38 }
  0xfc   : > { %1978 = vmatpush1.bf16.msra.mxu1 %v4112_v37 }
  0xfd   : > { %1979 = vmatprep.subr.bf16.mxu1 %v4120_v39 }
  0xfe   : > { %1754 = vmatpush1.bf16.msra.mxu0 %v4115_v40 }
  0xff   : > { %1836 = vmatprep.subr.bf16.mxu0 %v4123_v0 }
 0x100   : > { %1980 = vmatpush1.bf16.msra.mxu1 %v4118_v41 }
 0x101   : > { %2062 = vmatprep.subr.bf16.mxu1 %v4126_v42 }
 0x194   : > { %v646_v50 = vpop.f32.mrb[0].mxu0 }
 0x195   : > { %v647_v51 = vadd.f32 %v646_v50, %v4878_v48  ;;  %v648_v52 = vpop.f32.mrb[1].mxu0  ;;  %v4139_v50 = vld [vmem:[#allocation7 + $0x260] ss:$16 sps:$4 sm:$0xff]  }
 0x196   : > { %v649_v53 = vadd.f32 %v648_v52, %v4881_v49  ;;  %v650_v54 = vpop.f32.mrb[2].mxu0  ;;  %v759_v26 = vpop.f32.mrb[0].mxu1 }
 0x197   : > { %v651_v55 = vadd.f32 %v650_v54, %v4878_v48  ;;  %v652_v56 = vpop.f32.mrb[3].mxu0  ;;  %v838_v58 = vmax.f32 %v647_v51, 0.0  ;;  %v760_v31 = vadd.f32 %v759_v26, %v4895_v17  ;;  %v761_v32 = vpop.f32.mrb[1].mxu1  ;;  %v4142_v54 = vld [vmem:[#allocation7 + $0x268] ss:$16 sps:$4 sm:$0xff]  }
 0x198   : > { %v653_v57 = vadd.f32 %v652_v56, %v4881_v49  ;;  %v839_v60 = vmax.f32 %v649_v53, 0.0  ;;  %v762_v37 = vadd.f32 %v761_v32, %v4899_v22  ;;  %v763_v38 = vpop.f32.mrb[2].mxu1  ;;  %v4159_v32 = vld [vmem:[#allocation7 + $0x2c4] ss:$16 sps:$4 sm:$0xff]  }
 0x199   : > { %v842_v59 = vmax.f32 %v651_v55, 0.0  ;;  %v840_v41 = vmax.f32 %v760_v31, 0.0  ;;  %v764_v0 = vadd.f32 %v763_v38, %v4895_v17  ;;  %v765_v42 = vpop.f32.mrb[3].mxu1  ;;  %v4147_v55 = vld [vmem:[#allocation7 + $0x284] ss:$16 sps:$4 sm:$0xff]  }
 0x19a   : > { %v843_v61 = vmax.f32 %v653_v57, 0.0  ;;  %v841_v51 = vmax.f32 %v762_v37, 0.0  ;;  %v766_v52 = vadd.f32 %v765_v42, %v4899_v22  ;;  %v4154_v31 = vld [vmem:[#allocation7 + $0x2a8] ss:$16 sps:$4 sm:$0xff]  }
 0x19b   : > { %v902_v62 = vpack.c.bf16 %v842_v59, %v838_v58  ;;  %v844_v56 = vmax.f32 %v764_v0, 0.0  ;;  %v4150_v59 = vld [vmem:[#allocation7 + $0x28c] ss:$16 sps:$4 sm:$0xff]  }
 0x19c   : > { %v903_v63 = vpack.c.bf16 %v843_v61, %v839_v60  ;;  %v656_v1 = vpop.f32.mrb[4].mxu0  ;;  %v845_v60 = vmax.f32 %v766_v52, 0.0 }
 0x19d   : > { %v657_v5 = vadd.f32 %v656_v1, %v4878_v48  ;;  %v658_v6 = vpop.f32.mrb[5].mxu0 }
 0x19e   : > { %v659_v10 = vadd.f32 %v658_v6, %v4881_v49  ;;  %v660_v11 = vpop.f32.mrb[6].mxu0  ;;  %1755 = vmatprep.mubr.bf16.mxu0 %v903_v63  ;;  %1981 = vmatprep.mubr.bf16.mxu1 %v903_v63  ;;  %v4909_v63 = vpack.c.bf16 %v844_v56, %v840_v41  ;;  %v4165_v56 = vld [vmem:[#allocation7 + $0x2e4] ss:$16 sps:$4 sm:$0xff]  }
 0x19f   : > { %v661_v12 = vadd.f32 %v660_v11, %v4878_v48  ;;  %v662_v13 = vpop.f32.mrb[7].mxu0  ;;  %1756 = vmatmul.mubr.bf16.vlgmr.msra.gmra.mrb[32].mxu0 %v902_v62  ;;  %1982 = vmatmul.mubr.bf16.vlgmr.msra.gmra.mrb[32].mxu1 %v902_v62  ;;  %v846_v18 = vmax.f32 %v657_v5, 0.0 }
 0x1a0   : > { %v663_v14 = vadd.f32 %v662_v13, %v4881_v49  ;;  %1837 = vmatpush1.bf16.msra.mxu0 %v4121_v2  ;;  %2063 = vmatpush1.bf16.msra.mxu1 %v4124_v3  ;;  %v847_v23 = vmax.f32 %v659_v10, 0.0  ;;  %v4911_v2 = vpack.c.bf16 %v845_v60, %v841_v51  ;;  %v769_v3 = vpop.f32.mrb[4].mxu1  ;;  %v4160_v51 = vld [vmem:[#allocation7 + $0x2c8] ss:$16 sps:$4 sm:$0xff]  }
 0x1a1   : > { %v850_v19 = vmax.f32 %v661_v12, 0.0  ;;  %1838 = vmatprep.subr.bf16.mxu0 %v4129_v7  ;;  %2064 = vmatprep.subr.bf16.mxu1 %v4132_v8  ;;  %v4145_v7 = vld [vmem:[#allocation7 + $0x280] ss:$16 sps:$4 sm:$0xff]   ;;  %v4148_v8 = vld [vmem:[#allocation7 + $0x288] ss:$16 sps:$4 sm:$0xff]   ;;  %v770_v10 = vadd.f32 %v769_v3, %v4895_v17  ;;  %v771_v11 = vpop.f32.mrb[5].mxu1 }
 0x1a2   : > { %v851_v24 = vmax.f32 %v663_v14, 0.0  ;;  %v4153_v14 = vld [vmem:[#allocation7 + $0x2a4] ss:$16 sps:$4 sm:$0xff]  }
 0x1a3   : > { %v906_v25 = vpack.c.bf16 %v850_v19, %v846_v18  ;;  %v773_v18 = vpop.f32.mrb[6].mxu1 }
 0x1a4   : > { %v907_v27 = vpack.c.bf16 %v851_v24, %v847_v23  ;;  %1839 = vmatpush1.bf16.msra.mxu0 %v4127_v15  ;;  %v666_v28 = vpop.f32.mrb[8].mxu0  ;;  %2065 = vmatpush1.bf16.msra.mxu1 %v4130_v16  ;;  %v4156_v15 = vld [vmem:[#allocation7 + $0x2ac] ss:$16 sps:$4 sm:$0xff]   ;;  %v772_v16 = vadd.f32 %v771_v11, %v4899_v22  ;;  %v774_v23 = vadd.f32 %v773_v18, %v4895_v17  ;;  %v775_v24 = vpop.f32.mrb[7].mxu1 }
 0x1a5   : > { %v667_v33 = vadd.f32 %v666_v28, %v4878_v48  ;;  %v668_v34 = vpop.f32.mrb[9].mxu0  ;;  %1840 = vmatprep.subr.bf16.mxu0 %v4135_v20  ;;  %2066 = vmatprep.subr.bf16.mxu1 %v4138_v21  ;;  %v848_v21 = vmax.f32 %v770_v10, 0.0  ;;  %v4174_v18 = vld [vmem:[#allocation7 + $0x30c] ss:$16 sps:$4 sm:$0xff]  }
 0x1a6   : > { %v669_v39 = vadd.f32 %v668_v34, %v4881_v49  ;;  %v670_v40 = vpop.f32.mrb[10].mxu0  ;;  %1765 = vmatprep.mubr.bf16.mxu0 %v907_v27  ;;  %1991 = vmatprep.mubr.bf16.mxu1 %v907_v27  ;;  %v4151_v27 = vld [vmem:[#allocation7 + $0x2a0] ss:$16 sps:$4 sm:$0xff]   ;;  %v849_v28 = vmax.f32 %v772_v16, 0.0  ;;  %v779_v42 = vpop.f32.mrb[8].mxu1 }
 0x1a7   : > { %v671_v43 = vadd.f32 %v670_v40, %v4878_v48  ;;  %v672_v46 = vpop.f32.mrb[11].mxu0  ;;  %1766 = vmatmul.mubr.bf16.gmra.mrb[36].mxu0 %v906_v25  ;;  %1992 = vmatmul.mubr.bf16.gmra.mrb[36].mxu1 %v906_v25  ;;  %v854_v57 = vmax.f32 %v667_v33, 0.0  ;;  %v852_v33 = vmax.f32 %v774_v23, 0.0  ;;  %v780_v52 = vadd.f32 %v779_v42, %v4895_v17 }
 0x1a8   : > { %v673_v53 = vadd.f32 %v672_v46, %v4881_v49  ;;  %1841 = vmatpush1.bf16.msra.mxu0 %v4133_v29  ;;  %2067 = vmatpush1.bf16.msra.mxu1 %v4136_v30  ;;  %v855_v61 = vmax.f32 %v669_v39, 0.0  ;;  %v776_v29 = vadd.f32 %v775_v24, %v4899_v22 }
 0x1a9   : > { %v858_v58 = vmax.f32 %v671_v43, 0.0  ;;  %1842 = vmatprep.subr.bf16.mxu0 %v4141_v35  ;;  %2068 = vmatprep.subr.bf16.mxu1 %v4144_v36  ;;  %v4162_v36 = vld [vmem:[#allocation7 + $0x2cc] ss:$16 sps:$4 sm:$0xff]   ;;  %v4921_v40 = vpack.c.bf16 %v852_v33, %v848_v21 }
 0x1aa   : > { %v859_v62 = vmax.f32 %v673_v53, 0.0  ;;  %v853_v37 = vmax.f32 %v776_v29, 0.0  ;;  %v781_v53 = vpop.f32.mrb[9].mxu1  ;;  %v4169_v29 = vld [vmem:[#allocation7 + $0x300] ss:$16 sps:$4 sm:$0xff]  }
 0x1ab   : > { %v910_v1 = vpack.c.bf16 %v858_v58, %v854_v57  ;;  %v4168_v57 = vld [vmem:[#allocation7 + $0x2ec] ss:$16 sps:$4 sm:$0xff]   ;;  %v782_v58 = vadd.f32 %v781_v53, %v4899_v22 }
 0x1ac   : > { %v911_v5 = vpack.c.bf16 %v859_v62, %v855_v61  ;;  %1843 = vmatpush1.bf16.msra.mxu0 %v4139_v50  ;;  %v676_v6 = vpop.f32.mrb[12].mxu0  ;;  %2069 = vmatpush1.bf16.msra.mxu1 %v4142_v54  ;;  %v4923_v0 = vpack.c.bf16 %v853_v37, %v849_v28  ;;  %v4157_v50 = vld [vmem:[#allocation7 + $0x2c0] ss:$16 sps:$4 sm:$0xff]   ;;  %v856_v62 = vmax.f32 %v780_v52, 0.0 }
 0x1ad   : > { %v677_v12 = vadd.f32 %v676_v6, %v4878_v48  ;;  %v678_v13 = vpop.f32.mrb[13].mxu0  ;;  %1844 = vmatprep.subr.bf16.mxu0 %v4147_v55  ;;  %2070 = vmatprep.subr.bf16.mxu1 %v4150_v59  ;;  %v783_v59 = vpop.f32.mrb[10].mxu1  ;;  %v4175_v52 = vld [vmem:[#allocation7 + $0x320] ss:$16 sps:$4 sm:$0xff]  }
 0x1ae   : > { %v679_v19 = vadd.f32 %v678_v13, %v4881_v49  ;;  %v680_v20 = vpop.f32.mrb[14].mxu0  ;;  %1775 = vmatprep.mubr.bf16.mxu0 %v911_v5  ;;  %2001 = vmatprep.mubr.bf16.mxu1 %v911_v5  ;;  %v785_v3 = vpop.f32.mrb[11].mxu1  ;;  %v4171_v13 = vld [vmem:[#allocation7 + $0x304] ss:$16 sps:$4 sm:$0xff]  }
 0x1af   : > { %v681_v25 = vadd.f32 %v680_v20, %v4878_v48  ;;  %v682_v26 = vpop.f32.mrb[15].mxu0  ;;  %1776 = vmatmul.mubr.bf16.gmra.mrb[40].mxu0 %v910_v1  ;;  %2002 = vmatmul.mubr.bf16.gmra.mrb[40].mxu1 %v910_v1  ;;  %v862_v34 = vmax.f32 %v677_v12, 0.0  ;;  %v784_v1 = vadd.f32 %v783_v59, %v4895_v17  ;;  %v786_v10 = vadd.f32 %v785_v3, %v4899_v22  ;;  %v4166_v12 = vld [vmem:[#allocation7 + $0x2e8] ss:$16 sps:$4 sm:$0xff]  }
 0x1b0   : > { %v683_v30 = vadd.f32 %v682_v26, %v4881_v49  ;;  %1845 = vmatpush1.bf16.msra.mxu0 %v4145_v7  ;;  %2071 = vmatpush1.bf16.msra.mxu1 %v4148_v8  ;;  %v863_v38 = vmax.f32 %v679_v19, 0.0  ;;  %v4163_v7 = vld [vmem:[#allocation7 + $0x2e0] ss:$16 sps:$4 sm:$0xff]   ;;  %v857_v8 = vmax.f32 %v782_v58, 0.0  ;;  %v789_v26 = vpop.f32.mrb[12].mxu1 }
 0x1b1   : > { %v866_v35 = vmax.f32 %v681_v25, 0.0  ;;  %1846 = vmatprep.subr.bf16.mxu0 %v4153_v14  ;;  %2072 = vmatprep.subr.bf16.mxu1 %v4156_v15  ;;  %v860_v14 = vmax.f32 %v784_v1, 0.0  ;;  %v861_v19 = vmax.f32 %v786_v10, 0.0 }
 0x1b2   : > { %v867_v39 = vmax.f32 %v683_v30, 0.0  ;;  %v4172_v30 = vld [vmem:[#allocation7 + $0x308] ss:$16 sps:$4 sm:$0xff]  }
 0x1b3   : > { %v914_v41 = vpack.c.bf16 %v866_v35, %v862_v34  ;;  %v4933_v23 = vpack.c.bf16 %v860_v14, %v856_v62  ;;  %v4935_v25 = vpack.c.bf16 %v861_v19, %v857_v8  ;;  %v4177_v35 = vld [vmem:[#allocation7 + $0x324] ss:$16 sps:$4 sm:$0xff]  }
 0x1b4   : > { %v915_v43 = vpack.c.bf16 %v867_v39, %v863_v38  ;;  %1847 = vmatpush1.bf16.msra.mxu0 %v4151_v27  ;;  %v686_v46 = vpop.f32.mrb[16].mxu0  ;;  %2073 = vmatpush1.bf16.msra.mxu1 %v4154_v31  ;;  %v790_v31 = vadd.f32 %v789_v26, %v4895_v17  ;;  %v4189_v19 = vld [vmem:[#allocation7 + $0x364] ss:$16 sps:$4 sm:$0xff]  }
 0x1b5   : > { %v687_v54 = vadd.f32 %v686_v46, %v4878_v48  ;;  %v688_v55 = vpop.f32.mrb[17].mxu0  ;;  %1848 = vmatprep.subr.bf16.mxu0 %v4159_v32  ;;  %2074 = vmatprep.subr.bf16.mxu1 %v4162_v36  ;;  %v791_v32 = vpop.f32.mrb[13].mxu1  ;;  %v4180_v36 = vld [vmem:[#allocation7 + $0x32c] ss:$16 sps:$4 sm:$0xff]  }
 0x1b6   : > { %v689_v60 = vadd.f32 %v688_v55, %v4881_v49  ;;  %v690_v61 = vpop.f32.mrb[18].mxu0  ;;  %1785 = vmatprep.mubr.bf16.mxu0 %v915_v43  ;;  %2011 = vmatprep.mubr.bf16.mxu1 %v915_v43  ;;  %v792_v37 = vadd.f32 %v791_v32, %v4899_v22  ;;  %v793_v38 = vpop.f32.mrb[14].mxu1  ;;  %v864_v42 = vmax.f32 %v790_v31, 0.0 }
 0x1b7   : > { %v691_v5 = vadd.f32 %v690_v61, %v4878_v48  ;;  %v692_v6 = vpop.f32.mrb[19].mxu0  ;;  %1786 = vmatmul.mubr.bf16.gmra.mrb[44].mxu0 %v914_v41  ;;  %2012 = vmatmul.mubr.bf16.gmra.mrb[44].mxu1 %v914_v41  ;;  %v870_v15 = vmax.f32 %v687_v54, 0.0  ;;  %v794_v43 = vadd.f32 %v793_v38, %v4895_v17  ;;  %v795_v46 = vpop.f32.mrb[15].mxu1  ;;  %v4186_v61 = vld [vmem:[#allocation7 + $0x34c] ss:$16 sps:$4 sm:$0xff]  }
 0x1b8   : > { %v693_v11 = vadd.f32 %v692_v6, %v4881_v49  ;;  %1849 = vmatpush1.bf16.msra.mxu0 %v4157_v50  ;;  %2075 = vmatpush1.bf16.msra.mxu1 %v4160_v51  ;;  %v871_v20 = vmax.f32 %v689_v60, 0.0  ;;  %v865_v53 = vmax.f32 %v792_v37, 0.0  ;;  %v796_v54 = vadd.f32 %v795_v46, %v4899_v22  ;;  %v799_v8 = vpop.f32.mrb[16].mxu1  ;;  %v4190_v37 = vld [vmem:[#allocation7 + $0x368] ss:$16 sps:$4 sm:$0xff]  }
 0x1b9   : > { %v874_v16 = vmax.f32 %v691_v5, 0.0  ;;  %1850 = vmatprep.subr.bf16.mxu0 %v4165_v56  ;;  %2076 = vmatprep.subr.bf16.mxu1 %v4168_v57  ;;  %v4178_v56 = vld [vmem:[#allocation7 + $0x328] ss:$16 sps:$4 sm:$0xff]   ;;  %v4183_v57 = vld [vmem:[#allocation7 + $0x344] ss:$16 sps:$4 sm:$0xff]   ;;  %v868_v58 = vmax.f32 %v794_v43, 0.0  ;;  %v800_v14 = vadd.f32 %v799_v8, %v4895_v17 }
 0x1ba   : > { %v875_v21 = vmax.f32 %v693_v11, 0.0  ;;  %v869_v62 = vmax.f32 %v796_v54, 0.0  ;;  %v4195_v38 = vld [vmem:[#allocation7 + $0x384] ss:$16 sps:$4 sm:$0xff]   ;;  %v4198_v43 = vld [vmem:[#allocation7 + $0x38c] ss:$16 sps:$4 sm:$0xff]  }
 0x1bb   : > { %v918_v24 = vpack.c.bf16 %v874_v16, %v870_v15  ;;  %v4945_v5 = vpack.c.bf16 %v868_v58, %v864_v42  ;;  %v801_v15 = vpop.f32.mrb[17].mxu1  ;;  %v4193_v58 = vld [vmem:[#allocation7 + $0x380] ss:$16 sps:$4 sm:$0xff]  }
 0x1bc   : > { %v919_v27 = vpack.c.bf16 %v875_v21, %v871_v20  ;;  %1851 = vmatpush1.bf16.msra.mxu0 %v4163_v7  ;;  %v696_v28 = vpop.f32.mrb[20].mxu0  ;;  %2077 = vmatpush1.bf16.msra.mxu1 %v4166_v12  ;;  %v4947_v7 = vpack.c.bf16 %v869_v62, %v865_v53  ;;  %v4181_v12 = vld [vmem:[#allocation7 + $0x340] ss:$16 sps:$4 sm:$0xff]   ;;  %v4192_v20 = vld [vmem:[#allocation7 + $0x36c] ss:$16 sps:$4 sm:$0xff]   ;;  %v802_v21 = vadd.f32 %v801_v15, %v4899_v22 }
 0x1bd   : > { %v697_v33 = vadd.f32 %v696_v28, %v4878_v48  ;;  %v698_v34 = vpop.f32.mrb[21].mxu0  ;;  %1852 = vmatprep.subr.bf16.mxu0 %v4171_v13  ;;  %2078 = vmatprep.subr.bf16.mxu1 %v4174_v18  ;;  %v4184_v13 = vld [vmem:[#allocation7 + $0x348] ss:$16 sps:$4 sm:$0xff]   ;;  %v872_v28 = vmax.f32 %v800_v14, 0.0 }
 0x1be   : > { %v699_v39 = vadd.f32 %v698_v34, %v4881_v49  ;;  %v700_v41 = vpop.f32.mrb[22].mxu0  ;;  %1795 = vmatprep.mubr.bf16.mxu0 %v919_v27  ;;  %2021 = vmatprep.mubr.bf16.mxu1 %v919_v27  ;;  %v873_v34 = vmax.f32 %v802_v21, 0.0 }
 0x1bf   : > { %v701_v50 = vadd.f32 %v700_v41, %v4878_v48  ;;  %v702_v51 = vpop.f32.mrb[23].mxu0  ;;  %1796 = vmatmul.mubr.bf16.gmra.mrb[48].mxu0 %v918_v24  ;;  %2022 = vmatmul.mubr.bf16.gmra.mrb[48].mxu1 %v918_v24  ;;  %v878_v59 = vmax.f32 %v697_v33, 0.0  ;;  %v803_v24 = vpop.f32.mrb[18].mxu1  ;;  %v4187_v33 = vld [vmem:[#allocation7 + $0x360] ss:$16 sps:$4 sm:$0xff]  }
 0x1c0   : > { %v703_v55 = vadd.f32 %v702_v51, %v4881_v49  ;;  %1853 = vmatpush1.bf16.msra.mxu0 %v4169_v29  ;;  %2079 = vmatpush1.bf16.msra.mxu1 %v4172_v30  ;;  %v879_v1 = vmax.f32 %v699_v39, 0.0  ;;  %v804_v29 = vadd.f32 %v803_v24, %v4895_v17  ;;  %v805_v30 = vpop.f32.mrb[19].mxu1 }
 0x1c1   : > { %v882_v60 = vmax.f32 %v701_v50, 0.0  ;;  %1854 = vmatprep.subr.bf16.mxu0 %v4177_v35  ;;  %2080 = vmatprep.subr.bf16.mxu1 %v4180_v36  ;;  %v806_v35 = vadd.f32 %v805_v30, %v4899_v22 }
 0x1c2   : > { %v883_v3 = vmax.f32 %v703_v55, 0.0  ;;  %v876_v39 = vmax.f32 %v804_v29, 0.0  ;;  %v809_v55 = vpop.f32.mrb[20].mxu1 }
 0x1c3   : > { %v922_v6 = vpack.c.bf16 %v882_v60, %v878_v59  ;;  %v877_v46 = vmax.f32 %v806_v35, 0.0  ;;  %v4196_v59 = vld [vmem:[#allocation7 + $0x388] ss:$16 sps:$4 sm:$0xff]   ;;  %v810_v60 = vadd.f32 %v809_v55, %v4895_v17 }
 0x1c4   : > { %v923_v10 = vpack.c.bf16 %v883_v3, %v879_v1  ;;  %1855 = vmatpush1.bf16.msra.mxu0 %v4175_v52  ;;  %v706_v11 = vpop.f32.mrb[24].mxu0  ;;  %2081 = vmatpush1.bf16.msra.mxu1 %v4178_v56  ;;  %v4957_v52 = vpack.c.bf16 %v876_v39, %v872_v28  ;;  %v4201_v3 = vld [vmem:[#allocation7 + $0x3a4] ss:$16 sps:$4 sm:$0xff]   ;;  %v4208_v39 = vld [vmem:[#allocation7 + $0x3c8] ss:$16 sps:$4 sm:$0xff]  }
 0x1c5   : > { %v707_v16 = vadd.f32 %v706_v11, %v4878_v48  ;;  %v708_v18 = vpop.f32.mrb[25].mxu0  ;;  %1856 = vmatprep.subr.bf16.mxu0 %v4183_v57  ;;  %2082 = vmatprep.subr.bf16.mxu1 %v4186_v61  ;;  %v4959_v54 = vpack.c.bf16 %v877_v46, %v873_v34  ;;  %v811_v61 = vpop.f32.mrb[21].mxu1 }
 0x1c6   : > { %v709_v26 = vadd.f32 %v708_v18, %v4881_v49  ;;  %v710_v27 = vpop.f32.mrb[26].mxu0  ;;  %1805 = vmatprep.mubr.bf16.mxu0 %v923_v10  ;;  %2031 = vmatprep.mubr.bf16.mxu1 %v923_v10  ;;  %v812_v8 = vadd.f32 %v811_v61, %v4899_v22  ;;  %v813_v10 = vpop.f32.mrb[22].mxu1 }
 0x1c7   : > { %v711_v31 = vadd.f32 %v710_v27, %v4878_v48  ;;  %v712_v32 = vpop.f32.mrb[27].mxu0  ;;  %1806 = vmatmul.mubr.bf16.gmra.mrb[52].mxu0 %v922_v6  ;;  %2032 = vmatmul.mubr.bf16.gmra.mrb[52].mxu1 %v922_v6  ;;  %v886_v41 = vmax.f32 %v707_v16, 0.0  ;;  %v4204_v6 = vld [vmem:[#allocation7 + $0x3ac] ss:$16 sps:$4 sm:$0xff]   ;;  %v814_v14 = vadd.f32 %v813_v10, %v4895_v17  ;;  %v815_v15 = vpop.f32.mrb[23].mxu1 }
 0x1c8   : > { %v713_v36 = vadd.f32 %v712_v32, %v4881_v49  ;;  %1857 = vmatpush1.bf16.msra.mxu0 %v4181_v12  ;;  %2083 = vmatpush1.bf16.msra.mxu1 %v4184_v13  ;;  %v887_v50 = vmax.f32 %v709_v26, 0.0  ;;  %v880_v13 = vmax.f32 %v810_v60, 0.0  ;;  %v816_v21 = vadd.f32 %v815_v15, %v4899_v22  ;;  %v4202_v26 = vld [vmem:[#allocation7 + $0x3a8] ss:$16 sps:$4 sm:$0xff]   ;;  %v4207_v27 = vld [vmem:[#allocation7 + $0x3c4] ss:$16 sps:$4 sm:$0xff]  }
 0x1c9   : > { %v890_v42 = vmax.f32 %v711_v31, 0.0  ;;  %1858 = vmatprep.subr.bf16.mxu0 %v4189_v19  ;;  %2084 = vmatprep.subr.bf16.mxu1 %v4192_v20  ;;  %v4199_v19 = vld [vmem:[#allocation7 + $0x3a0] ss:$16 sps:$4 sm:$0xff]   ;;  %v881_v20 = vmax.f32 %v812_v8, 0.0  ;;  %v884_v28 = vmax.f32 %v814_v14, 0.0 }
 0x1ca   : > { %v891_v51 = vmax.f32 %v713_v36, 0.0  ;;  %v4210_v31 = vld [vmem:[#allocation7 + $0x3cc] ss:$16 sps:$4 sm:$0xff]   ;;  %v4214_v60 = vld [vmem:[#allocation7 + $0x3e8] ss:$16 sps:$4 sm:$0xff]  }
 0x1cb   : > { %v926_v53 = vpack.c.bf16 %v890_v42, %v886_v41  ;;  %v4969_v34 = vpack.c.bf16 %v884_v28, %v880_v13  ;;  %v4217_v15 = vld [vmem:[#allocation8] ss:$8 sps:$4 sm:$0xff]  }
 0x1cc   : > { %v927_v56 = vpack.c.bf16 %v891_v51, %v887_v50  ;;  %1859 = vmatpush1.bf16.msra.mxu0 %v4187_v33  ;;  %v716_v57 = vpop.f32.mrb[28].mxu0  ;;  %2085 = vmatpush1.bf16.msra.mxu1 %v4190_v37  ;;  %v819_v37 = vpop.f32.mrb[24].mxu1  ;;  %v4216_v51 = vld [vmem:[#allocation7 + $0x3ec] ss:$16 sps:$4 sm:$0xff]  }
 0x1cd   : > { %v717_v62 = vadd.f32 %v716_v57, %v4878_v48  ;;  %v718_v1 = vpop.f32.mrb[29].mxu0  ;;  %1860 = vmatprep.subr.bf16.mxu0 %v4195_v38  ;;  %2086 = vmatprep.subr.bf16.mxu1 %v4198_v43  ;;  %v4205_v38 = vld [vmem:[#allocation7 + $0x3c0] ss:$16 sps:$4 sm:$0xff]   ;;  %v820_v41 = vadd.f32 %v819_v37, %v4895_v17  ;;  %v821_v42 = vpop.f32.mrb[25].mxu1  ;;  %v4213_v43 = vld [vmem:[#allocation7 + $0x3e4] ss:$16 sps:$4 sm:$0xff]  }
 0x1ce   : > { %v719_v11 = vadd.f32 %v718_v1, %v4881_v49  ;;  %v720_v12 = vpop.f32.mrb[30].mxu0  ;;  %1815 = vmatprep.mubr.bf16.mxu0 %v927_v56  ;;  %2041 = vmatprep.mubr.bf16.mxu1 %v927_v56  ;;  %v822_v46 = vadd.f32 %v821_v42, %v4899_v22  ;;  %v823_v50 = vpop.f32.mrb[26].mxu1  ;;  %v4219_v1 = vld [vmem:[#allocation8 + $0x4] ss:$8 sps:$4 sm:$0xff]   ;;  %v5019_v37 = vld [vmem:[#allocation8 + $0x130] ss:$8 sps:$4 sm:$0xff]  }
 0x1cf   : > { %v721_v16 = vadd.f32 %v720_v12, %v4878_v48  ;;  %v722_v18 = vpop.f32.mrb[31].mxu0  ;;  %1816 = vmatmul.mubr.bf16.gmra.mrb[56].mxu0 %v926_v53  ;;  %2042 = vmatmul.mubr.bf16.gmra.mrb[56].mxu1 %v926_v53  ;;  %v894_v29 = vmax.f32 %v717_v62, 0.0  ;;  %v885_v48 = vmax.f32 %v816_v21, 0.0  ;;  %v888_v53 = vmax.f32 %v820_v41, 0.0  ;;  %v825_v56 = vpop.f32.mrb[27].mxu1 }
 0x1d0   : > { %v723_v24 = vadd.f32 %v722_v18, %v4881_v49  ;;  %1861 = vmatpush1.bf16.msra.mxu0 %v4193_v58  ;;  %2087 = vmatpush1.bf16.msra.mxu1 %v4196_v59  ;;  %v895_v32 = vmax.f32 %v719_v11, 0.0  ;;  %v824_v55 = vadd.f32 %v823_v50, %v4895_v17  ;;  %v889_v57 = vmax.f32 %v822_v46, 0.0  ;;  %v4211_v59 = vld [vmem:[#allocation7 + $0x3e0] ss:$16 sps:$4 sm:$0xff]   ;;  %v829_v10 = vpop.f32.mrb[28].mxu1 }
 0x1d1   : > { %v898_v30 = vmax.f32 %v721_v16, 0.0  ;;  %1862 = vmatprep.subr.bf16.mxu0 %v4201_v3  ;;  %2088 = vmatprep.subr.bf16.mxu1 %v4204_v6  ;;  %v4971_v36 = vpack.c.bf16 %v885_v48, %v881_v20  ;;  %v826_v58 = vadd.f32 %v825_v56, %v4899_v22  ;;  %v4978_v3 = vld [vmem:[#allocation8 + $0x104] ss:$8 sps:$4 sm:$0xff]   ;;  %v830_v11 = vadd.f32 %v829_v10, %v4895_v17  ;;  %v831_v12 = vpop.f32.mrb[29].mxu1  ;;  %v4987_v16 = vld [vmem:[#allocation8 + $0x100] ss:$8 sps:$4 sm:$0xff]  }
 0x1d2   : > { %v899_v33 = vmax.f32 %v723_v24, 0.0  ;;  %v892_v61 = vmax.f32 %v824_v55, 0.0  ;;  %v832_v13 = vadd.f32 %v831_v12, %v4899_v22  ;;  %v833_v14 = vpop.f32.mrb[30].mxu1  ;;  %v4222_v20 = vld [vmem:[#allocation8 + $0x14] ss:$8 sps:$4 sm:$0xff]  }
 0x1d3   : > { %v930_v35 = vpack.c.bf16 %v898_v30, %v894_v29  ;;  %v893_v62 = vmax.f32 %v826_v58, 0.0  ;;  %v834_v18 = vadd.f32 %v833_v14, %v4895_v17  ;;  %v4991_v21 = vld [vmem:[#allocation8 + $0x114] ss:$8 sps:$4 sm:$0xff]   ;;  %v4220_v29 = vld [vmem:[#allocation8 + $0x10] ss:$8 sps:$4 sm:$0xff]  }
 0x1d4   : > { %v931_v49 = vpack.c.bf16 %v899_v33, %v895_v32  ;;  %1863 = vmatpush1.bf16.msra.mxu0 %v4199_v19  ;;  %2089 = vmatpush1.bf16.msra.mxu1 %v4202_v26  ;;  %v4981_v6 = vpack.c.bf16 %v892_v61, %v888_v53  ;;  %v835_v19 = vpop.f32.mrb[31].mxu1  ;;  %v897_v24 = vmax.f32 %v832_v13, 0.0  ;;  %v4999_v17 = vld [vmem:[#allocation8 + $0x110] ss:$8 sps:$4 sm:$0xff]   ;;  %v5009_v48 = vld [vmem:[#allocation8 + $0x120] ss:$8 sps:$4 sm:$0xff]  }
 0x1d5   : > { %1864 = vmatprep.subr.bf16.mxu0 %v4207_v27  ;;  %2090 = vmatprep.subr.bf16.mxu1 %v4210_v31  ;;  %v4983_v8 = vpack.c.bf16 %v893_v62, %v889_v57  ;;  %v836_v26 = vadd.f32 %v835_v19, %v4899_v22  ;;  %v900_v27 = vmax.f32 %v834_v18, 0.0  ;;  %v4225_v31 = vld [vmem:[#allocation8 + $0x24] ss:$8 sps:$4 sm:$0xff]   ;;  %v4228_v32 = vld [vmem:[#allocation8 + $0x34] ss:$8 sps:$4 sm:$0xff]  }
 0x1d6   : > { %1825 = vmatprep.mubr.bf16.mxu0 %v931_v49  ;;  %2051 = vmatprep.mubr.bf16.mxu1 %v931_v49  ;;  %v5012_v33 = vld [vmem:[#allocation8 + $0x134] ss:$8 sps:$4 sm:$0xff]   ;;  %v4231_v49 = vld [vmem:[#allocation8 + $0x44] ss:$8 sps:$4 sm:$0xff]   ;;  %v4232_v42 = vld [vmem:[#allocation8 + $0x50] ss:$8 sps:$4 sm:$0xff]  }
 0x1d7   : > { %1826 = vmatmul.mubr.bf16.gmra.mrb[60].mxu0 %v930_v35  ;;  %2052 = vmatmul.mubr.bf16.gmra.mrb[60].mxu1 %v930_v35  ;;  %v901_v28 = vmax.f32 %v836_v26, 0.0  ;;  %v4226_v35 = vld [vmem:[#allocation8 + $0x30] ss:$8 sps:$4 sm:$0xff]   ;;  %v5028_v41 = vld [vmem:[#allocation8 + $0x154] ss:$8 sps:$4 sm:$0xff]  }
 0x1d8   : > { %1865 = vmatpush1.bf16.msra.mxu0 %v4205_v38  ;;  %2091 = vmatpush1.bf16.msra.mxu1 %v4208_v39  ;;  %v5022_v38 = vld [vmem:[#allocation8 + $0x144] ss:$8 sps:$4 sm:$0xff]   ;;  %v4229_v39 = vld [vmem:[#allocation8 + $0x40] ss:$8 sps:$4 sm:$0xff]   ;;  %v4249_v55 = vld [vmem:[#allocation8 + $0x94] ss:$8 sps:$4 sm:$0xff]  }
 0x1d9   : > { %1866 = vmatprep.subr.bf16.mxu0 %v4213_v43  ;;  %1868 = vmatprep.mubr.bf16.mxu0 %v4911_v2  ;;  %v5006_v22 = vpack.c.bf16 %v901_v28, %v897_v24  ;;  %v5035_v43 = vld [vmem:[#allocation8 + $0x150] ss:$8 sps:$4 sm:$0xff]   ;;  %v4237_v46 = vld [vmem:[#allocation8 + $0x64] ss:$8 sps:$4 sm:$0xff]   ;;  %v4235_v50 = vld [vmem:[#allocation8 + $0x60] ss:$8 sps:$4 sm:$0xff]  }
 0x1da   : > { %2092 = vmatprep.subr.bf16.mxu1 %v4216_v51  ;;  %2094 = vmatprep.mubr.bf16.mxu1 %v4911_v2  ;;  %v896_v2 = vmax.f32 %v830_v11, 0.0  ;;  %v4243_v51 = vld [vmem:[#allocation8 + $0x84] ss:$8 sps:$4 sm:$0xff]   ;;  %v4241_v53 = vld [vmem:[#allocation8 + $0x80] ss:$8 sps:$4 sm:$0xff]  }
 0x1db   : > { %v4253_v56 = vld [vmem:[#allocation8 + $0xa0] ss:$8 sps:$4 sm:$0xff]   ;;  %v4261_v57 = vld [vmem:[#allocation8 + $0xb4] ss:$8 sps:$4 sm:$0xff]   ;;  %v5057_v61 = vld [vmem:[#allocation8 + $0x164] ss:$8 sps:$4 sm:$0xff]  }
 0x1dc   : > { %1867 = vmatpush1.bf16.msra.mxu0 %v4211_v59  ;;  %2093 = vmatpush1.bf16.msra.mxu1 %v4214_v60  ;;  %v5001_v30 = vpack.c.bf16 %v900_v27, %v896_v2  ;;  %v4265_v58 = vld [vmem:[#allocation8 + $0xc0] ss:$8 sps:$4 sm:$0xff]   ;;  %v4273_v59 = vld [vmem:[#allocation8 + $0xd4] ss:$8 sps:$4 sm:$0xff]   ;;  %v4279_v60 = vld [vmem:[#allocation8 + $0xe4] ss:$8 sps:$4 sm:$0xff]  }
 0x1dd   : > { %2666 = vmatprep.subr.bf16.mxu0 %v4219_v1  ;;  %3649 = vmatprep.subr.bf16.mxu1 %v4978_v3  ;;  %v4277_v62 = vld [vmem:[#allocation8 + $0xe0] ss:$8 sps:$4 sm:$0xff]   ;;  %v4283_v10 = vld [vmem:[#allocation8 + $0xf0] ss:$8 sps:$4 sm:$0xff]   ;;  %v5070_v12 = vld [vmem:[#allocation8 + $0x184] ss:$8 sps:$4 sm:$0xff]  }
 0x1de   : > { %v5059_v1 = vld [vmem:[#allocation8 + $0x160] ss:$8 sps:$4 sm:$0xff]   ;;  %v5065_v11 = vld [vmem:[#allocation8 + $0x170] ss:$8 sps:$4 sm:$0xff]   ;;  %v5076_v14 = vld [vmem:[#allocation8 + $0x194] ss:$8 sps:$4 sm:$0xff]  }
 0x1df   : > { %1869 = vmatmul.mubr.bf16.vlgmr.msra.gmra.mrb[32].mxu0 %v4909_v63  ;;  %2095 = vmatmul.mubr.bf16.vlgmr.msra.gmra.mrb[32].mxu1 %v4909_v63  ;;  %v5004_v63 = vld [vmem:[#allocation8 + $0x124] ss:$8 sps:$4 sm:$0xff]   ;;  %v5072_v13 = vld [vmem:[#allocation8 + $0x180] ss:$8 sps:$4 sm:$0xff]   ;;  %v5090_v19 = vld [vmem:[#allocation8 + $0x1b0] ss:$8 sps:$4 sm:$0xff]  }
 0x1e0   : > { %1878 = vmatprep.mubr.bf16.mxu0 %v4923_v0  ;;  %2104 = vmatprep.mubr.bf16.mxu1 %v4923_v0  ;;  %v4223_v0 = vld [vmem:[#allocation8 + $0x20] ss:$8 sps:$4 sm:$0xff]   ;;  %v5082_v2 = vld [vmem:[#allocation8 + $0x1a4] ss:$8 sps:$4 sm:$0xff]   ;;  %v5100_v26 = vld [vmem:[#allocation8 + $0x1d4] ss:$8 sps:$4 sm:$0xff]  }
 0x1e1   : > { %2667 = vmatpush1.bf16.msra.mxu0 %v4217_v15  ;;  %3665 = vmatpush1.bf16.msra.mxu1 %v4987_v16  ;;  %v5078_v15 = vld [vmem:[#allocation8 + $0x190] ss:$8 sps:$4 sm:$0xff]   ;;  %v5084_v18 = vld [vmem:[#allocation8 + $0x1a0] ss:$8 sps:$4 sm:$0xff]   ;;  %v5106_v28 = vld [vmem:[#allocation8 + $0x1e4] ss:$8 sps:$4 sm:$0xff]  }
 0x1e2   : > { %2668 = vmatprep.subr.bf16.mxu0 %v4222_v20  ;;  %3650 = vmatprep.subr.bf16.mxu1 %v4991_v21  ;;  %v5094_v20 = vld [vmem:[#allocation8 + $0x1c4] ss:$8 sps:$4 sm:$0xff]   ;;  %v5096_v24 = vld [vmem:[#allocation8 + $0x1c0] ss:$8 sps:$4 sm:$0xff]   ;;  %v5102_v27 = vld [vmem:[#allocation8 + $0x1d0] ss:$8 sps:$4 sm:$0xff]  }
 0x1e5   : > { %2669 = vmatpush1.bf16.msra.mxu0 %v4220_v29  ;;  %3666 = vmatpush1.bf16.msra.mxu1 %v4999_v17  ;;  %v5108_v29 = vld [vmem:[#allocation8 + $0x1e0] ss:$8 sps:$4 sm:$0xff]  }
 0x1e6   : > { %2670 = vmatprep.subr.bf16.mxu0 %v4225_v31  ;;  %3651 = vmatprep.subr.bf16.mxu1 %v5004_v63  ;;  %v5114_v31 = vld [vmem:[#allocation8 + $0x1f0] ss:$8 sps:$4 sm:$0xff]  }
 0x1e7   : > { %1879 = vmatmul.mubr.bf16.gmra.mrb[36].mxu0 %v4921_v40  ;;  %2105 = vmatmul.mubr.bf16.gmra.mrb[36].mxu1 %v4921_v40  ;;  %v5025_v40 = vld [vmem:[#allocation8 + $0x140] ss:$8 sps:$4 sm:$0xff]  }
 0x1e8   : > { %1888 = vmatprep.mubr.bf16.mxu0 %v4935_v25  ;;  %2114 = vmatprep.mubr.bf16.mxu1 %v4935_v25  ;;  %v4234_v25 = vld [vmem:[#allocation8 + $0x54] ss:$8 sps:$4 sm:$0xff]  }
 0x1e9   : > { %2671 = vmatpush1.bf16.msra.mxu0 %v4223_v0  ;;  %3667 = vmatpush1.bf16.msra.mxu1 %v5009_v48 }
 0x1ea   : > { %2672 = vmatprep.subr.bf16.mxu0 %v4228_v32  ;;  %3652 = vmatprep.subr.bf16.mxu1 %v5012_v33 }
 0x1ed   : > { %2673 = vmatpush1.bf16.msra.mxu0 %v4226_v35  ;;  %3668 = vmatpush1.bf16.msra.mxu1 %v5019_v37 }
 0x1ee   : > { %2674 = vmatprep.subr.bf16.mxu0 %v4231_v49  ;;  %3653 = vmatprep.subr.bf16.mxu1 %v5022_v38 }
 0x1ef   : > { %1889 = vmatmul.mubr.bf16.gmra.mrb[40].mxu0 %v4933_v23  ;;  %2115 = vmatmul.mubr.bf16.gmra.mrb[40].mxu1 %v4933_v23  ;;  %v4240_v23 = vld [vmem:[#allocation8 + $0x74] ss:$8 sps:$4 sm:$0xff]  }
 0x1f0   : > { %1898 = vmatprep.mubr.bf16.mxu0 %v4947_v7  ;;  %2124 = vmatprep.mubr.bf16.mxu1 %v4947_v7  ;;  %v4238_v7 = vld [vmem:[#allocation8 + $0x70] ss:$8 sps:$4 sm:$0xff]  }
 0x1f1   : > { %2675 = vmatpush1.bf16.msra.mxu0 %v4229_v39  ;;  %3669 = vmatpush1.bf16.msra.mxu1 %v5025_v40 }
 0x1f2   : > { %2676 = vmatprep.subr.bf16.mxu0 %v4234_v25  ;;  %3654 = vmatprep.subr.bf16.mxu1 %v5028_v41 }
 0x1f5   : > { %2677 = vmatpush1.bf16.msra.mxu0 %v4232_v42  ;;  %3670 = vmatpush1.bf16.msra.mxu1 %v5035_v43 }
 0x1f6   : > { %2678 = vmatprep.subr.bf16.mxu0 %v4237_v46  ;;  %3655 = vmatprep.subr.bf16.mxu1 %v5057_v61 }
 0x1f7   : > { %1899 = vmatmul.mubr.bf16.gmra.mrb[44].mxu0 %v4945_v5  ;;  %2125 = vmatmul.mubr.bf16.gmra.mrb[44].mxu1 %v4945_v5  ;;  %v4247_v5 = vld [vmem:[#allocation8 + $0x90] ss:$8 sps:$4 sm:$0xff]  }
 0x1f8   : > { %1908 = vmatprep.mubr.bf16.mxu0 %v4959_v54  ;;  %2134 = vmatprep.mubr.bf16.mxu1 %v4959_v54  ;;  %v4255_v54 = vld [vmem:[#allocation8 + $0xa4] ss:$8 sps:$4 sm:$0xff]  }
 0x1f9   : > { %2679 = vmatpush1.bf16.msra.mxu0 %v4235_v50  ;;  %3671 = vmatpush1.bf16.msra.mxu1 %v5059_v1 }
 0x1fa   : > { %2680 = vmatprep.subr.bf16.mxu0 %v4240_v23 }
 0x1fd   : > { %2681 = vmatpush1.bf16.msra.mxu0 %v4238_v7 }
 0x1fe   : > { %2682 = vmatprep.subr.bf16.mxu0 %v4243_v51 }
 0x1ff   : > { %1909 = vmatmul.mubr.bf16.gmra.mrb[48].mxu0 %v4957_v52  ;;  %2135 = vmatmul.mubr.bf16.gmra.mrb[48].mxu1 %v4957_v52  ;;  %v4259_v52 = vld [vmem:[#allocation8 + $0xb0] ss:$8 sps:$4 sm:$0xff]  }
 0x200   : > { %1918 = vmatprep.mubr.bf16.mxu0 %v4971_v36  ;;  %2144 = vmatprep.mubr.bf16.mxu1 %v4971_v36  ;;  %v4267_v36 = vld [vmem:[#allocation8 + $0xc4] ss:$8 sps:$4 sm:$0xff]  }
 0x201   : > { %2683 = vmatpush1.bf16.msra.mxu0 %v4241_v53 }
 0x202   : > { %2684 = vmatprep.subr.bf16.mxu0 %v4249_v55 }
 0x205   : > { %2685 = vmatpush1.bf16.msra.mxu0 %v4247_v5 }
 0x206   : > { %2686 = vmatprep.subr.bf16.mxu0 %v4255_v54 }
 0x207   : > { %1919 = vmatmul.mubr.bf16.gmra.mrb[52].mxu0 %v4969_v34  ;;  %2145 = vmatmul.mubr.bf16.gmra.mrb[52].mxu1 %v4969_v34  ;;  %v4271_v34 = vld [vmem:[#allocation8 + $0xd0] ss:$8 sps:$4 sm:$0xff]  }
 0x208   : > { %1928 = vmatprep.mubr.bf16.mxu0 %v4983_v8  ;;  %2154 = vmatprep.mubr.bf16.mxu1 %v4983_v8  ;;  %v5063_v8 = vld [vmem:[#allocation8 + $0x174] ss:$8 sps:$4 sm:$0xff]  }
 0x209   : > { %2687 = vmatpush1.bf16.msra.mxu0 %v4253_v56  ;;  %3656 = vmatprep.subr.bf16.mxu1 %v5063_v8 }
 0x20a   : > { %2688 = vmatprep.subr.bf16.mxu0 %v4261_v57  ;;  %3672 = vmatpush1.bf16.msra.mxu1 %v5065_v11 }
 0x20b   : > { %3657 = vmatprep.subr.bf16.mxu1 %v5070_v12 }
 0x20d   : > { %2689 = vmatpush1.bf16.msra.mxu0 %v4259_v52 }
 0x20e   : > { %2690 = vmatprep.subr.bf16.mxu0 %v4267_v36  ;;  %3673 = vmatpush1.bf16.msra.mxu1 %v5072_v13 }
 0x20f   : > { %1929 = vmatmul.mubr.bf16.gmra.mrb[56].mxu0 %v4981_v6  ;;  %2155 = vmatmul.mubr.bf16.gmra.mrb[56].mxu1 %v4981_v6  ;;  %v4285_v6 = vld [vmem:[#allocation8 + $0xf4] ss:$8 sps:$4 sm:$0xff]  }
 0x210   : > { %1938 = vmatprep.mubr.bf16.mxu0 %v5006_v22  ;;  %2164 = vmatprep.mubr.bf16.mxu1 %v5006_v22  ;;  %v332_v22 = vld [vmem:[%s5415_s5 + $0x4] sm:$0xf] }
 0x211   : > { %2691 = vmatpush1.bf16.msra.mxu0 %v4265_v58  ;;  %3658 = vmatprep.subr.bf16.mxu1 %v5076_v14  ;;  %v5122_v0 = vrot.slane %v332_v22, %v4869_v45  ;;  %v5126_v32 = vrot.slane %v332_v22, %v394_v4  ;;  %v5129_v35 = vrot.slane %v332_v22, %v4875_v47 }
 0x212   : > { %2692 = vmatprep.subr.bf16.mxu0 %v4273_v59  ;;  %3674 = vmatpush1.bf16.msra.mxu1 %v5078_v15  ;;  %v5133_v49 = vrot.slane %v332_v22, %v398_v9 }
 0x213   : > { %3659 = vmatprep.subr.bf16.mxu1 %v5082_v2 }
 0x215   : > { %2693 = vmatpush1.bf16.msra.mxu0 %v4271_v34 }
 0x216   : > { %2694 = vmatprep.subr.bf16.mxu0 %v4279_v60  ;;  %3675 = vmatpush1.bf16.msra.mxu1 %v5084_v18 }
 0x217   : > { %1939 = vmatmul.mubr.bf16.gmra.mrb[60].mxu0 %v5001_v30  ;;  %2165 = vmatmul.mubr.bf16.gmra.mrb[60].mxu1 %v5001_v30  ;;  %v5112_v30 = vld [vmem:[#allocation8 + $0x1f4] ss:$8 sps:$4 sm:$0xff]  }
 0x219   : > { %2695 = vmatpush1.bf16.msra.mxu0 %v4277_v62 }
 0x21a   : > { %2696 = vmatprep.subr.bf16.mxu0 %v4285_v6 }
 0x21d   : > { %2697 = vmatpush1.bf16.msra.mxu0 %v4283_v10 }
 0x21e   : > { %2779 = vmatprep.subr.bf16.mxu0 %v4978_v3  ;;  %v5088_v3 = vld [vmem:[#allocation8 + $0x1b4] ss:$8 sps:$4 sm:$0xff]  }
 0x21f   : > { %3660 = vmatprep.subr.bf16.mxu1 %v5088_v3 }
 0x220   : > { %3676 = vmatpush1.bf16.msra.mxu1 %v5090_v19 }
 0x221   : > { %3661 = vmatprep.subr.bf16.mxu1 %v5094_v20 }
 0x224   : > { %3677 = vmatpush1.bf16.msra.mxu1 %v5096_v24 }
 0x225   : > { %3662 = vmatprep.subr.bf16.mxu1 %v5100_v26 }
 0x228   : > { %3678 = vmatpush1.bf16.msra.mxu1 %v5102_v27 }
 0x229   : > { %3663 = vmatprep.subr.bf16.mxu1 %v5106_v28 }
 0x22c   : > { %3679 = vmatpush1.bf16.msra.mxu1 %v5108_v29 }
 0x22d   : > { %3664 = vmatprep.subr.bf16.mxu1 %v5112_v30 }
 0x230   : > { %3680 = vmatpush1.bf16.msra.mxu1 %v5114_v31 }
 0x2b2   : > { %v1870_v39 = vpop.f32.mrb[32].mxu0  ;;  %v2096_v25 = vpop.f32.mrb[32].mxu1 }
 0x2b3   : > { %v3681_v42 = vadd.f32 %v1870_v39, %v5122_v0  ;;  %v3713_v46 = vadd.f32 %v2096_v25, %v5126_v32  ;;  %v1872_v50 = vpop.f32.mrb[33].mxu0  ;;  %v2098_v23 = vpop.f32.mrb[33].mxu1 }
 0x2b4   : > { %v3682_v7 = vadd.f32 %v1872_v50, %v5129_v35  ;;  %v3714_v4 = vadd.f32 %v2098_v23, %v5133_v49  ;;  %v1874_v51 = vpop.f32.mrb[34].mxu0  ;;  %v2100_v53 = vpop.f32.mrb[34].mxu1 }
 0x2b5   : > { %v3683_v55 = vadd.f32 %v1874_v51, %v5122_v0  ;;  %v3715_v44 = vadd.f32 %v2100_v53, %v5126_v32  ;;  %v1876_v9 = vpop.f32.mrb[35].mxu0  ;;  %v2102_v5 = vpop.f32.mrb[35].mxu1  ;;  %v2175_v57 = vmax.f32 %v3681_v42, 0.0  ;;  %v2177_v52 = vmax.f32 %v3713_v46, 0.0 }
 0x2b6   : > { %v3684_v54 = vadd.f32 %v1876_v9, %v5129_v35  ;;  %v3716_v56 = vadd.f32 %v2102_v5, %v5133_v49  ;;  %v2176_v59 = vmax.f32 %v3682_v7, 0.0  ;;  %v2178_v34 = vmax.f32 %v3714_v4, 0.0 }
 0x2b7   : > { %v2179_v36 = vmax.f32 %v3683_v55, 0.0  ;;  %v2181_v58 = vmax.f32 %v3715_v44, 0.0 }
 0x2b8   : > { %v2180_v60 = vmax.f32 %v3684_v54, 0.0  ;;  %v2182_v62 = vmax.f32 %v3716_v56, 0.0 }
 0x2b9   : > { %v2239_v6 = vpack.c.bf16 %v2179_v36, %v2175_v57  ;;  %v5143_v10 = vpack.c.bf16 %v2181_v58, %v2177_v52 }
 0x2ba   : > { %v2240_v22 = vpack.c.bf16 %v2180_v60, %v2176_v59  ;;  %v5145_v39 = vpack.c.bf16 %v2182_v62, %v2178_v34  ;;  %v1880_v25 = vpop.f32.mrb[36].mxu0  ;;  %v2106_v50 = vpop.f32.mrb[36].mxu1 }
 0x2bb   : > { %v3685_v23 = vadd.f32 %v1880_v25, %v5122_v0  ;;  %v3717_v51 = vadd.f32 %v2106_v50, %v5126_v32  ;;  %v1882_v42 = vpop.f32.mrb[37].mxu0  ;;  %v2108_v46 = vpop.f32.mrb[37].mxu1 }
 0x2bc   : > { %v3686_v53 = vadd.f32 %v1882_v42, %v5129_v35  ;;  %v3718_v7 = vadd.f32 %v2108_v46, %v5133_v49  ;;  %v1884_v4 = vpop.f32.mrb[38].mxu0  ;;  %v2110_v55 = vpop.f32.mrb[38].mxu1  ;;  %2698 = vmatprep.mubr.bf16.mxu0 %v2240_v22 }
 0x2bd   : > { %v3687_v44 = vadd.f32 %v1884_v4, %v5122_v0  ;;  %v3719_v9 = vadd.f32 %v2110_v55, %v5126_v32  ;;  %v1886_v5 = vpop.f32.mrb[39].mxu0  ;;  %v2112_v54 = vpop.f32.mrb[39].mxu1  ;;  %2699 = vmatmul.mubr.bf16.vlgmr.msra.gmra.mrb[64].mxu0 %v2239_v6  ;;  %v2183_v52 = vmax.f32 %v3685_v23, 0.0  ;;  %v2185_v36 = vmax.f32 %v3717_v51, 0.0 }
 0x2be   : > { %v3688_v56 = vadd.f32 %v1886_v5, %v5129_v35  ;;  %v3720_v57 = vadd.f32 %v2112_v54, %v5133_v49  ;;  %2780 = vmatpush1.bf16.msra.mxu0 %v4987_v16  ;;  %v2184_v34 = vmax.f32 %v3686_v53, 0.0  ;;  %v2186_v60 = vmax.f32 %v3718_v7, 0.0 }
 0x2bf   : > { %v2187_v58 = vmax.f32 %v3687_v44, 0.0  ;;  %v2189_v59 = vmax.f32 %v3719_v9, 0.0  ;;  %2781 = vmatprep.subr.bf16.mxu0 %v4991_v21 }
 0x2c0   : > { %v2188_v62 = vmax.f32 %v3688_v56, 0.0  ;;  %v2190_v22 = vmax.f32 %v3720_v57, 0.0 }
 0x2c1   : > { %v2243_v25 = vpack.c.bf16 %v2187_v58, %v2183_v52  ;;  %v5157_v50 = vpack.c.bf16 %v2189_v59, %v2185_v36 }
 0x2c2   : > { %v2244_v6 = vpack.c.bf16 %v2188_v62, %v2184_v34  ;;  %v5159_v42 = vpack.c.bf16 %v2190_v22, %v2186_v60  ;;  %2782 = vmatpush1.bf16.msra.mxu0 %v4999_v17  ;;  %v1890_v46 = vpop.f32.mrb[40].mxu0  ;;  %v2116_v16 = vpop.f32.mrb[40].mxu1 }
 0x2c3   : > { %v3689_v23 = vadd.f32 %v1890_v46, %v5122_v0  ;;  %v3721_v51 = vadd.f32 %v2116_v16, %v5126_v32  ;;  %v1892_v4 = vpop.f32.mrb[41].mxu0  ;;  %v2118_v21 = vpop.f32.mrb[41].mxu1  ;;  %2783 = vmatprep.subr.bf16.mxu0 %v5004_v63 }
 0x2c4   : > { %v3690_v53 = vadd.f32 %v1892_v4, %v5129_v35  ;;  %v3722_v7 = vadd.f32 %v2118_v21, %v5133_v49  ;;  %v1894_v55 = vpop.f32.mrb[42].mxu0  ;;  %v2120_v44 = vpop.f32.mrb[42].mxu1  ;;  %2708 = vmatprep.mubr.bf16.mxu0 %v2244_v6 }
 0x2c5   : > { %v3691_v9 = vadd.f32 %v1894_v55, %v5122_v0  ;;  %v3723_v17 = vadd.f32 %v2120_v44, %v5126_v32  ;;  %v1896_v5 = vpop.f32.mrb[43].mxu0  ;;  %v2122_v54 = vpop.f32.mrb[43].mxu1  ;;  %2709 = vmatmul.mubr.bf16.gmra.mrb[68].mxu0 %v2243_v25  ;;  %v2191_v63 = vmax.f32 %v3689_v23, 0.0  ;;  %v2193_v52 = vmax.f32 %v3721_v51, 0.0 }
 0x2c6   : > { %v3692_v56 = vadd.f32 %v1896_v5, %v5129_v35  ;;  %v3724_v57 = vadd.f32 %v2122_v54, %v5133_v49  ;;  %2784 = vmatpush1.bf16.msra.mxu0 %v5009_v48  ;;  %v2192_v59 = vmax.f32 %v3690_v53, 0.0  ;;  %v2194_v34 = vmax.f32 %v3722_v7, 0.0 }
 0x2c7   : > { %v2195_v36 = vmax.f32 %v3691_v9, 0.0  ;;  %v2197_v58 = vmax.f32 %v3723_v17, 0.0  ;;  %2785 = vmatprep.subr.bf16.mxu0 %v5012_v33 }
 0x2c8   : > { %v2196_v60 = vmax.f32 %v3692_v56, 0.0  ;;  %v2198_v62 = vmax.f32 %v3724_v57, 0.0 }
 0x2c9   : > { %v2247_v22 = vpack.c.bf16 %v2195_v36, %v2191_v63  ;;  %v5173_v6 = vpack.c.bf16 %v2197_v58, %v2193_v52 }
 0x2ca   : > { %v2248_v25 = vpack.c.bf16 %v2196_v60, %v2192_v59  ;;  %v5175_v46 = vpack.c.bf16 %v2198_v62, %v2194_v34  ;;  %2786 = vmatpush1.bf16.msra.mxu0 %v5019_v37  ;;  %v1900_v16 = vpop.f32.mrb[44].mxu0  ;;  %v2126_v48 = vpop.f32.mrb[44].mxu1 }
 0x2cb   : > { %v3693_v23 = vadd.f32 %v1900_v16, %v5122_v0  ;;  %v3725_v51 = vadd.f32 %v2126_v48, %v5126_v32  ;;  %v1902_v4 = vpop.f32.mrb[45].mxu0  ;;  %v2128_v33 = vpop.f32.mrb[45].mxu1  ;;  %2787 = vmatprep.subr.bf16.mxu0 %v5022_v38 }
 0x2cc   : > { %v3694_v21 = vadd.f32 %v1902_v4, %v5129_v35  ;;  %v3726_v53 = vadd.f32 %v2128_v33, %v5133_v49  ;;  %v1904_v7 = vpop.f32.mrb[46].mxu0  ;;  %v2130_v55 = vpop.f32.mrb[46].mxu1  ;;  %2718 = vmatprep.mubr.bf16.mxu0 %v2248_v25 }
 0x2cd   : > { %v3695_v44 = vadd.f32 %v1904_v7, %v5122_v0  ;;  %v3727_v37 = vadd.f32 %v2130_v55, %v5126_v32  ;;  %v1906_v9 = vpop.f32.mrb[47].mxu0  ;;  %v2132_v17 = vpop.f32.mrb[47].mxu1  ;;  %2719 = vmatmul.mubr.bf16.gmra.mrb[72].mxu0 %v2247_v22  ;;  %v2199_v38 = vmax.f32 %v3693_v23, 0.0  ;;  %v2201_v56 = vmax.f32 %v3725_v51, 0.0 }
 0x2ce   : > { %v3696_v5 = vadd.f32 %v1906_v9, %v5129_v35  ;;  %v3728_v54 = vadd.f32 %v2132_v17, %v5133_v49  ;;  %2788 = vmatpush1.bf16.msra.mxu0 %v5025_v40  ;;  %v2200_v52 = vmax.f32 %v3694_v21, 0.0  ;;  %v2202_v36 = vmax.f32 %v3726_v53, 0.0 }
 0x2cf   : > { %v2203_v57 = vmax.f32 %v3695_v44, 0.0  ;;  %v2205_v63 = vmax.f32 %v3727_v37, 0.0  ;;  %2789 = vmatprep.subr.bf16.mxu0 %v5028_v41 }
 0x2d0   : > { %v2204_v58 = vmax.f32 %v3696_v5, 0.0  ;;  %v2206_v59 = vmax.f32 %v3728_v54, 0.0 }
 0x2d1   : > { %v2251_v34 = vpack.c.bf16 %v2203_v57, %v2199_v38  ;;  %v5189_v60 = vpack.c.bf16 %v2205_v63, %v2201_v56 }
 0x2d2   : > { %v2252_v62 = vpack.c.bf16 %v2204_v58, %v2200_v52  ;;  %v5191_v22 = vpack.c.bf16 %v2206_v59, %v2202_v36  ;;  %2790 = vmatpush1.bf16.msra.mxu0 %v5035_v43  ;;  %v1910_v25 = vpop.f32.mrb[48].mxu0  ;;  %v2136_v40 = vpop.f32.mrb[48].mxu1 }
 0x2d3   : > { %v3697_v16 = vadd.f32 %v1910_v25, %v5122_v0  ;;  %v3729_v48 = vadd.f32 %v2136_v40, %v5126_v32  ;;  %v1912_v23 = vpop.f32.mrb[49].mxu0  ;;  %v2138_v41 = vpop.f32.mrb[49].mxu1  ;;  %2791 = vmatprep.subr.bf16.mxu0 %v5057_v61 }
 0x2d4   : > { %v3698_v51 = vadd.f32 %v1912_v23, %v5129_v35  ;;  %v3730_v4 = vadd.f32 %v2138_v41, %v5133_v49  ;;  %v1914_v33 = vpop.f32.mrb[50].mxu0  ;;  %v2140_v21 = vpop.f32.mrb[50].mxu1  ;;  %2728 = vmatprep.mubr.bf16.mxu0 %v2252_v62 }
 0x2d5   : > { %v3699_v53 = vadd.f32 %v1914_v33, %v5122_v0  ;;  %v3731_v43 = vadd.f32 %v2140_v21, %v5126_v32  ;;  %v1916_v7 = vpop.f32.mrb[51].mxu0  ;;  %v2142_v55 = vpop.f32.mrb[51].mxu1  ;;  %2729 = vmatmul.mubr.bf16.gmra.mrb[76].mxu0 %v2251_v34  ;;  %v2207_v61 = vmax.f32 %v3697_v16, 0.0  ;;  %v2209_v9 = vmax.f32 %v3729_v48, 0.0 }
 0x2d6   : > { %v3700_v44 = vadd.f32 %v1916_v7, %v5129_v35  ;;  %v3732_v37 = vadd.f32 %v2142_v55, %v5133_v49  ;;  %2792 = vmatpush1.bf16.msra.mxu0 %v5059_v1  ;;  %v2208_v54 = vmax.f32 %v3698_v51, 0.0  ;;  %v2210_v38 = vmax.f32 %v3730_v4, 0.0 }
 0x2d7   : > { %v2211_v17 = vmax.f32 %v3699_v53, 0.0  ;;  %v2213_v5 = vmax.f32 %v3731_v43, 0.0  ;;  %2793 = vmatprep.subr.bf16.mxu0 %v5063_v8 }
 0x2d8   : > { %v2212_v56 = vmax.f32 %v3700_v44, 0.0  ;;  %v2214_v57 = vmax.f32 %v3732_v37, 0.0 }
 0x2d9   : > { %v2255_v63 = vpack.c.bf16 %v2211_v17, %v2207_v61  ;;  %v2257_v52 = vpack.c.bf16 %v2213_v5, %v2209_v9 }
 0x2da   : > { %v2256_v36 = vpack.c.bf16 %v2212_v56, %v2208_v54  ;;  %v2258_v58 = vpack.c.bf16 %v2214_v57, %v2210_v38  ;;  %2794 = vmatpush1.bf16.msra.mxu0 %v5065_v11  ;;  %v1920_v59 = vpop.f32.mrb[52].mxu0  ;;  %v2146_v34 = vpop.f32.mrb[52].mxu1 }
 0x2db   : > { %v3701_v1 = vadd.f32 %v1920_v59, %v5122_v0  ;;  %v3733_v62 = vadd.f32 %v2146_v34, %v5126_v32  ;;  %v1922_v25 = vpop.f32.mrb[53].mxu0  ;;  %v2148_v40 = vpop.f32.mrb[53].mxu1  ;;  %2795 = vmatprep.subr.bf16.mxu0 %v5070_v12 }
 0x2dc   : > { %v3702_v8 = vadd.f32 %v1922_v25, %v5129_v35  ;;  %v3734_v16 = vadd.f32 %v2148_v40, %v5133_v49  ;;  %v1924_v48 = vpop.f32.mrb[54].mxu0  ;;  %v2150_v23 = vpop.f32.mrb[54].mxu1  ;;  %2738 = vmatprep.mubr.bf16.mxu0 %v2256_v36  ;;  %2851 = vmatprep.mubr.bf16.mxu1 %v2258_v58 }
 0x2dd   : > { %v3703_v11 = vadd.f32 %v1924_v48, %v5122_v0  ;;  %v3735_v41 = vadd.f32 %v2150_v23, %v5126_v32  ;;  %v1926_v51 = vpop.f32.mrb[55].mxu0  ;;  %v2152_v4 = vpop.f32.mrb[55].mxu1  ;;  %2739 = vmatmul.mubr.bf16.gmra.mrb[80].mxu0 %v2255_v63  ;;  %2852 = vmatmul.mubr.bf16.vlgmr.msra.gmra.mrb[64].mxu1 %v2257_v52  ;;  %v2215_v21 = vmax.f32 %v3701_v1, 0.0  ;;  %v2217_v53 = vmax.f32 %v3733_v62, 0.0 }
 0x2de   : > { %v3704_v33 = vadd.f32 %v1926_v51, %v5129_v35  ;;  %v3736_v12 = vadd.f32 %v2152_v4, %v5133_v49  ;;  %2796 = vmatpush1.bf16.msra.mxu0 %v5072_v13  ;;  %v2216_v55 = vmax.f32 %v3702_v8, 0.0  ;;  %v2218_v44 = vmax.f32 %v3734_v16, 0.0 }
 0x2df   : > { %v2219_v43 = vmax.f32 %v3703_v11, 0.0  ;;  %v2221_v7 = vmax.f32 %v3735_v41, 0.0  ;;  %2797 = vmatprep.subr.bf16.mxu0 %v5076_v14 }
 0x2e0   : > { %v2220_v37 = vmax.f32 %v3704_v33, 0.0  ;;  %v2222_v61 = vmax.f32 %v3736_v12, 0.0 }
 0x2e1   : > { %v2259_v9 = vpack.c.bf16 %v2219_v43, %v2215_v21  ;;  %v2261_v17 = vpack.c.bf16 %v2221_v7, %v2217_v53 }
 0x2e2   : > { %v2260_v5 = vpack.c.bf16 %v2220_v37, %v2216_v55  ;;  %v2262_v54 = vpack.c.bf16 %v2222_v61, %v2218_v44  ;;  %2798 = vmatpush1.bf16.msra.mxu0 %v5078_v15  ;;  %v1930_v38 = vpop.f32.mrb[56].mxu0  ;;  %v2156_v56 = vpop.f32.mrb[56].mxu1 }
 0x2e3   : > { %v3705_v13 = vadd.f32 %v1930_v38, %v5122_v0  ;;  %v3737_v57 = vadd.f32 %v2156_v56, %v5126_v32  ;;  %v1932_v63 = vpop.f32.mrb[57].mxu0  ;;  %v2158_v52 = vpop.f32.mrb[57].mxu1  ;;  %2799 = vmatprep.subr.bf16.mxu0 %v5082_v2 }
 0x2e4   : > { %v3706_v14 = vadd.f32 %v1932_v63, %v5129_v35  ;;  %v3738_v36 = vadd.f32 %v2158_v52, %v5133_v49  ;;  %v1934_v58 = vpop.f32.mrb[58].mxu0  ;;  %v2160_v59 = vpop.f32.mrb[58].mxu1  ;;  %2748 = vmatprep.mubr.bf16.mxu0 %v2260_v5  ;;  %2861 = vmatprep.mubr.bf16.mxu1 %v2262_v54 }
 0x2e5   : > { %v3707_v15 = vadd.f32 %v1934_v58, %v5122_v0  ;;  %v3739_v34 = vadd.f32 %v2160_v59, %v5126_v32  ;;  %v1936_v1 = vpop.f32.mrb[59].mxu0  ;;  %v2162_v62 = vpop.f32.mrb[59].mxu1  ;;  %2749 = vmatmul.mubr.bf16.gmra.mrb[84].mxu0 %v2259_v9  ;;  %2862 = vmatmul.mubr.bf16.gmra.mrb[68].mxu1 %v2261_v17  ;;  %v2223_v40 = vmax.f32 %v3705_v13, 0.0  ;;  %v2225_v8 = vmax.f32 %v3737_v57, 0.0 }
 0x2e6   : > { %v3708_v25 = vadd.f32 %v1936_v1, %v5129_v35  ;;  %v3740_v2 = vadd.f32 %v2162_v62, %v5133_v49  ;;  %2800 = vmatpush1.bf16.msra.mxu0 %v5084_v18  ;;  %v2224_v23 = vmax.f32 %v3706_v14, 0.0  ;;  %v2226_v11 = vmax.f32 %v3738_v36, 0.0 }
 0x2e7   : > { %v2227_v16 = vmax.f32 %v3707_v15, 0.0  ;;  %v2229_v48 = vmax.f32 %v3739_v34, 0.0  ;;  %2801 = vmatprep.subr.bf16.mxu0 %v5088_v3 }
 0x2e8   : > { %v2228_v41 = vmax.f32 %v3708_v25, 0.0  ;;  %v2230_v51 = vmax.f32 %v3740_v2, 0.0 }
 0x2e9   : > { %v2263_v4 = vpack.c.bf16 %v2227_v16, %v2223_v40  ;;  %v2265_v33 = vpack.c.bf16 %v2229_v48, %v2225_v8 }
 0x2ea   : > { %v2264_v12 = vpack.c.bf16 %v2228_v41, %v2224_v23  ;;  %v2266_v21 = vpack.c.bf16 %v2230_v51, %v2226_v11  ;;  %2802 = vmatpush1.bf16.msra.mxu0 %v5090_v19  ;;  %v1940_v53 = vpop.f32.mrb[60].mxu0  ;;  %v2166_v43 = vpop.f32.mrb[60].mxu1 }
 0x2eb   : > { %v3709_v18 = vadd.f32 %v1940_v53, %v5122_v0  ;;  %v3741_v7 = vadd.f32 %v2166_v43, %v5126_v32  ;;  %v1942_v55 = vpop.f32.mrb[61].mxu0  ;;  %v2168_v44 = vpop.f32.mrb[61].mxu1  ;;  %2803 = vmatprep.subr.bf16.mxu0 %v5094_v20 }
 0x2ec   : > { %v3710_v3 = vadd.f32 %v1942_v55, %v5129_v35  ;;  %v3742_v37 = vadd.f32 %v2168_v44, %v5133_v49  ;;  %v1944_v61 = vpop.f32.mrb[62].mxu0  ;;  %v2170_v9 = vpop.f32.mrb[62].mxu1  ;;  %2758 = vmatprep.mubr.bf16.mxu0 %v2264_v12  ;;  %2871 = vmatprep.mubr.bf16.mxu1 %v2266_v21 }
 0x2ed   : > { %v3711_v19 = vadd.f32 %v1944_v61, %v5122_v0  ;;  %v3743_v17 = vadd.f32 %v2170_v9, %v5126_v32  ;;  %v1946_v5 = vpop.f32.mrb[63].mxu0  ;;  %v2172_v54 = vpop.f32.mrb[63].mxu1  ;;  %2759 = vmatmul.mubr.bf16.gmra.mrb[88].mxu0 %v2263_v4  ;;  %2872 = vmatmul.mubr.bf16.gmra.mrb[72].mxu1 %v2265_v33  ;;  %v2231_v56 = vmax.f32 %v3709_v18, 0.0  ;;  %v2233_v13 = vmax.f32 %v3741_v7, 0.0 }
 0x2ee   : > { %v3712_v38 = vadd.f32 %v1946_v5, %v5129_v35  ;;  %v3744_v20 = vadd.f32 %v2172_v54, %v5133_v49  ;;  %2804 = vmatpush1.bf16.msra.mxu0 %v5096_v24  ;;  %v2232_v52 = vmax.f32 %v3710_v3, 0.0  ;;  %v2234_v0 = vmax.f32 %v3742_v37, 0.0  ;;  %v4313_v24 = vld [vmem:[#allocation10 + $0x40] sm:$0xff]   ;;  %v4320_v35 = vld [vmem:[#allocation10 + $0x18] sm:$0xff]  }
 0x2ef   : > { %v2235_v57 = vmax.f32 %v3711_v19, 0.0  ;;  %v2237_v63 = vmax.f32 %v3743_v17, 0.0  ;;  %2805 = vmatprep.subr.bf16.mxu0 %v5100_v26  ;;  %v4314_v26 = vld [vmem:[#allocation10] sm:$0xff]   ;;  %3585 = vmatprep.subr.bf16.mxu1 %v4313_v24 }
 0x2f0   : > { %v2236_v14 = vmax.f32 %v3712_v38, 0.0  ;;  %v2238_v32 = vmax.f32 %v3744_v20, 0.0  ;;  %3586 = vmatpush3.bf16.msra.mxu1 %v4314_v26  ;;  %v4321_v49 = vld [vmem:[#allocation10 + $0x60] sm:$0xff]  }
 0x2f1   : > { %v2267_v36 = vpack.c.bf16 %v2235_v57, %v2231_v56  ;;  %v2269_v58 = vpack.c.bf16 %v2237_v63, %v2233_v13 }
 0x2f2   : > { %v2268_v59 = vpack.c.bf16 %v2236_v14, %v2232_v52  ;;  %v2270_v15 = vpack.c.bf16 %v2238_v32, %v2234_v0  ;;  %2806 = vmatpush1.bf16.msra.mxu0 %v5102_v27  ;;  %v4315_v27 = vld [vmem:[#allocation10 + $0x48] sm:$0xff]  }
 0x2f3   : > { %2807 = vmatprep.subr.bf16.mxu0 %v5106_v28  ;;  %v4316_v28 = vld [vmem:[#allocation10 + $0x8] sm:$0xff]   ;;  %3587 = vmatprep.subr.bf16.mxu1 %v4315_v27 }
 0x2f4   : > { %2768 = vmatprep.mubr.bf16.mxu0 %v2268_v59  ;;  %2881 = vmatprep.mubr.bf16.mxu1 %v2270_v15 }
 0x2f5   : > { %2769 = vmatmul.mubr.bf16.gmra.mrb[92].mxu0 %v2267_v36  ;;  %2882 = vmatmul.mubr.bf16.gmra.mrb[76].mxu1 %v2269_v58 }
 0x2f6   : > { %2808 = vmatpush1.bf16.msra.mxu0 %v5108_v29  ;;  %2811 = vmatprep.mubr.bf16.mxu0 %v5145_v39  ;;  %v4317_v29 = vld [vmem:[#allocation10 + $0x50] sm:$0xff]   ;;  %v4323_v39 = vld [vmem:[#allocation10 + $0x68] sm:$0xff]  }
 0x2f7   : > { %2809 = vmatprep.subr.bf16.mxu0 %v5112_v30  ;;  %3588 = vmatpush3.bf16.msra.mxu1 %v4316_v28  ;;  %v4318_v30 = vld [vmem:[#allocation10 + $0x10] sm:$0xff]  }
 0x2f8   : > { %3589 = vmatprep.subr.bf16.mxu1 %v4317_v29 }
 0x2fa   : > { %2810 = vmatpush1.bf16.msra.mxu0 %v5114_v31  ;;  %v4319_v31 = vld [vmem:[#allocation10 + $0x58] sm:$0xff]  }
 0x2fb   : > { %3590 = vmatpush3.bf16.msra.mxu1 %v4318_v30 }
 0x2fc   : > { %3591 = vmatprep.subr.bf16.mxu1 %v4319_v31 }
 0x2fd   : > { %2812 = vmatmul.mubr.bf16.vlgmr.msra.gmra.mrb[64].mxu0 %v5143_v10  ;;  %v4322_v10 = vld [vmem:[#allocation10 + $0x20] sm:$0xff]  }
 0x2fe   : > { %2821 = vmatprep.mubr.bf16.mxu0 %v5159_v42  ;;  %v4325_v42 = vld [vmem:[#allocation10 + $0x70] sm:$0xff]  }
 0x2ff   : > { %3592 = vmatpush3.bf16.msra.mxu1 %v4320_v35 }
 0x300   : > { %3593 = vmatprep.subr.bf16.mxu1 %v4321_v49 }
 0x303   : > { %3594 = vmatpush3.bf16.msra.mxu1 %v4322_v10 }
 0x304   : > { %3595 = vmatprep.subr.bf16.mxu1 %v4323_v39 }
 0x305   : > { %2822 = vmatmul.mubr.bf16.gmra.mrb[68].mxu0 %v5157_v50  ;;  %v4324_v50 = vld [vmem:[#allocation10 + $0x28] sm:$0xff]  }
 0x306   : > { %2831 = vmatprep.mubr.bf16.mxu0 %v5175_v46  ;;  %v4327_v46 = vld [vmem:[#allocation10 + $0x78] sm:$0xff]  }
 0x307   : > { %3596 = vmatpush3.bf16.msra.mxu1 %v4324_v50 }
 0x308   : > { %3597 = vmatprep.subr.bf16.mxu1 %v4325_v42 }
 0x30d   : > { %2832 = vmatmul.mubr.bf16.gmra.mrb[72].mxu0 %v5173_v6  ;;  %v4326_v6 = vld [vmem:[#allocation10 + $0x30] sm:$0xff]  }
 0x30e   : > { %2841 = vmatprep.mubr.bf16.mxu0 %v5191_v22  ;;  %3598 = vmatpush3.bf16.msra.mxu1 %v4326_v6  ;;  %v333_v22 = vld [vmem:[%s5415_s5 + $0x8] sm:$0x3] }
 0x30f   : > { %3599 = vmatprep.subr.bf16.mxu1 %v4327_v46  ;;  %v5258_v34 = vrot.slane %v333_v22, %v4869_v45  ;;  %v5261_v1 = vrot.slane %v333_v22, %v4875_v47 }
 0x315   : > { %2842 = vmatmul.mubr.bf16.gmra.mrb[76].mxu0 %v5189_v60  ;;  %v4328_v60 = vld [vmem:[#allocation10 + $0x38] sm:$0xff]  }
 0x316   : > { %3600 = vmatpush3.bf16.msra.mxu1 %v4328_v60 }
 0x3b0   : > { %v2740_v62 = vpop.f32.mrb[80].mxu0  ;;  %v2853_v25 = vpop.f32.mrb[64].mxu1 }
 0x3b1   : > { %v2741_v2 = vadd.f32 %v2740_v62, %v5258_v34  ;;  %v2742_v40 = vpop.f32.mrb[81].mxu0  ;;  %v2855_v8 = vpop.f32.mrb[65].mxu1 }
 0x3b2   : > { %v2743_v16 = vadd.f32 %v2742_v40, %v5261_v1  ;;  %v2744_v48 = vpop.f32.mrb[82].mxu0  ;;  %v2857_v23 = vpop.f32.mrb[66].mxu1 }
 0x3b3   : > { %v2854_v11 = vadd.f32 %v2853_v25, %v2741_v2  ;;  %v2745_v41 = vadd.f32 %v2744_v48, %v5258_v34  ;;  %v2746_v51 = vpop.f32.mrb[83].mxu0  ;;  %v2859_v4 = vpop.f32.mrb[67].mxu1 }
 0x3b4   : > { %v2856_v45 = vadd.f32 %v2855_v8, %v2743_v16  ;;  %v2747_v33 = vadd.f32 %v2746_v51, %v5261_v1 }
 0x3b5   : > { %v2858_v47 = vadd.f32 %v2857_v23, %v2745_v41  ;;  %v2908_v21 = vmax.f32 %v2854_v11, 0.0 }
 0x3b6   : > { %v2860_v12 = vadd.f32 %v2859_v4, %v2747_v33  ;;  %v2909_v43 = vmax.f32 %v2856_v45, 0.0 }
 0x3b7   : > { %v2910_v53 = vmax.f32 %v2858_v47, 0.0 }
 0x3b8   : > { %v2911_v18 = vmax.f32 %v2860_v12, 0.0  ;;  %v2750_v7 = vpop.f32.mrb[84].mxu0  ;;  %v2863_v55 = vpop.f32.mrb[68].mxu1 }
 0x3b9   : > { %v5267_v44 = vpack.c.bf16 %v2910_v53, %v2908_v21  ;;  %v2751_v3 = vadd.f32 %v2750_v7, %v5258_v34  ;;  %v2752_v37 = vpop.f32.mrb[85].mxu0  ;;  %v2865_v61 = vpop.f32.mrb[69].mxu1 }
 0x3ba   : > { %v5270_v9 = vpack.c.bf16 %v2911_v18, %v2909_v43  ;;  %v2753_v19 = vadd.f32 %v2752_v37, %v5261_v1  ;;  %v2754_v17 = vpop.f32.mrb[86].mxu0  ;;  %v2867_v5 = vpop.f32.mrb[70].mxu1 }
 0x3bb   : > { %v2864_v54 = vadd.f32 %v2863_v55, %v2751_v3  ;;  %v2755_v38 = vadd.f32 %v2754_v17, %v5258_v34  ;;  %v2756_v20 = vpop.f32.mrb[87].mxu0  ;;  %v2869_v56 = vpop.f32.mrb[71].mxu1 }
 0x3bc   : > { %v2866_v13 = vadd.f32 %v2865_v61, %v2753_v19  ;;  %v2757_v57 = vadd.f32 %v2756_v20, %v5261_v1 }
 0x3bd   : > { %v2868_v63 = vadd.f32 %v2867_v5, %v2755_v38  ;;  %v2912_v0 = vmax.f32 %v2864_v54, 0.0 }
 0x3be   : > { %v2870_v52 = vadd.f32 %v2869_v56, %v2757_v57  ;;  %v2913_v32 = vmax.f32 %v2866_v13, 0.0 }
 0x3bf   : > { %v2914_v14 = vmax.f32 %v2868_v63, 0.0 }
 0x3c0   : > { %v2915_v36 = vmax.f32 %v2870_v52, 0.0  ;;  %v2760_v58 = vpop.f32.mrb[88].mxu0  ;;  %v2873_v59 = vpop.f32.mrb[72].mxu1 }
 0x3c1   : > { %v5275_v15 = vpack.c.bf16 %v2914_v14, %v2912_v0  ;;  %v2761_v24 = vadd.f32 %v2760_v58, %v5258_v34  ;;  %v2762_v26 = vpop.f32.mrb[89].mxu0  ;;  %v2875_v27 = vpop.f32.mrb[73].mxu1 }
 0x3c2   : > { %v5278_v28 = vpack.c.bf16 %v2915_v36, %v2913_v32  ;;  %v2763_v29 = vadd.f32 %v2762_v26, %v5261_v1  ;;  %v2764_v30 = vpop.f32.mrb[90].mxu0  ;;  %v2877_v31 = vpop.f32.mrb[74].mxu1 }
 0x3c3   : > { %v2874_v35 = vadd.f32 %v2873_v59, %v2761_v24  ;;  %v2765_v49 = vadd.f32 %v2764_v30, %v5258_v34  ;;  %v2766_v10 = vpop.f32.mrb[91].mxu0  ;;  %v2879_v39 = vpop.f32.mrb[75].mxu1 }
 0x3c4   : > { %v2876_v50 = vadd.f32 %v2875_v27, %v2763_v29  ;;  %v2767_v42 = vadd.f32 %v2766_v10, %v5261_v1 }
 0x3c5   : > { %v2878_v6 = vadd.f32 %v2877_v31, %v2765_v49  ;;  %v2916_v60 = vmax.f32 %v2874_v35, 0.0 }
 0x3c6   : > { %v2880_v46 = vadd.f32 %v2879_v39, %v2767_v42  ;;  %v2917_v62 = vmax.f32 %v2876_v50, 0.0 }
 0x3c7   : > { %v2918_v22 = vmax.f32 %v2878_v6, 0.0 }
 0x3c8   : > { %v2919_v25 = vmax.f32 %v2880_v46, 0.0  ;;  %v2770_v2 = vpop.f32.mrb[92].mxu0  ;;  %v2883_v40 = vpop.f32.mrb[76].mxu1 }
 0x3c9   : > { %v5283_v8 = vpack.c.bf16 %v2918_v22, %v2916_v60  ;;  %v2771_v16 = vadd.f32 %v2770_v2, %v5258_v34  ;;  %v2772_v48 = vpop.f32.mrb[93].mxu0  ;;  %v2885_v23 = vpop.f32.mrb[77].mxu1 }
 0x3ca   : > { %v5286_v11 = vpack.c.bf16 %v2919_v25, %v2917_v62  ;;  %v2773_v41 = vadd.f32 %v2772_v48, %v5261_v1  ;;  %v2774_v51 = vpop.f32.mrb[94].mxu0  ;;  %v2887_v4 = vpop.f32.mrb[78].mxu1 }
 0x3cb   : > { %v2884_v45 = vadd.f32 %v2883_v40, %v2771_v16  ;;  %v2775_v33 = vadd.f32 %v2774_v51, %v5258_v34  ;;  %v2776_v47 = vpop.f32.mrb[95].mxu0  ;;  %v2889_v12 = vpop.f32.mrb[79].mxu1 }
 0x3cc   : > { %v2886_v21 = vadd.f32 %v2885_v23, %v2773_v41  ;;  %v2777_v53 = vadd.f32 %v2776_v47, %v5261_v1 }
 0x3cd   : > { %v2888_v43 = vadd.f32 %v2887_v4, %v2775_v33  ;;  %v2920_v7 = vmax.f32 %v2884_v45, 0.0 }
 0x3ce   : > { %v2890_v18 = vadd.f32 %v2889_v12, %v2777_v53  ;;  %v2921_v3 = vmax.f32 %v2886_v21, 0.0 }
 0x3cf   : > { %v2922_v55 = vmax.f32 %v2888_v43, 0.0 }
 0x3d0   : > { %v2923_v37 = vmax.f32 %v2890_v18, 0.0  ;;  %v2813_v61 = vpop.f32.mrb[64].mxu0 }
 0x3d1   : > { %v5291_v19 = vpack.c.bf16 %v2922_v55, %v2920_v7  ;;  %v3745_v17 = vadd.f32 %v2813_v61, %v5258_v34  ;;  %v2815_v5 = vpop.f32.mrb[65].mxu0 }
 0x3d2   : > { %v5294_v54 = vpack.c.bf16 %v2923_v37, %v2921_v3  ;;  %v3746_v38 = vadd.f32 %v2815_v5, %v5261_v1  ;;  %v2817_v20 = vpop.f32.mrb[66].mxu0 }
 0x3d3   : > { %v3747_v56 = vadd.f32 %v2817_v20, %v5258_v34  ;;  %v2819_v13 = vpop.f32.mrb[67].mxu0  ;;  %v2892_v63 = vmax.f32 %v3745_v17, 0.0 }
 0x3d4   : > { %v3748_v57 = vadd.f32 %v2819_v13, %v5261_v1  ;;  %v2893_v0 = vmax.f32 %v3746_v38, 0.0 }
 0x3d5   : > { %v2894_v52 = vmax.f32 %v3747_v56, 0.0 }
 0x3d6   : > { %v2895_v14 = vmax.f32 %v3748_v57, 0.0 }
 0x3d7   : > { %v2924_v32 = vpack.c.bf16 %v2894_v52, %v2892_v63 }
 0x3d8   : > { %v2925_v36 = vpack.c.bf16 %v2895_v14, %v2893_v0  ;;  %v2823_v58 = vpop.f32.mrb[68].mxu0 }
 0x3d9   : > { %v3749_v59 = vadd.f32 %v2823_v58, %v5258_v34  ;;  %v2825_v24 = vpop.f32.mrb[69].mxu0 }
 0x3da   : > { %v3750_v26 = vadd.f32 %v2825_v24, %v5261_v1  ;;  %v2827_v27 = vpop.f32.mrb[70].mxu0  ;;  %3106 = vmatprep.mubr.bf16.mxu1 %v2925_v36 }
 0x3db   : > { %v3751_v29 = vadd.f32 %v2827_v27, %v5258_v34  ;;  %v2829_v30 = vpop.f32.mrb[71].mxu0  ;;  %3107 = vmatmul.mubr.bf16.vlgmr.msra.gmra.mrb[80].mxu1 %v2924_v32  ;;  %v2896_v35 = vmax.f32 %v3749_v59, 0.0 }
 0x3dc   : > { %v3752_v31 = vadd.f32 %v2829_v30, %v5261_v1  ;;  %v2897_v10 = vmax.f32 %v3750_v26, 0.0 }
 0x3dd   : > { %v2898_v49 = vmax.f32 %v3751_v29, 0.0 }
 0x3de   : > { %v2899_v39 = vmax.f32 %v3752_v31, 0.0 }
 0x3df   : > { %v2926_v50 = vpack.c.bf16 %v2898_v49, %v2896_v35 }
 0x3e0   : > { %v2927_v42 = vpack.c.bf16 %v2899_v39, %v2897_v10  ;;  %v2833_v6 = vpop.f32.mrb[72].mxu0 }
 0x3e1   : > { %v3753_v46 = vadd.f32 %v2833_v6, %v5258_v34  ;;  %v2835_v60 = vpop.f32.mrb[73].mxu0 }
 0x3e2   : > { %v3754_v22 = vadd.f32 %v2835_v60, %v5261_v1  ;;  %v2837_v62 = vpop.f32.mrb[74].mxu0  ;;  %3114 = vmatprep.mubr.bf16.mxu1 %v2927_v42 }
 0x3e3   : > { %v3755_v25 = vadd.f32 %v2837_v62, %v5258_v34  ;;  %v2839_v2 = vpop.f32.mrb[75].mxu0  ;;  %3115 = vmatmul.mubr.bf16.gmra.mrb[84].mxu1 %v2926_v50  ;;  %v2900_v16 = vmax.f32 %v3753_v46, 0.0 }
 0x3e4   : > { %v3756_v40 = vadd.f32 %v2839_v2, %v5261_v1  ;;  %v2901_v23 = vmax.f32 %v3754_v22, 0.0 }
 0x3e5   : > { %v2902_v48 = vmax.f32 %v3755_v25, 0.0 }
 0x3e6   : > { %v2903_v41 = vmax.f32 %v3756_v40, 0.0 }
 0x3e7   : > { %v2928_v51 = vpack.c.bf16 %v2902_v48, %v2900_v16 }
 0x3e8   : > { %v2929_v4 = vpack.c.bf16 %v2903_v41, %v2901_v23  ;;  %v2843_v45 = vpop.f32.mrb[76].mxu0 }
 0x3e9   : > { %v3757_v33 = vadd.f32 %v2843_v45, %v5258_v34  ;;  %v2845_v47 = vpop.f32.mrb[77].mxu0 }
 0x3ea   : > { %v3758_v12 = vadd.f32 %v2845_v47, %v5261_v1  ;;  %v2847_v21 = vpop.f32.mrb[78].mxu0  ;;  %3122 = vmatprep.mubr.bf16.mxu1 %v2929_v4 }
 0x3eb   : > { %v3759_v53 = vadd.f32 %v2847_v21, %v5258_v34  ;;  %v2849_v43 = vpop.f32.mrb[79].mxu0  ;;  %3123 = vmatmul.mubr.bf16.gmra.mrb[88].mxu1 %v2928_v51  ;;  %v2904_v7 = vmax.f32 %v3757_v33, 0.0 }
 0x3ec   : > { %v3760_v18 = vadd.f32 %v2849_v43, %v5261_v1  ;;  %v2905_v3 = vmax.f32 %v3758_v12, 0.0  ;;  %v5323_v1 = vld [vmem:[%s5415_s5 + $0xa] ss:$0 sm:$0xff] }
 0x3ed   : > { %v2906_v55 = vmax.f32 %v3759_v53, 0.0 }
 0x3ee   : > { %v2907_v37 = vmax.f32 %v3760_v18, 0.0 }
 0x3ef   : > { %v2930_v61 = vpack.c.bf16 %v2906_v55, %v2904_v7 }
 0x3f0   : > { %v2931_v17 = vpack.c.bf16 %v2907_v37, %v2905_v3 }
 0x3f2   : > { %3130 = vmatprep.mubr.bf16.mxu1 %v2931_v17 }
 0x3f3   : > { %3131 = vmatmul.mubr.bf16.gmra.mrb[92].mxu1 %v2930_v61 }
 0x3f4   : > { %3138 = vmatprep.mubr.bf16.mxu1 %v5270_v9 }
 0x3fb   : > { %3139 = vmatmul.mubr.bf16.gmra.mrb[96].mxu1 %v5267_v44 }
 0x3fc   : > { %3146 = vmatprep.mubr.bf16.mxu1 %v5278_v28 }
 0x403   : > { %3147 = vmatmul.mubr.bf16.gmra.mrb[100].mxu1 %v5275_v15 }
 0x404   : > { %3154 = vmatprep.mubr.bf16.mxu1 %v5286_v11 }
 0x40b   : > { %3155 = vmatmul.mubr.bf16.gmra.mrb[104].mxu1 %v5283_v8 }
 0x40c   : > { %3162 = vmatprep.mubr.bf16.mxu1 %v5294_v54 }
 0x413   : > { %3163 = vmatmul.mubr.bf16.gmra.mrb[108].mxu1 %v5291_v19 }
 0x4ae   : > { %v3601_v34 = vpop.f32.mrb[80].mxu1 }
 0x4af   : > { %v3602_v44 = vpop.f32.mrb[81].mxu1 }
 0x4b0   : > { %v3603_v9 = vadd.f32 %v3602_v44, %v3601_v34  ;;  %v3604_v28 = vpop.f32.mrb[82].mxu1 }
 0x4b1   : > { %v3605_v5 = vpop.f32.mrb[83].mxu1 }
 0x4b2   : > { %v3109_v15 = vadd.f32 %v3603_v9, %v5323_v1  ;;  %v3606_v11 = vadd.f32 %v3605_v5, %v3604_v28 }
 0x4b4   : > { %3171 = vst [vmem:[%s5326_s15] sm:$0xff] %v3109_v15  ;;  %v3112_v8 = vadd.f32 %v3606_v11, %v5323_v1 }
 0x4b6   : > { %3172 = vst [vmem:[%s5326_s15 + $0x8] sm:$0xff] %v3112_v8  ;;  %v3607_v19 = vpop.f32.mrb[84].mxu1 }
 0x4b7   : > { %v3608_v54 = vpop.f32.mrb[85].mxu1 }
 0x4b8   : > { %v3609_v38 = vadd.f32 %v3608_v54, %v3607_v19  ;;  %v3610_v20 = vpop.f32.mrb[86].mxu1 }
 0x4b9   : > { %v3611_v56 = vpop.f32.mrb[87].mxu1 }
 0x4ba   : > { %v3117_v13 = vadd.f32 %v3609_v38, %v5323_v1  ;;  %v3612_v57 = vadd.f32 %v3611_v56, %v3610_v20 }
 0x4bc   : > { %3173 = vst [vmem:[%s5326_s15 + $0x10] sm:$0xff] %v3117_v13  ;;  %v3120_v63 = vadd.f32 %v3612_v57, %v5323_v1 }
 0x4be   : > { %3174 = vst [vmem:[%s5326_s15 + $0x18] sm:$0xff] %v3120_v63  ;;  %v3613_v52 = vpop.f32.mrb[88].mxu1 }
 0x4bf   : > { %v3614_v0 = vpop.f32.mrb[89].mxu1 }
 0x4c0   : > { %v3615_v14 = vadd.f32 %v3614_v0, %v3613_v52  ;;  %v3616_v32 = vpop.f32.mrb[90].mxu1 }
 0x4c1   : > { %v3617_v36 = vpop.f32.mrb[91].mxu1 }
 0x4c2   : > { %v3125_v58 = vadd.f32 %v3615_v14, %v5323_v1  ;;  %v3618_v59 = vadd.f32 %v3617_v36, %v3616_v32 }
 0x4c4   : > { %3175 = vst [vmem:[%s5326_s15 + $0x20] sm:$0xff] %v3125_v58  ;;  %v3128_v24 = vadd.f32 %v3618_v59, %v5323_v1 }
 0x4c6   : > { %3176 = vst [vmem:[%s5326_s15 + $0x28] sm:$0xff] %v3128_v24  ;;  %v3619_v26 = vpop.f32.mrb[92].mxu1 }
 0x4c7   : > { %v3620_v27 = vpop.f32.mrb[93].mxu1 }
 0x4c8   : > { %v3621_v29 = vadd.f32 %v3620_v27, %v3619_v26  ;;  %v3622_v30 = vpop.f32.mrb[94].mxu1 }
 0x4c9   : > { %v3623_v31 = vpop.f32.mrb[95].mxu1 }
 0x4ca   : > { %v3133_v35 = vadd.f32 %v3621_v29, %v5323_v1  ;;  %v3624_v49 = vadd.f32 %v3623_v31, %v3622_v30 }
 0x4cc   : > { %3177 = vst [vmem:[%s5326_s15 + $0x30] sm:$0xff] %v3133_v35  ;;  %v3136_v10 = vadd.f32 %v3624_v49, %v5323_v1 }
 0x4ce   : > { %3178 = vst [vmem:[%s5326_s15 + $0x38] sm:$0xff] %v3136_v10  ;;  %v3625_v39 = vpop.f32.mrb[96].mxu1 }
 0x4cf   : > { %v3626_v50 = vpop.f32.mrb[97].mxu1 }
 0x4d0   : > { %v3627_v42 = vadd.f32 %v3626_v50, %v3625_v39  ;;  %v3628_v6 = vpop.f32.mrb[98].mxu1 }
 0x4d1   : > { %v3629_v46 = vpop.f32.mrb[99].mxu1 }
 0x4d2   : > { %v3141_v60 = vadd.f32 %v3627_v42, %v5323_v1  ;;  %v3630_v22 = vadd.f32 %v3629_v46, %v3628_v6 }
 0x4d4   : > { %3179 = vst [vmem:[%s5326_s15 + $0x40] sm:$0xff] %v3141_v60  ;;  %v3144_v62 = vadd.f32 %v3630_v22, %v5323_v1 }
 0x4d6   : > { %3180 = vst [vmem:[%s5326_s15 + $0x48] sm:$0xff] %v3144_v62  ;;  %v3631_v25 = vpop.f32.mrb[100].mxu1 }
 0x4d7   : > { %v3632_v2 = vpop.f32.mrb[101].mxu1 }
 0x4d8   : > { %v3633_v40 = vadd.f32 %v3632_v2, %v3631_v25  ;;  %v3634_v16 = vpop.f32.mrb[102].mxu1 }
 0x4d9   : > { %v3635_v48 = vpop.f32.mrb[103].mxu1 }
 0x4da   : > { %v3149_v23 = vadd.f32 %v3633_v40, %v5323_v1  ;;  %v3636_v41 = vadd.f32 %v3635_v48, %v3634_v16 }
 0x4dc   : > { %3181 = vst [vmem:[%s5326_s15 + $0x50] sm:$0xff] %v3149_v23  ;;  %v3152_v51 = vadd.f32 %v3636_v41, %v5323_v1 }
 0x4de   : > { %3182 = vst [vmem:[%s5326_s15 + $0x58] sm:$0xff] %v3152_v51  ;;  %v3637_v4 = vpop.f32.mrb[104].mxu1 }
 0x4df   : > { %v3638_v45 = vpop.f32.mrb[105].mxu1 }
 0x4e0   : > { %v3639_v33 = vadd.f32 %v3638_v45, %v3637_v4  ;;  %v3640_v47 = vpop.f32.mrb[106].mxu1 }
 0x4e1   : > { %v3641_v12 = vpop.f32.mrb[107].mxu1 }
 0x4e2   : > { %v3157_v21 = vadd.f32 %v3639_v33, %v5323_v1  ;;  %v3642_v53 = vadd.f32 %v3641_v12, %v3640_v47 }
 0x4e4   : > { %3183 = vst [vmem:[%s5326_s15 + $0x60] sm:$0xff] %v3157_v21  ;;  %v3160_v43 = vadd.f32 %v3642_v53, %v5323_v1 }
 0x4e6   : > { %3184 = vst [vmem:[%s5326_s15 + $0x68] sm:$0xff] %v3160_v43  ;;  %v3643_v18 = vpop.f32.mrb[108].mxu1 }
 0x4e7   : > { %v3644_v7 = vpop.f32.mrb[109].mxu1 }
 0x4e8   : > { %v3645_v55 = vadd.f32 %v3644_v7, %v3643_v18  ;;  %v3646_v3 = vpop.f32.mrb[110].mxu1 }
 0x4e9   : > { %v3647_v37 = vpop.f32.mrb[111].mxu1 }
 0x4ea   : > { %v3165_v61 = vadd.f32 %v3645_v55, %v5323_v1  ;;  %v3648_v17 = vadd.f32 %v3647_v37, %v3646_v3 }
 0x4ec   : > { %3185 = vst [vmem:[%s5326_s15 + $0x70] sm:$0xff] %v3165_v61  ;;  %v3168_v34 = vadd.f32 %v3648_v17, %v5323_v1 }
 0x4ee   : > { %3186 = vst [vmem:[%s5326_s15 + $0x78] sm:$0xff] %v3168_v34 }
 0x4ef   : > { %4484 = shalt.err (!%p4481_p13)
}
 0x4f0   : > { %s4485_s20 = scalar_lea.hbm %s5361_s27, 2048  ;;  %s4489_s18 = scalar_lea.hbm %s5416_s6, 4096 }
 0x4f1   : > { %p4486_p9 = scmp.ne.s32.totalorder %s5361_s27, %s4485_s20  ;;  %p4490_p6 = scmp.lt.u32.totalorder %s5361_s27, %s5416_s6 }
 0x4f2   : > { %p4491_p4 = scmp.lt.u32.totalorder %s4489_s18, %s4485_s20  ;;  %p4493_p10 = scmp.lt.u32.totalorder %s4485_s20, %s5361_s27 }
 0x4f3   : > { %p4487_p0 = pnand %p4486_p9, %p4772_p3 }
 0x4f4   : > { %p4492_p8 = por %p4491_p4, %p4490_p6 }
 0x4f5   : > { %p4488_p11 = pneg %p4487_p0 }
 0x4f6   : > { %p4494_p5 = por %p4493_p10, %p4492_p8 }
 0x4f8   : > { %p4495_p7 = pnand %p4494_p5, %p4488_p11 }
 0x4fa   : > { %4498 = shalt.err (!%p4495_p7)
}
 0x4fb   : > { %s4560_s13 = smov 128   ;;  %s4561_s17 = smov 8  }
 0x4fc   : > { %3891 = dma.vmem_to_hbm [thread:$0]  (%p4772_p3), %s5363_s7, 2048, %s5361_s27, %s3188_s25, %s4560_s13, %s4560_s13, %s4561_s17  }
 0x4fd PF: > { %s3216_s29 = sand.u32 1, %s4533_s21   ;;  %p5438_p12 = scmp.ne.s32.totalorder %s5423_s28, 0 }
 0x4fe   : > { %p5439_p1 = scmp.ge.s32.totalorder %s4545_s24, 2  ;;  %s3217_s19 = scalar_lea.sflag [#allocation4], %s3216_s29 }
 0x500   : > { %p3911_p2 = pnand %p5439_p1, %p5438_p12 }
 0x502   : > { %4528 = dma.done.wait (!%p3911_p2), %s3217_s19, 2048  }
 0x503   : > { %4530 = vsyncadd (!%p3911_p2), %s3217_s19, 4294965248  ;;  %p21_p13 = scmp.ge.s32.totalorder %s4759_s30, 4   ;;  %s5440_s21 = smov %s4537_s22 }
 0x504   : > { %s5441_s22 = smov %s4541_s23  ;;  %s5442_s23 = smov %s4768_s14 }
 0x505   : > { %s5443_s24 = smov %s4759_s30  ;;  %23 = sbr.rel (!%p21_p13) target bundleno = 7 (0x7), region = 105 }
 0x50c   :  { %3222 = vsyncpa [#allocation3], 1 }
 0x50d   :  { %3224 = vsyncpa [#allocation3 + $0x1], 1 }
 0x50e   :  { %3225 = vsyncpa [#allocation6], 1 }
 0x50f   :  { %3226 = vsyncpa [#allocation9], 1 }
 0x510   :  { %3227 = vsyncpa [#allocation4], 1 }
 0x511   :  { %3229 = vsyncpa [#allocation4 + $0x1], 1 }

</bundles_post_ra>
